<compile_context>
chip_gen: v7x
topology: tpu7x:2x2x1
jax: 0.10.0
libtpu: 0.0.40
codegen_flags: <defaults>
</compile_context>

<pallas_src>
import functools

import jax
import jax.numpy as jnp
from jax.experimental import pallas as pl
from jax.experimental.pallas import tpu as pltpu

D = 64        # Data_Vector_Length
C = 32        # centord_Vector_Length
K = 4         # prototype classes
H = 800       # DriftPointNet hidden width (logical, fixed by the module)
HP = 896      # H rounded up to a 128-lane multiple (w2 output dim only)
TB = 8        # samples per grid step (raise to 64-256 for large query batches)
DEQ_CHUNK = 160   # row chunk for the one-time int8->bf16 dequant (multiple of 32)

# accumulator lane layout (VMEM scratch carried across grid steps)
_A_CORRECT = 0
_A_HIT0 = 1       # lanes 1..4  per-class hits
_A_CNT0 = 8       # lanes 8..11 per-class counts
_A_SU = 16        # sum((locy - pre)^2)
_A_SY = 17        # sum(locy)
_A_SY2 = 18       # sum(locy^2)

# packed (1, 128) output lane layout
_O_ACC_VAL = 0
_O_CLASS0 = 1     # lanes 1..4 per-class accuracy
_O_LOC_ACC = 5


# ----------------------------------------------------------------------------
# Fused kernel: FAN encoder -> prototype classification metrics ->
#               DriftPointNet MLP -> R^2 location accuracy (accumulated).
# ----------------------------------------------------------------------------
def joint_kernel(n_total,
                 datax_ref, datay_ref, locy_ref,
                 waws_ref, wc12_ref, pt_ref,
                 w1xc_ref, w2q_ref, small_ref,
                 out_ref, w2bf_ref, acc_ref):
    step = pl.program_id(0)
    lane = jax.lax.broadcasted_iota(jnp.int32, (1, 128), 1)

    # ---- one-time init: zero accumulator, dequantize mlp2 int8 -> bf16 ------
    @pl.when(step == 0)
    def _():
        acc_ref[...] = jnp.zeros_like(acc_ref)
        for r0 in range(0, H, DEQ_CHUNK):          # chunked to bound VMEM temps
            w2bf_ref[r0:r0 + DEQ_CHUNK, :] = (
                w2q_ref[r0:r0 + DEQ_CHUNK, :]
                .astype(jnp.float32).astype(jnp.bfloat16))

    # ---- packed small parameters (one DMA) ----------------------------------
    ba = small_ref[0:1, 0:3 * D]     # attn bias           (1, 192)
    bs = small_ref[1:2, 0:3 * D]     # W_s bias            (1, 192)
    bc = small_ref[2:3, 0:C]         # attn_combine bias   (1, 32)
    b1 = small_ref[3:4, 0:H]         # mlp1 bias           (1, 800)
    b2 = small_ref[4:5, :]           # mlp2 bias           (1, 896) pad lanes 0
    w3 = small_ref[5:6, :]           # out-layer weights   (1, 896) pad lanes 0
    b3 = small_ref[6:7, 0:1]         # out-layer bias      (1, 1)
    w2s = small_ref[7:8, :]          # mlp2 dequant scale  (1, 896) pad lanes 0

    x = datax_ref[...]                               # (TB, D) f32
    x_bf = x.astype(jnp.bfloat16)

    # ---- FAN encoder ---------------------------------------------------------
    wa = waws_ref[0:D, :]                            # (D, 3D)
    ws = waws_ref[D:2 * D, :]                        # (D, 3D)
    attn = jnp.dot(x_bf, wa, preferred_element_type=jnp.float32) + ba
    m = jnp.max(attn, axis=1, keepdims=True)
    e = jnp.exp(attn - m)
    attn_w = e / jnp.sum(e, axis=1, keepdims=True)   # exact divide (parity)
    q_s = jnp.maximum(
        jnp.dot(x_bf, ws, preferred_element_type=jnp.float32) + bs, 0.0)
    applied = attn_w * q_s
    wc1 = wc12_ref[0:3 * D, :]                       # q_s half of attn_combine
    wc2 = wc12_ref[3 * D:6 * D, :]                   # applied half
    emb = (jnp.dot(q_s.astype(jnp.bfloat16), wc1, preferred_element_type=jnp.float32)
           + jnp.dot(applied.astype(jnp.bfloat16), wc2, preferred_element_type=jnp.float32)
           + bc)                                     # (TB, C) f32

    # ---- prototypical classification metrics --------------------------------
    # squared euclidean distances; argmax(log_softmax(-d)) == argmax(-d)
    pt = pt_ref[...]                                 # (C, K)
    x2 = jnp.sum(emb * emb, axis=1, keepdims=True)
    p2 = jnp.sum(pt * pt, axis=0, keepdims=True)
    xp = jnp.dot(emb, pt, preferred_element_type=jnp.float32)
    neg = -(x2 + p2 - 2.0 * xp)                      # (TB, K)

    col = jax.lax.broadcasted_iota(jnp.int32, (TB, K), 1)
    row_max = jnp.max(neg, axis=1, keepdims=True)
    pred = jnp.min(jnp.where(neg >= row_max, col, K),
                   axis=1, keepdims=True)            # first argmax, (TB,1) int32

    y = datay_ref[...]                               # (TB, 1) int32
    correct = (pred == y).astype(jnp.float32)
    n_correct = jnp.sum(correct)
    hits, cnts = [], []
    for c in range(K):                               # static unroll, K = 4
        mask = (y == c).astype(jnp.float32)
        cnts.append(jnp.sum(mask))
        hits.append(jnp.sum(correct * mask))

    # ---- DriftPointNet + R^2 partial sums ------------------------------------
    w1x = w1xc_ref[0:D, :]                           # (D, H)
    w1c = w1xc_ref[D:D + C, :]                       # (C, H)
    h1 = jnp.maximum(
        jnp.dot(x_bf, w1x, preferred_element_type=jnp.float32)
        + jnp.dot(emb.astype(jnp.bfloat16), w1c, preferred_element_type=jnp.float32)
        + b1, 0.0)                                   # (TB, H)
    h2 = jnp.maximum(
        jnp.dot(h1.astype(jnp.bfloat16), w2bf_ref[...],
                preferred_element_type=jnp.float32) * w2s
        + b2, 0.0)                                   # (TB, HP); pad lanes stay 0
    pre = jnp.sum(h2 * w3, axis=1, keepdims=True) + b3   # (TB, 1)

    locy = locy_ref[...]                             # (TB, 1)
    diff = locy - pre
    su = jnp.sum(diff * diff)
    sy = jnp.sum(locy)
    sy2 = jnp.sum(locy * locy)

    # ---- accumulate per-step partial sums into the resident scratch ---------
    contrib = jnp.where(lane == _A_CORRECT, n_correct, 0.0)
    for c in range(K):
        contrib = jnp.where(lane == _A_HIT0 + c, hits[c], contrib)
        contrib = jnp.where(lane == _A_CNT0 + c, cnts[c], contrib)
    contrib = jnp.where(lane == _A_SU, su, contrib)
    contrib = jnp.where(lane == _A_SY, sy, contrib)
    contrib = jnp.where(lane == _A_SY2, sy2, contrib)
    acc_ref[...] += contrib

    # ---- finalize metrics on the last grid step ------------------------------
    @pl.when(step == pl.num_programs(0) - 1)
    def _():
        acc = acc_ref[...]

        def get(i):
            return jnp.sum(jnp.where(lane == i, acc, 0.0))

        inv_n = 1.0 / n_total
        acc_val = get(_A_CORRECT) * inv_n
        su_t = get(_A_SU)
        sy_t = get(_A_SY)
        sy2_t = get(_A_SY2)
        v = sy2_t - sy_t * sy_t * inv_n              # sum((locy - mean)^2)
        loc_acc = 1.0 - su_t / v

        out = jnp.where(lane == _O_ACC_VAL, acc_val, 0.0)
        for c in range(K):
            # NaN when a class is absent from the batch, matching the reference
            out = jnp.where(lane == _O_CLASS0 + c,
                            get(_A_HIT0 + c) / get(_A_CNT0 + c), out)
        out = jnp.where(lane == _O_LOC_ACC, loc_acc, out)
        out_ref[...] = out


# ----------------------------------------------------------------------------
# Full Joint_PredictionVer forward
# ----------------------------------------------------------------------------
@jax.jit
def joint_prediction_forward(params, datax, datay, locy):
    n = datax.shape[0]
    assert n % TB == 0, "batch must be a multiple of TB"
    nb = n // TB

    const = lambda i: (0, 0)     # constant index_map -> weights stay VMEM-resident
    grid_spec = pltpu.PrefetchScalarGridSpec(
        num_scalar_prefetch=0,
        grid=(nb,),
        in_specs=[
            pl.BlockSpec((TB, D), lambda i: (i, 0)),      # datax tile
            pl.BlockSpec((TB, 1), lambda i: (i, 0)),      # datay tile (int32)
            pl.BlockSpec((TB, 1), lambda i: (i, 0)),      # locy tile
            pl.BlockSpec((2 * D, 3 * D), const),          # wa | ws       (bf16)
            pl.BlockSpec((6 * D, C), const),              # attn_combine  (bf16)
            pl.BlockSpec((C, K), const),                  # prototypes    (f32)
            pl.BlockSpec((D + C, H), const),              # mlp1          (bf16)
            pl.BlockSpec((H, HP), const),                 # mlp2          (int8)
            pl.BlockSpec((8, HP), const),                 # packed biases/scales
        ],
        out_specs=pl.BlockSpec((1, 128), const),
        scratch_shapes=[
            pltpu.VMEM((H, HP), jnp.bfloat16),            # dequantized mlp2
            pltpu.VMEM((1, 128), jnp.float32),            # metric accumulator
        ],
    )
    out = pl.pallas_call(
        functools.partial(joint_kernel, float(n)),
        out_shape=jax.ShapeDtypeStruct((1, 128), jnp.float32),
        grid_spec=grid_spec,
        # The batch axis carries the metric accumulator and the dequantized
        # weight scratch, so it must be a sequential ("arbitrary") axis.
        compiler_params=pltpu.CompilerParams(
            dimension_semantics=("arbitrary",)),
    )(datax, datay, locy,
      params['wa_ws'], params['wc12'], params['prototypes_t'],
      params['w1xc'], params['w2_q'], params['small'])
    return out[0, :8]


def unpack_metrics(row):
    acc_list = [float(row[_O_CLASS0 + c]) for c in range(K)]
    return acc_list, float(row[_O_ACC_VAL]), float(row[_O_LOC_ACC])


# ----------------------------------------------------------------------------
# Deterministic parameter construction.
# w2 (mlp2) is quantized per-output-channel to int8; its output dim is padded
# to HP=896 with zero columns (scale/bias/w3 padding lanes are zero too, so
# the math is identical to the unpadded 800-wide net).
# ----------------------------------------------------------------------------
def make_params(key):
    ks = jax.random.split(key, 13)

    def lin_w(k, fan_in, fan_out):
        scale = 1.0 / jnp.sqrt(jnp.float32(fan_in))
        return scale * jax.random.normal(k, (fan_in, fan_out), jnp.float32)

    def lin_b(k, fan_out):
        return 0.01 * jax.random.normal(k, (fan_out,), jnp.float32)

    wa = lin_w(ks[0], D, 3 * D); ba = lin_b(ks[1], 3 * D)
    ws = lin_w(ks[2], D, 3 * D); bs = lin_b(ks[3], 3 * D)
    wc = lin_w(ks[4], 6 * D, C); bc = lin_b(ks[5], C)          # attn_combine
    pt = jax.random.normal(ks[6], (C, K), jnp.float32)         # synthetic centroids^T
    w1 = lin_w(ks[7], D + C, H); b1 = lin_b(ks[8], H)          # mlp1 (cat(datax, emb))
    w2 = lin_w(ks[9], H, H);     b2 = lin_b(ks[10], H)         # mlp2
    w3 = lin_w(ks[11], H, 1);    b3 = lin_b(ks[12], 1)         # out layer

    # per-output-channel int8 quantization of mlp2
    amax = jnp.max(jnp.abs(w2), axis=0, keepdims=True)         # (1, H)
    w2_scale = jnp.maximum(amax / 127.0, 1e-12)
    w2_q = jnp.clip(jnp.round(w2 / w2_scale), -127.0, 127.0).astype(jnp.int8)
    w2_q = jnp.pad(w2_q, ((0, 0), (0, HP - H)))                # (H, HP) int8

    # packed small-parameter buffer (one DMA): rows = ba, bs, bc, b1, b2, w3, b3, scale
    small = jnp.zeros((8, HP), jnp.float32)
    small = small.at[0, :3 * D].set(ba)
    small = small.at[1, :3 * D].set(bs)
    small = small.at[2, :C].set(bc)
    small = small.at[3, :H].set(b1)
    small = small.at[4, :H].set(b2)
    small = small.at[5, :H].set(w3[:, 0])
    small = small.at[6, 0].set(b3[0])
    small = small.at[7, :H].set(w2_scale[0])

    return {
        'wa_ws': jnp.concatenate([wa, ws], axis=0).astype(jnp.bfloat16),   # (2D, 3D)
        'wc12': wc.astype(jnp.bfloat16),                                   # (6D, C)
        'prototypes_t': pt,                                                # (C, K)
        'w1xc': w1.astype(jnp.bfloat16),                                   # (D+C, H)
        'w2_q': w2_q,                                                      # (H, HP) int8
        'small': small,                                                    # (8, HP) f32
    }


if __name__ == "__main__":
    root = jax.random.PRNGKey(0)
    kp, kx, kl = jax.random.split(root, 3)

    params = make_params(kp)

    N = 32                                                   # small demo batch: 4 tiles of TB=8
    datax = jax.random.normal(kx, (N, D), jnp.float32)
    # host-side data prep (reshape / dtype) — kept out of the jitted wrapper
    datay = jnp.tile(jnp.arange(K, dtype=jnp.int32), N // K).reshape(N, 1)  # every class present
    locy = jax.random.uniform(kl, (N, 1), jnp.float32)       # normalized drift location

    row = joint_prediction_forward(params, datax, datay, locy)
    row = jax.block_until_ready(row)
    acc_list, acc_val, loc_acc = unpack_metrics(row)
    print("KERNEL_OK")
</pallas_src>

<mosaic_0001>
module attributes {stable_mosaic.version = 11 : i64} {
  func.func @joint_kernel(%arg0: i32, %arg1: memref<8x64xf32, #tpu.memory_space<vmem>>, %arg2: memref<8x1xi32, #tpu.memory_space<vmem>>, %arg3: memref<8x1xf32, #tpu.memory_space<vmem>>, %arg4: memref<128x192xbf16, #tpu.memory_space<vmem>>, %arg5: memref<384x32xbf16, #tpu.memory_space<vmem>>, %arg6: memref<32x4xf32, #tpu.memory_space<vmem>>, %arg7: memref<96x800xbf16, #tpu.memory_space<vmem>>, %arg8: memref<800x896xi8, #tpu.memory_space<vmem>>, %arg9: memref<8x896xf32, #tpu.memory_space<vmem>>, %arg10: memref<1x128xf32, #tpu.memory_space<vmem>>, %arg11: memref<800x896xbf16, #tpu.memory_space<vmem>>, %arg12: memref<1x128xf32, #tpu.memory_space<vmem>>) attributes {dimension_semantics = [#tpu.dimension_semantics<arbitrary>], iteration_bounds = array<i64: 4>, scalar_prefetch = 0 : i64, scratch_operands = 2 : i64, tpu.core_type = #tpu.core_type<tc>, window_params = [{transform_indices = @transform_0, window_bounds = array<i64: 8, 64>}, {transform_indices = @transform_1, window_bounds = array<i64: 8, 1>}, {transform_indices = @transform_2, window_bounds = array<i64: 8, 1>}, {pipeline_mode = #tpu.pipeline_mode<synchronous>, transform_indices = @transform_3, window_bounds = array<i64: 128, 192>}, {pipeline_mode = #tpu.pipeline_mode<synchronous>, transform_indices = @transform_4, window_bounds = array<i64: 384, 32>}, {pipeline_mode = #tpu.pipeline_mode<synchronous>, transform_indices = @transform_5, window_bounds = array<i64: 32, 4>}, {pipeline_mode = #tpu.pipeline_mode<synchronous>, transform_indices = @transform_6, window_bounds = array<i64: 96, 800>}, {pipeline_mode = #tpu.pipeline_mode<synchronous>, transform_indices = @transform_7, window_bounds = array<i64: 800, 896>}, {pipeline_mode = #tpu.pipeline_mode<synchronous>, transform_indices = @transform_8, window_bounds = array<i64: 8, 896>}, {pipeline_mode = #tpu.pipeline_mode<synchronous>, transform_indices = @transform_9, window_bounds = array<i64: 1, 128>}]} {
    %0 = tpu.iota {dimensions = array<i32: 1>} : vector<1x128xi32>
    %c0_i32 = arith.constant 0 : i32
    %1 = arith.cmpi eq, %arg0, %c0_i32 : i32
    %2 = arith.extui %1 : i1 to i32
    %c0_i32_0 = arith.constant 0 : i32
    %3 = arith.cmpi ne, %2, %c0_i32_0 : i32
    scf.if %3 {
      %cst_73 = arith.constant 0.000000e+00 : f32
      %224 = vector.broadcast %cst_73 : f32 to vector<1x128xf32>
      %c0_74 = arith.constant 0 : index
      %c0_75 = arith.constant 0 : index
      %225 = vector.load %arg12[%c0_74, %c0_75] : memref<1x128xf32, #tpu.memory_space<vmem>>, vector<1x128xf32>
      tpu.vector_store %arg12[%c0_74, %c0_75], %224 {strides = array<i32>} : memref<1x128xf32, #tpu.memory_space<vmem>>, vector<1x128xf32>,
      %c0_76 = arith.constant 0 : index
      %c0_77 = arith.constant 0 : index
      %226 = vector.load %arg8[%c0_76, %c0_77] : memref<800x896xi8, #tpu.memory_space<vmem>>, vector<160x896xi8>
      %227 = arith.sitofp %226 : vector<160x896xi8> to vector<160x896xf32>
      %228 = arith.truncf %227 : vector<160x896xf32> to vector<160x896xbf16>
      %c0_78 = arith.constant 0 : index
      %c0_79 = arith.constant 0 : index
      %229 = vector.load %arg11[%c0_78, %c0_79] : memref<800x896xbf16, #tpu.memory_space<vmem>>, vector<160x896xbf16>
      tpu.vector_store %arg11[%c0_78, %c0_79], %228 {strides = array<i32>} : memref<800x896xbf16, #tpu.memory_space<vmem>>, vector<160x896xbf16>,
      %c160 = arith.constant 160 : index
      %c0_80 = arith.constant 0 : index
      %230 = vector.load %arg8[%c160, %c0_80] : memref<800x896xi8, #tpu.memory_space<vmem>>, vector<160x896xi8>
      %231 = arith.sitofp %230 : vector<160x896xi8> to vector<160x896xf32>
      %232 = arith.truncf %231 : vector<160x896xf32> to vector<160x896xbf16>
      %c160_81 = arith.constant 160 : index
      %c0_82 = arith.constant 0 : index
      %233 = vector.load %arg11[%c160_81, %c0_82] : memref<800x896xbf16, #tpu.memory_space<vmem>>, vector<160x896xbf16>
      tpu.vector_store %arg11[%c160_81, %c0_82], %232 {strides = array<i32>} : memref<800x896xbf16, #tpu.memory_space<vmem>>, vector<160x896xbf16>,
      %c320 = arith.constant 320 : index
      %c0_83 = arith.constant 0 : index
      %234 = vector.load %arg8[%c320, %c0_83] : memref<800x896xi8, #tpu.memory_space<vmem>>, vector<160x896xi8>
      %235 = arith.sitofp %234 : vector<160x896xi8> to vector<160x896xf32>
      %236 = arith.truncf %235 : vector<160x896xf32> to vector<160x896xbf16>
      %c320_84 = arith.constant 320 : index
      %c0_85 = arith.constant 0 : index
      %237 = vector.load %arg11[%c320_84, %c0_85] : memref<800x896xbf16, #tpu.memory_space<vmem>>, vector<160x896xbf16>
      tpu.vector_store %arg11[%c320_84, %c0_85], %236 {strides = array<i32>} : memref<800x896xbf16, #tpu.memory_space<vmem>>, vector<160x896xbf16>,
      %c480 = arith.constant 480 : index
      %c0_86 = arith.constant 0 : index
      %238 = vector.load %arg8[%c480, %c0_86] : memref<800x896xi8, #tpu.memory_space<vmem>>, vector<160x896xi8>
      %239 = arith.sitofp %238 : vector<160x896xi8> to vector<160x896xf32>
      %240 = arith.truncf %239 : vector<160x896xf32> to vector<160x896xbf16>
      %c480_87 = arith.constant 480 : index
      %c0_88 = arith.constant 0 : index
      %241 = vector.load %arg11[%c480_87, %c0_88] : memref<800x896xbf16, #tpu.memory_space<vmem>>, vector<160x896xbf16>
      tpu.vector_store %arg11[%c480_87, %c0_88], %240 {strides = array<i32>} : memref<800x896xbf16, #tpu.memory_space<vmem>>, vector<160x896xbf16>,
      %c640 = arith.constant 640 : index
      %c0_89 = arith.constant 0 : index
      %242 = vector.load %arg8[%c640, %c0_89] : memref<800x896xi8, #tpu.memory_space<vmem>>, vector<160x896xi8>
      %243 = arith.sitofp %242 : vector<160x896xi8> to vector<160x896xf32>
      %244 = arith.truncf %243 : vector<160x896xf32> to vector<160x896xbf16>
      %c640_90 = arith.constant 640 : index
      %c0_91 = arith.constant 0 : index
      %245 = vector.load %arg11[%c640_90, %c0_91] : memref<800x896xbf16, #tpu.memory_space<vmem>>, vector<160x896xbf16>
      tpu.vector_store %arg11[%c640_90, %c0_91], %244 {strides = array<i32>} : memref<800x896xbf16, #tpu.memory_space<vmem>>, vector<160x896xbf16>,
    } else {
    }
    %c0 = arith.constant 0 : index
    %c0_1 = arith.constant 0 : index
    %4 = vector.load %arg9[%c0, %c0_1] : memref<8x896xf32, #tpu.memory_space<vmem>>, vector<1x192xf32>
    %c1 = arith.constant 1 : index
    %c0_2 = arith.constant 0 : index
    %5 = vector.load %arg9[%c1, %c0_2] : memref<8x896xf32, #tpu.memory_space<vmem>>, vector<1x192xf32>
    %c2 = arith.constant 2 : index
    %c0_3 = arith.constant 0 : index
    %6 = vector.load %arg9[%c2, %c0_3] : memref<8x896xf32, #tpu.memory_space<vmem>>, vector<1x32xf32>
    %c3 = arith.constant 3 : index
    %c0_4 = arith.constant 0 : index
    %7 = vector.load %arg9[%c3, %c0_4] : memref<8x896xf32, #tpu.memory_space<vmem>>, vector<1x800xf32>
    %c4 = arith.constant 4 : index
    %c0_5 = arith.constant 0 : index
    %8 = vector.load %arg9[%c4, %c0_5] : memref<8x896xf32, #tpu.memory_space<vmem>>, vector<1x896xf32>
    %c5 = arith.constant 5 : index
    %c0_6 = arith.constant 0 : index
    %9 = vector.load %arg9[%c5, %c0_6] : memref<8x896xf32, #tpu.memory_space<vmem>>, vector<1x896xf32>
    %c6 = arith.constant 6 : index
    %c0_7 = arith.constant 0 : index
    %10 = vector.load %arg9[%c6, %c0_7] : memref<8x896xf32, #tpu.memory_space<vmem>>, vector<1x1xf32>
    %c7 = arith.constant 7 : index
    %c0_8 = arith.constant 0 : index
    %11 = vector.load %arg9[%c7, %c0_8] : memref<8x896xf32, #tpu.memory_space<vmem>>, vector<1x896xf32>
    %c0_9 = arith.constant 0 : index
    %c0_10 = arith.constant 0 : index
    %12 = vector.load %arg1[%c0_9, %c0_10] : memref<8x64xf32, #tpu.memory_space<vmem>>, vector<8x64xf32>
    %13 = arith.truncf %12 : vector<8x64xf32> to vector<8x64xbf16>
    %c0_11 = arith.constant 0 : index
    %c0_12 = arith.constant 0 : index
    %14 = vector.load %arg4[%c0_11, %c0_12] : memref<128x192xbf16, #tpu.memory_space<vmem>>, vector<64x192xbf16>
    %c64 = arith.constant 64 : index
    %c0_13 = arith.constant 0 : index
    %15 = vector.load %arg4[%c64, %c0_13] : memref<128x192xbf16, #tpu.memory_space<vmem>>, vector<64x192xbf16>
    %cst = arith.constant dense<0.000000e+00> : vector<8x192xf32>
    %16 = tpu.matmul %13, %14, %cst {dimension_numbers = #tpu.dot_dimension_numbers<[1], [0], [0], [1], [0, 0, 1, 1], [], []>} : vector<8x64xbf16>, vector<64x192xbf16>, vector<8x192xf32> -> vector<8x192xf32>
    %17 = vector.broadcast %4 : vector<1x192xf32> to vector<8x192xf32>
    %18 = arith.addf %16, %17 : vector<8x192xf32>
    %cst_14 = arith.constant dense<0xFF800000> : vector<8xf32>
    %19 = vector.multi_reduction <maximumf>, %18, %cst_14 [1] : vector<8x192xf32> to vector<8xf32>
    %20 = vector.shape_cast %19 : vector<8xf32> to vector<8x1xf32>
    %21 = vector.broadcast %20 : vector<8x1xf32> to vector<8x192xf32>
    %22 = arith.subf %18, %21 : vector<8x192xf32>
    %23 = math.exp %22 : vector<8x192xf32>
    %cst_15 = arith.constant dense<0.000000e+00> : vector<8xf32>
    %24 = vector.multi_reduction <add>, %23, %cst_15 [1] : vector<8x192xf32> to vector<8xf32>
    %25 = vector.shape_cast %24 : vector<8xf32> to vector<8x1xf32>
    %26 = vector.broadcast %25 : vector<8x1xf32> to vector<8x192xf32>
    %27 = arith.divf %23, %26 : vector<8x192xf32>
    %cst_16 = arith.constant dense<0.000000e+00> : vector<8x192xf32>
    %28 = tpu.matmul %13, %15, %cst_16 {dimension_numbers = #tpu.dot_dimension_numbers<[1], [0], [0], [1], [0, 0, 1, 1], [], []>} : vector<8x64xbf16>, vector<64x192xbf16>, vector<8x192xf32> -> vector<8x192xf32>
    %29 = vector.broadcast %5 : vector<1x192xf32> to vector<8x192xf32>
    %30 = arith.addf %28, %29 : vector<8x192xf32>
    %cst_17 = arith.constant 0.000000e+00 : f32
    %31 = vector.broadcast %cst_17 : f32 to vector<8x192xf32>
    %32 = arith.maximumf %30, %31 : vector<8x192xf32>
    %33 = arith.mulf %27, %32 : vector<8x192xf32>
    %c0_18 = arith.constant 0 : index
    %c0_19 = arith.constant 0 : index
    %34 = vector.load %arg5[%c0_18, %c0_19] : memref<384x32xbf16, #tpu.memory_space<vmem>>, vector<192x32xbf16>
    %c192 = arith.constant 192 : index
    %c0_20 = arith.constant 0 : index
    %35 = vector.load %arg5[%c192, %c0_20] : memref<384x32xbf16, #tpu.memory_space<vmem>>, vector<192x32xbf16>
    %36 = arith.truncf %32 : vector<8x192xf32> to vector<8x192xbf16>
    %cst_21 = arith.constant dense<0.000000e+00> : vector<8x32xf32>
    %37 = tpu.matmul %36, %34, %cst_21 {dimension_numbers = #tpu.dot_dimension_numbers<[1], [0], [0], [1], [0, 0, 1, 1], [], []>} : vector<8x192xbf16>, vector<192x32xbf16>, vector<8x32xf32> -> vector<8x32xf32>
    %38 = arith.truncf %33 : vector<8x192xf32> to vector<8x192xbf16>
    %cst_22 = arith.constant dense<0.000000e+00> : vector<8x32xf32>
    %39 = tpu.matmul %38, %35, %cst_22 {dimension_numbers = #tpu.dot_dimension_numbers<[1], [0], [0], [1], [0, 0, 1, 1], [], []>} : vector<8x192xbf16>, vector<192x32xbf16>, vector<8x32xf32> -> vector<8x32xf32>
    %40 = arith.addf %37, %39 : vector<8x32xf32>
    %41 = vector.broadcast %6 : vector<1x32xf32> to vector<8x32xf32>
    %42 = arith.addf %40, %41 : vector<8x32xf32>
    %c0_23 = arith.constant 0 : index
    %c0_24 = arith.constant 0 : index
    %43 = vector.load %arg6[%c0_23, %c0_24] : memref<32x4xf32, #tpu.memory_space<vmem>>, vector<32x4xf32>
    %44 = arith.mulf %42, %42 : vector<8x32xf32>
    %cst_25 = arith.constant dense<0.000000e+00> : vector<8xf32>
    %45 = vector.multi_reduction <add>, %44, %cst_25 [1] : vector<8x32xf32> to vector<8xf32>
    %46 = vector.shape_cast %45 : vector<8xf32> to vector<8x1xf32>
    %47 = arith.mulf %43, %43 : vector<32x4xf32>
    %cst_26 = arith.constant dense<0.000000e+00> : vector<4xf32>
    %48 = vector.multi_reduction <add>, %47, %cst_26 [0] : vector<32x4xf32> to vector<4xf32>
    %49 = vector.shape_cast %48 : vector<4xf32> to vector<1x4xf32>
    %cst_27 = arith.constant dense<0.000000e+00> : vector<8x4xf32>
    %50 = tpu.matmul %42, %43, %cst_27 {dimension_numbers = #tpu.dot_dimension_numbers<[1], [0], [0], [1], [0, 0, 1, 1], [], []>} : vector<8x32xf32>, vector<32x4xf32>, vector<8x4xf32> -> vector<8x4xf32>
    %51 = vector.broadcast %46 : vector<8x1xf32> to vector<8x4xf32>
    %52 = vector.broadcast %49 : vector<1x4xf32> to vector<8x4xf32>
    %53 = arith.addf %51, %52 : vector<8x4xf32>
    %cst_28 = arith.constant 2.000000e+00 : f32
    %54 = vector.broadcast %cst_28 : f32 to vector<8x4xf32>
    %55 = arith.mulf %54, %50 : vector<8x4xf32>
    %56 = arith.subf %53, %55 : vector<8x4xf32>
    %cst_29 = arith.constant 0.000000e+00 : f32
    %57 = vector.broadcast %cst_29 : f32 to vector<8x4xf32>
    %58 = arith.subf %57, %56 : vector<8x4xf32>
    %59 = tpu.iota {dimensions = array<i32: 1>} : vector<8x4xi32>
    %cst_30 = arith.constant dense<0xFF800000> : vector<8xf32>
    %60 = vector.multi_reduction <maximumf>, %58, %cst_30 [1] : vector<8x4xf32> to vector<8xf32>
    %61 = vector.shape_cast %60 : vector<8xf32> to vector<8x1xf32>
    %62 = vector.broadcast %61 : vector<8x1xf32> to vector<8x4xf32>
    %63 = arith.cmpf oge, %58, %62 : vector<8x4xf32>
    %c4_i32 = arith.constant 4 : i32
    %64 = vector.broadcast %c4_i32 : i32 to vector<8x4xi32>
    %65 = arith.select %63, %59, %64 : vector<8x4xi1>, vector<8x4xi32>
    %cst_31 = arith.constant dense<2147483647> : vector<8xi32>
    %66 = vector.multi_reduction <minsi>, %65, %cst_31 [1] : vector<8x4xi32> to vector<8xi32>
    %67 = vector.shape_cast %66 : vector<8xi32> to vector<8x1xi32>
    %c0_32 = arith.constant 0 : index
    %c0_33 = arith.constant 0 : index
    %68 = vector.load %arg2[%c0_32, %c0_33] : memref<8x1xi32, #tpu.memory_space<vmem>>, vector<8x1xi32>
    %69 = arith.cmpi eq, %67, %68 : vector<8x1xi32>
    %70 = arith.extui %69 : vector<8x1xi1> to vector<8x1xi32>
    %71 = arith.sitofp %70 : vector<8x1xi32> to vector<8x1xf32>
    %72 = vector.shape_cast %71 : vector<8x1xf32> to vector<1x8x1xf32>
    %cst_34 = arith.constant dense<0.000000e+00> : vector<1xf32>
    %73 = vector.multi_reduction <add>, %72, %cst_34 [1, 2] : vector<1x8x1xf32> to vector<1xf32>
    %74 = vector.shape_cast %73 : vector<1xf32> to vector<1x1x1xf32>
    %75 = vector.extract %74[0, 0, 0] : f32 from vector<1x1x1xf32>
    %c0_i32_35 = arith.constant 0 : i32
    %76 = vector.broadcast %c0_i32_35 : i32 to vector<8x1xi32>
    %77 = arith.cmpi eq, %68, %76 : vector<8x1xi32>
    %78 = arith.extui %77 : vector<8x1xi1> to vector<8x1xi32>
    %79 = arith.sitofp %78 : vector<8x1xi32> to vector<8x1xf32>
    %80 = vector.shape_cast %79 : vector<8x1xf32> to vector<1x8x1xf32>
    %cst_36 = arith.constant dense<0.000000e+00> : vector<1xf32>
    %81 = vector.multi_reduction <add>, %80, %cst_36 [1, 2] : vector<1x8x1xf32> to vector<1xf32>
    %82 = vector.shape_cast %81 : vector<1xf32> to vector<1x1x1xf32>
    %83 = vector.extract %82[0, 0, 0] : f32 from vector<1x1x1xf32>
    %84 = arith.mulf %71, %79 : vector<8x1xf32>
    %85 = vector.shape_cast %84 : vector<8x1xf32> to vector<1x8x1xf32>
    %cst_37 = arith.constant dense<0.000000e+00> : vector<1xf32>
    %86 = vector.multi_reduction <add>, %85, %cst_37 [1, 2] : vector<1x8x1xf32> to vector<1xf32>
    %87 = vector.shape_cast %86 : vector<1xf32> to vector<1x1x1xf32>
    %88 = vector.extract %87[0, 0, 0] : f32 from vector<1x1x1xf32>
    %c1_i32 = arith.constant 1 : i32
    %89 = vector.broadcast %c1_i32 : i32 to vector<8x1xi32>
    %90 = arith.cmpi eq, %68, %89 : vector<8x1xi32>
    %91 = arith.extui %90 : vector<8x1xi1> to vector<8x1xi32>
    %92 = arith.sitofp %91 : vector<8x1xi32> to vector<8x1xf32>
    %93 = vector.shape_cast %92 : vector<8x1xf32> to vector<1x8x1xf32>
    %cst_38 = arith.constant dense<0.000000e+00> : vector<1xf32>
    %94 = vector.multi_reduction <add>, %93, %cst_38 [1, 2] : vector<1x8x1xf32> to vector<1xf32>
    %95 = vector.shape_cast %94 : vector<1xf32> to vector<1x1x1xf32>
    %96 = vector.extract %95[0, 0, 0] : f32 from vector<1x1x1xf32>
    %97 = arith.mulf %71, %92 : vector<8x1xf32>
    %98 = vector.shape_cast %97 : vector<8x1xf32> to vector<1x8x1xf32>
    %cst_39 = arith.constant dense<0.000000e+00> : vector<1xf32>
    %99 = vector.multi_reduction <add>, %98, %cst_39 [1, 2] : vector<1x8x1xf32> to vector<1xf32>
    %100 = vector.shape_cast %99 : vector<1xf32> to vector<1x1x1xf32>
    %101 = vector.extract %100[0, 0, 0] : f32 from vector<1x1x1xf32>
    %c2_i32 = arith.constant 2 : i32
    %102 = vector.broadcast %c2_i32 : i32 to vector<8x1xi32>
    %103 = arith.cmpi eq, %68, %102 : vector<8x1xi32>
    %104 = arith.extui %103 : vector<8x1xi1> to vector<8x1xi32>
    %105 = arith.sitofp %104 : vector<8x1xi32> to vector<8x1xf32>
    %106 = vector.shape_cast %105 : vector<8x1xf32> to vector<1x8x1xf32>
    %cst_40 = arith.constant dense<0.000000e+00> : vector<1xf32>
    %107 = vector.multi_reduction <add>, %106, %cst_40 [1, 2] : vector<1x8x1xf32> to vector<1xf32>
    %108 = vector.shape_cast %107 : vector<1xf32> to vector<1x1x1xf32>
    %109 = vector.extract %108[0, 0, 0] : f32 from vector<1x1x1xf32>
    %110 = arith.mulf %71, %105 : vector<8x1xf32>
    %111 = vector.shape_cast %110 : vector<8x1xf32> to vector<1x8x1xf32>
    %cst_41 = arith.constant dense<0.000000e+00> : vector<1xf32>
    %112 = vector.multi_reduction <add>, %111, %cst_41 [1, 2] : vector<1x8x1xf32> to vector<1xf32>
    %113 = vector.shape_cast %112 : vector<1xf32> to vector<1x1x1xf32>
    %114 = vector.extract %113[0, 0, 0] : f32 from vector<1x1x1xf32>
    %c3_i32 = arith.constant 3 : i32
    %115 = vector.broadcast %c3_i32 : i32 to vector<8x1xi32>
    %116 = arith.cmpi eq, %68, %115 : vector<8x1xi32>
    %117 = arith.extui %116 : vector<8x1xi1> to vector<8x1xi32>
    %118 = arith.sitofp %117 : vector<8x1xi32> to vector<8x1xf32>
    %119 = vector.shape_cast %118 : vector<8x1xf32> to vector<1x8x1xf32>
    %cst_42 = arith.constant dense<0.000000e+00> : vector<1xf32>
    %120 = vector.multi_reduction <add>, %119, %cst_42 [1, 2] : vector<1x8x1xf32> to vector<1xf32>
    %121 = vector.shape_cast %120 : vector<1xf32> to vector<1x1x1xf32>
    %122 = vector.extract %121[0, 0, 0] : f32 from vector<1x1x1xf32>
    %123 = arith.mulf %71, %118 : vector<8x1xf32>
    %124 = vector.shape_cast %123 : vector<8x1xf32> to vector<1x8x1xf32>
    %cst_43 = arith.constant dense<0.000000e+00> : vector<1xf32>
    %125 = vector.multi_reduction <add>, %124, %cst_43 [1, 2] : vector<1x8x1xf32> to vector<1xf32>
    %126 = vector.shape_cast %125 : vector<1xf32> to vector<1x1x1xf32>
    %127 = vector.extract %126[0, 0, 0] : f32 from vector<1x1x1xf32>
    %c0_44 = arith.constant 0 : index
    %c0_45 = arith.constant 0 : index
    %128 = vector.load %arg7[%c0_44, %c0_45] : memref<96x800xbf16, #tpu.memory_space<vmem>>, vector<64x800xbf16>
    %c64_46 = arith.constant 64 : index
    %c0_47 = arith.constant 0 : index
    %129 = vector.load %arg7[%c64_46, %c0_47] : memref<96x800xbf16, #tpu.memory_space<vmem>>, vector<32x800xbf16>
    %cst_48 = arith.constant dense<0.000000e+00> : vector<8x800xf32>
    %130 = tpu.matmul %13, %128, %cst_48 {dimension_numbers = #tpu.dot_dimension_numbers<[1], [0], [0], [1], [0, 0, 1, 1], [], []>} : vector<8x64xbf16>, vector<64x800xbf16>, vector<8x800xf32> -> vector<8x800xf32>
    %131 = arith.truncf %42 : vector<8x32xf32> to vector<8x32xbf16>
    %cst_49 = arith.constant dense<0.000000e+00> : vector<8x800xf32>
    %132 = tpu.matmul %131, %129, %cst_49 {dimension_numbers = #tpu.dot_dimension_numbers<[1], [0], [0], [1], [0, 0, 1, 1], [], []>} : vector<8x32xbf16>, vector<32x800xbf16>, vector<8x800xf32> -> vector<8x800xf32>
    %133 = arith.addf %130, %132 : vector<8x800xf32>
    %134 = vector.broadcast %7 : vector<1x800xf32> to vector<8x800xf32>
    %135 = arith.addf %133, %134 : vector<8x800xf32>
    %cst_50 = arith.constant 0.000000e+00 : f32
    %136 = vector.broadcast %cst_50 : f32 to vector<8x800xf32>
    %137 = arith.maximumf %135, %136 : vector<8x800xf32>
    %138 = arith.truncf %137 : vector<8x800xf32> to vector<8x800xbf16>
    %c0_51 = arith.constant 0 : index
    %c0_52 = arith.constant 0 : index
    %139 = vector.load %arg11[%c0_51, %c0_52] : memref<800x896xbf16, #tpu.memory_space<vmem>>, vector<800x896xbf16>
    %cst_53 = arith.constant dense<0.000000e+00> : vector<8x896xf32>
    %140 = tpu.matmul %138, %139, %cst_53 {dimension_numbers = #tpu.dot_dimension_numbers<[1], [0], [0], [1], [0, 0, 1, 1], [], []>} : vector<8x800xbf16>, vector<800x896xbf16>, vector<8x896xf32> -> vector<8x896xf32>
    %141 = vector.broadcast %11 : vector<1x896xf32> to vector<8x896xf32>
    %142 = arith.mulf %140, %141 : vector<8x896xf32>
    %143 = vector.broadcast %8 : vector<1x896xf32> to vector<8x896xf32>
    %144 = arith.addf %142, %143 : vector<8x896xf32>
    %cst_54 = arith.constant 0.000000e+00 : f32
    %145 = vector.broadcast %cst_54 : f32 to vector<8x896xf32>
    %146 = arith.maximumf %144, %145 : vector<8x896xf32>
    %147 = vector.broadcast %9 : vector<1x896xf32> to vector<8x896xf32>
    %148 = arith.mulf %146, %147 : vector<8x896xf32>
    %cst_55 = arith.constant dense<0.000000e+00> : vector<8xf32>
    %149 = vector.multi_reduction <add>, %148, %cst_55 [1] : vector<8x896xf32> to vector<8xf32>
    %150 = vector.shape_cast %149 : vector<8xf32> to vector<8x1xf32>
    %151 = vector.broadcast %10 : vector<1x1xf32> to vector<8x1xf32>
    %152 = arith.addf %150, %151 : vector<8x1xf32>
    %c0_56 = arith.constant 0 : index
    %c0_57 = arith.constant 0 : index
    %153 = vector.load %arg3[%c0_56, %c0_57] : memref<8x1xf32, #tpu.memory_space<vmem>>, vector<8x1xf32>
    %154 = arith.subf %153, %152 : vector<8x1xf32>
    %155 = arith.mulf %154, %154 : vector<8x1xf32>
    %156 = vector.shape_cast %155 : vector<8x1xf32> to vector<1x8x1xf32>
    %cst_58 = arith.constant dense<0.000000e+00> : vector<1xf32>
    %157 = vector.multi_reduction <add>, %156, %cst_58 [1, 2] : vector<1x8x1xf32> to vector<1xf32>
    %158 = vector.shape_cast %157 : vector<1xf32> to vector<1x1x1xf32>
    %159 = vector.extract %158[0, 0, 0] : f32 from vector<1x1x1xf32>
    %160 = vector.shape_cast %153 : vector<8x1xf32> to vector<1x8x1xf32>
    %cst_59 = arith.constant dense<0.000000e+00> : vector<1xf32>
    %161 = vector.multi_reduction <add>, %160, %cst_59 [1, 2] : vector<1x8x1xf32> to vector<1xf32>
    %162 = vector.shape_cast %161 : vector<1xf32> to vector<1x1x1xf32>
    %163 = vector.extract %162[0, 0, 0] : f32 from vector<1x1x1xf32>
    %164 = arith.mulf %153, %153 : vector<8x1xf32>
    %165 = vector.shape_cast %164 : vector<8x1xf32> to vector<1x8x1xf32>
    %cst_60 = arith.constant dense<0.000000e+00> : vector<1xf32>
    %166 = vector.multi_reduction <add>, %165, %cst_60 [1, 2] : vector<1x8x1xf32> to vector<1xf32>
    %167 = vector.shape_cast %166 : vector<1xf32> to vector<1x1x1xf32>
    %168 = vector.extract %167[0, 0, 0] : f32 from vector<1x1x1xf32>
    %c0_i32_61 = arith.constant 0 : i32
    %169 = vector.broadcast %c0_i32_61 : i32 to vector<1x128xi32>
    %170 = arith.cmpi eq, %0, %169 : vector<1x128xi32>
    %cst_62 = arith.constant 0.000000e+00 : f32
    %171 = vector.broadcast %75 : f32 to vector<1x128xf32>
    %172 = vector.broadcast %cst_62 : f32 to vector<1x128xf32>
    %173 = arith.select %170, %171, %172 : vector<1x128xi1>, vector<1x128xf32>
    %c1_i32_63 = arith.constant 1 : i32
    %174 = vector.broadcast %c1_i32_63 : i32 to vector<1x128xi32>
    %175 = arith.cmpi eq, %0, %174 : vector<1x128xi32>
    %176 = vector.broadcast %88 : f32 to vector<1x128xf32>
    %177 = arith.select %175, %176, %173 : vector<1x128xi1>, vector<1x128xf32>
    %c8_i32 = arith.constant 8 : i32
    %178 = vector.broadcast %c8_i32 : i32 to vector<1x128xi32>
    %179 = arith.cmpi eq, %0, %178 : vector<1x128xi32>
    %180 = vector.broadcast %83 : f32 to vector<1x128xf32>
    %181 = arith.select %179, %180, %177 : vector<1x128xi1>, vector<1x128xf32>
    %c2_i32_64 = arith.constant 2 : i32
    %182 = vector.broadcast %c2_i32_64 : i32 to vector<1x128xi32>
    %183 = arith.cmpi eq, %0, %182 : vector<1x128xi32>
    %184 = vector.broadcast %101 : f32 to vector<1x128xf32>
    %185 = arith.select %183, %184, %181 : vector<1x128xi1>, vector<1x128xf32>
    %c9_i32 = arith.constant 9 : i32
    %186 = vector.broadcast %c9_i32 : i32 to vector<1x128xi32>
    %187 = arith.cmpi eq, %0, %186 : vector<1x128xi32>
    %188 = vector.broadcast %96 : f32 to vector<1x128xf32>
    %189 = arith.select %187, %188, %185 : vector<1x128xi1>, vector<1x128xf32>
    %c3_i32_65 = arith.constant 3 : i32
    %190 = vector.broadcast %c3_i32_65 : i32 to vector<1x128xi32>
    %191 = arith.cmpi eq, %0, %190 : vector<1x128xi32>
    %192 = vector.broadcast %114 : f32 to vector<1x128xf32>
    %193 = arith.select %191, %192, %189 : vector<1x128xi1>, vector<1x128xf32>
    %c10_i32 = arith.constant 10 : i32
    %194 = vector.broadcast %c10_i32 : i32 to vector<1x128xi32>
    %195 = arith.cmpi eq, %0, %194 : vector<1x128xi32>
    %196 = vector.broadcast %109 : f32 to vector<1x128xf32>
    %197 = arith.select %195, %196, %193 : vector<1x128xi1>, vector<1x128xf32>
    %c4_i32_66 = arith.constant 4 : i32
    %198 = vector.broadcast %c4_i32_66 : i32 to vector<1x128xi32>
    %199 = arith.cmpi eq, %0, %198 : vector<1x128xi32>
    %200 = vector.broadcast %127 : f32 to vector<1x128xf32>
    %201 = arith.select %199, %200, %197 : vector<1x128xi1>, vector<1x128xf32>
    %c11_i32 = arith.constant 11 : i32
    %202 = vector.broadcast %c11_i32 : i32 to vector<1x128xi32>
    %203 = arith.cmpi eq, %0, %202 : vector<1x128xi32>
    %204 = vector.broadcast %122 : f32 to vector<1x128xf32>
    %205 = arith.select %203, %204, %201 : vector<1x128xi1>, vector<1x128xf32>
    %c16_i32 = arith.constant 16 : i32
    %206 = vector.broadcast %c16_i32 : i32 to vector<1x128xi32>
    %207 = arith.cmpi eq, %0, %206 : vector<1x128xi32>
    %208 = vector.broadcast %159 : f32 to vector<1x128xf32>
    %209 = arith.select %207, %208, %205 : vector<1x128xi1>, vector<1x128xf32>
    %c17_i32 = arith.constant 17 : i32
    %210 = vector.broadcast %c17_i32 : i32 to vector<1x128xi32>
    %211 = arith.cmpi eq, %0, %210 : vector<1x128xi32>
    %212 = vector.broadcast %163 : f32 to vector<1x128xf32>
    %213 = arith.select %211, %212, %209 : vector<1x128xi1>, vector<1x128xf32>
    %c18_i32 = arith.constant 18 : i32
    %214 = vector.broadcast %c18_i32 : i32 to vector<1x128xi32>
    %215 = arith.cmpi eq, %0, %214 : vector<1x128xi32>
    %216 = vector.broadcast %168 : f32 to vector<1x128xf32>
    %217 = arith.select %215, %216, %213 : vector<1x128xi1>, vector<1x128xf32>
    %c0_67 = arith.constant 0 : index
    %c0_68 = arith.constant 0 : index
    %218 = vector.load %arg12[%c0_67, %c0_68] : memref<1x128xf32, #tpu.memory_space<vmem>>, vector<1x128xf32>
    %219 = arith.addf %218, %217 : vector<1x128xf32>
    %c0_69 = arith.constant 0 : index
    %c0_70 = arith.constant 0 : index
    %220 = vector.load %arg12[%c0_69, %c0_70] : memref<1x128xf32, #tpu.memory_space<vmem>>, vector<1x128xf32>
    tpu.vector_store %arg12[%c0_69, %c0_70], %219 {strides = array<i32>} : memref<1x128xf32, #tpu.memory_space<vmem>>, vector<1x128xf32>,
    %c3_i32_71 = arith.constant 3 : i32
    %221 = arith.cmpi eq, %arg0, %c3_i32_71 : i32
    %222 = arith.extui %221 : i1 to i32
    %c0_i32_72 = arith.constant 0 : i32
    %223 = arith.cmpi ne, %222, %c0_i32_72 : i32
    scf.if %223 {
      %c0_73 = arith.constant 0 : index
      %c0_74 = arith.constant 0 : index
      %224 = vector.load %arg12[%c0_73, %c0_74] : memref<1x128xf32, #tpu.memory_space<vmem>>, vector<1x128xf32>
      %c0_i32_75 = arith.constant 0 : i32
      %225 = vector.broadcast %c0_i32_75 : i32 to vector<1x128xi32>
      %226 = arith.cmpi eq, %0, %225 : vector<1x128xi32>
      %cst_76 = arith.constant 0.000000e+00 : f32
      %227 = vector.broadcast %cst_76 : f32 to vector<1x128xf32>
      %228 = arith.select %226, %224, %227 : vector<1x128xi1>, vector<1x128xf32>
      %229 = vector.shape_cast %228 : vector<1x128xf32> to vector<1x1x128xf32>
      %cst_77 = arith.constant dense<0.000000e+00> : vector<1xf32>
      %230 = vector.multi_reduction <add>, %229, %cst_77 [1, 2] : vector<1x1x128xf32> to vector<1xf32>
      %231 = vector.shape_cast %230 : vector<1xf32> to vector<1x1x1xf32>
      %232 = vector.extract %231[0, 0, 0] : f32 from vector<1x1x1xf32>
      %cst_78 = arith.constant 3.125000e-02 : f32
      %233 = arith.mulf %232, %cst_78 : f32
      %c16_i32_79 = arith.constant 16 : i32
      %234 = vector.broadcast %c16_i32_79 : i32 to vector<1x128xi32>
      %235 = arith.cmpi eq, %0, %234 : vector<1x128xi32>
      %cst_80 = arith.constant 0.000000e+00 : f32
      %236 = vector.broadcast %cst_80 : f32 to vector<1x128xf32>
      %237 = arith.select %235, %224, %236 : vector<1x128xi1>, vector<1x128xf32>
      %238 = vector.shape_cast %237 : vector<1x128xf32> to vector<1x1x128xf32>
      %cst_81 = arith.constant dense<0.000000e+00> : vector<1xf32>
      %239 = vector.multi_reduction <add>, %238, %cst_81 [1, 2] : vector<1x1x128xf32> to vector<1xf32>
      %240 = vector.shape_cast %239 : vector<1xf32> to vector<1x1x1xf32>
      %241 = vector.extract %240[0, 0, 0] : f32 from vector<1x1x1xf32>
      %c17_i32_82 = arith.constant 17 : i32
      %242 = vector.broadcast %c17_i32_82 : i32 to vector<1x128xi32>
      %243 = arith.cmpi eq, %0, %242 : vector<1x128xi32>
      %cst_83 = arith.constant 0.000000e+00 : f32
      %244 = vector.broadcast %cst_83 : f32 to vector<1x128xf32>
      %245 = arith.select %243, %224, %244 : vector<1x128xi1>, vector<1x128xf32>
      %246 = vector.shape_cast %245 : vector<1x128xf32> to vector<1x1x128xf32>
      %cst_84 = arith.constant dense<0.000000e+00> : vector<1xf32>
      %247 = vector.multi_reduction <add>, %246, %cst_84 [1, 2] : vector<1x1x128xf32> to vector<1xf32>
      %248 = vector.shape_cast %247 : vector<1xf32> to vector<1x1x1xf32>
      %249 = vector.extract %248[0, 0, 0] : f32 from vector<1x1x1xf32>
      %c18_i32_85 = arith.constant 18 : i32
      %250 = vector.broadcast %c18_i32_85 : i32 to vector<1x128xi32>
      %251 = arith.cmpi eq, %0, %250 : vector<1x128xi32>
      %cst_86 = arith.constant 0.000000e+00 : f32
      %252 = vector.broadcast %cst_86 : f32 to vector<1x128xf32>
      %253 = arith.select %251, %224, %252 : vector<1x128xi1>, vector<1x128xf32>
      %254 = vector.shape_cast %253 : vector<1x128xf32> to vector<1x1x128xf32>
      %cst_87 = arith.constant dense<0.000000e+00> : vector<1xf32>
      %255 = vector.multi_reduction <add>, %254, %cst_87 [1, 2] : vector<1x1x128xf32> to vector<1xf32>
      %256 = vector.shape_cast %255 : vector<1xf32> to vector<1x1x1xf32>
      %257 = vector.extract %256[0, 0, 0] : f32 from vector<1x1x1xf32>
      %258 = arith.mulf %249, %249 : f32
      %cst_88 = arith.constant 3.125000e-02 : f32
      %259 = arith.mulf %258, %cst_88 : f32
      %260 = arith.subf %257, %259 : f32
      %261 = arith.divf %241, %260 : f32
      %cst_89 = arith.constant 1.000000e+00 : f32
      %262 = arith.subf %cst_89, %261 : f32
      %c0_i32_90 = arith.constant 0 : i32
      %263 = vector.broadcast %c0_i32_90 : i32 to vector<1x128xi32>
      %264 = arith.cmpi eq, %0, %263 : vector<1x128xi32>
      %cst_91 = arith.constant 0.000000e+00 : f32
      %265 = vector.broadcast %233 : f32 to vector<1x128xf32>
      %266 = vector.broadcast %cst_91 : f32 to vector<1x128xf32>
      %267 = arith.select %264, %265, %266 : vector<1x128xi1>, vector<1x128xf32>
      %c1_i32_92 = arith.constant 1 : i32
      %268 = vector.broadcast %c1_i32_92 : i32 to vector<1x128xi32>
      %269 = arith.cmpi eq, %0, %268 : vector<1x128xi32>
      %c1_i32_93 = arith.constant 1 : i32
      %270 = vector.broadcast %c1_i32_93 : i32 to vector<1x128xi32>
      %271 = arith.cmpi eq, %0, %270 : vector<1x128xi32>
      %cst_94 = arith.constant 0.000000e+00 : f32
      %272 = vector.broadcast %cst_94 : f32 to vector<1x128xf32>
      %273 = arith.select %271, %224, %272 : vector<1x128xi1>, vector<1x128xf32>
      %274 = vector.shape_cast %273 : vector<1x128xf32> to vector<1x1x128xf32>
      %cst_95 = arith.constant dense<0.000000e+00> : vector<1xf32>
      %275 = vector.multi_reduction <add>, %274, %cst_95 [1, 2] : vector<1x1x128xf32> to vector<1xf32>
      %276 = vector.shape_cast %275 : vector<1xf32> to vector<1x1x1xf32>
      %277 = vector.extract %276[0, 0, 0] : f32 from vector<1x1x1xf32>
      %c8_i32_96 = arith.constant 8 : i32
      %278 = vector.broadcast %c8_i32_96 : i32 to vector<1x128xi32>
      %279 = arith.cmpi eq, %0, %278 : vector<1x128xi32>
      %cst_97 = arith.constant 0.000000e+00 : f32
      %280 = vector.broadcast %cst_97 : f32 to vector<1x128xf32>
      %281 = arith.select %279, %224, %280 : vector<1x128xi1>, vector<1x128xf32>
      %282 = vector.shape_cast %281 : vector<1x128xf32> to vector<1x1x128xf32>
      %cst_98 = arith.constant dense<0.000000e+00> : vector<1xf32>
      %283 = vector.multi_reduction <add>, %282, %cst_98 [1, 2] : vector<1x1x128xf32> to vector<1xf32>
      %284 = vector.shape_cast %283 : vector<1xf32> to vector<1x1x1xf32>
      %285 = vector.extract %284[0, 0, 0] : f32 from vector<1x1x1xf32>
      %286 = arith.divf %277, %285 : f32
      %287 = vector.broadcast %286 : f32 to vector<1x128xf32>
      %288 = arith.select %269, %287, %267 : vector<1x128xi1>, vector<1x128xf32>
      %c2_i32_99 = arith.constant 2 : i32
      %289 = vector.broadcast %c2_i32_99 : i32 to vector<1x128xi32>
      %290 = arith.cmpi eq, %0, %289 : vector<1x128xi32>
      %c2_i32_100 = arith.constant 2 : i32
      %291 = vector.broadcast %c2_i32_100 : i32 to vector<1x128xi32>
      %292 = arith.cmpi eq, %0, %291 : vector<1x128xi32>
      %cst_101 = arith.constant 0.000000e+00 : f32
      %293 = vector.broadcast %cst_101 : f32 to vector<1x128xf32>
      %294 = arith.select %292, %224, %293 : vector<1x128xi1>, vector<1x128xf32>
      %295 = vector.shape_cast %294 : vector<1x128xf32> to vector<1x1x128xf32>
      %cst_102 = arith.constant dense<0.000000e+00> : vector<1xf32>
      %296 = vector.multi_reduction <add>, %295, %cst_102 [1, 2] : vector<1x1x128xf32> to vector<1xf32>
      %297 = vector.shape_cast %296 : vector<1xf32> to vector<1x1x1xf32>
      %298 = vector.extract %297[0, 0, 0] : f32 from vector<1x1x1xf32>
      %c9_i32_103 = arith.constant 9 : i32
      %299 = vector.broadcast %c9_i32_103 : i32 to vector<1x128xi32>
      %300 = arith.cmpi eq, %0, %299 : vector<1x128xi32>
      %cst_104 = arith.constant 0.000000e+00 : f32
      %301 = vector.broadcast %cst_104 : f32 to vector<1x128xf32>
      %302 = arith.select %300, %224, %301 : vector<1x128xi1>, vector<1x128xf32>
      %303 = vector.shape_cast %302 : vector<1x128xf32> to vector<1x1x128xf32>
      %cst_105 = arith.constant dense<0.000000e+00> : vector<1xf32>
      %304 = vector.multi_reduction <add>, %303, %cst_105 [1, 2] : vector<1x1x128xf32> to vector<1xf32>
      %305 = vector.shape_cast %304 : vector<1xf32> to vector<1x1x1xf32>
      %306 = vector.extract %305[0, 0, 0] : f32 from vector<1x1x1xf32>
      %307 = arith.divf %298, %306 : f32
      %308 = vector.broadcast %307 : f32 to vector<1x128xf32>
      %309 = arith.select %290, %308, %288 : vector<1x128xi1>, vector<1x128xf32>
      %c3_i32_106 = arith.constant 3 : i32
      %310 = vector.broadcast %c3_i32_106 : i32 to vector<1x128xi32>
      %311 = arith.cmpi eq, %0, %310 : vector<1x128xi32>
      %c3_i32_107 = arith.constant 3 : i32
      %312 = vector.broadcast %c3_i32_107 : i32 to vector<1x128xi32>
      %313 = arith.cmpi eq, %0, %312 : vector<1x128xi32>
      %cst_108 = arith.constant 0.000000e+00 : f32
      %314 = vector.broadcast %cst_108 : f32 to vector<1x128xf32>
      %315 = arith.select %313, %224, %314 : vector<1x128xi1>, vector<1x128xf32>
      %316 = vector.shape_cast %315 : vector<1x128xf32> to vector<1x1x128xf32>
      %cst_109 = arith.constant dense<0.000000e+00> : vector<1xf32>
      %317 = vector.multi_reduction <add>, %316, %cst_109 [1, 2] : vector<1x1x128xf32> to vector<1xf32>
      %318 = vector.shape_cast %317 : vector<1xf32> to vector<1x1x1xf32>
      %319 = vector.extract %318[0, 0, 0] : f32 from vector<1x1x1xf32>
      %c10_i32_110 = arith.constant 10 : i32
      %320 = vector.broadcast %c10_i32_110 : i32 to vector<1x128xi32>
      %321 = arith.cmpi eq, %0, %320 : vector<1x128xi32>
      %cst_111 = arith.constant 0.000000e+00 : f32
      %322 = vector.broadcast %cst_111 : f32 to vector<1x128xf32>
      %323 = arith.select %321, %224, %322 : vector<1x128xi1>, vector<1x128xf32>
      %324 = vector.shape_cast %323 : vector<1x128xf32> to vector<1x1x128xf32>
      %cst_112 = arith.constant dense<0.000000e+00> : vector<1xf32>
      %325 = vector.multi_reduction <add>, %324, %cst_112 [1, 2] : vector<1x1x128xf32> to vector<1xf32>
      %326 = vector.shape_cast %325 : vector<1xf32> to vector<1x1x1xf32>
      %327 = vector.extract %326[0, 0, 0] : f32 from vector<1x1x1xf32>
      %328 = arith.divf %319, %327 : f32
      %329 = vector.broadcast %328 : f32 to vector<1x128xf32>
      %330 = arith.select %311, %329, %309 : vector<1x128xi1>, vector<1x128xf32>
      %c4_i32_113 = arith.constant 4 : i32
      %331 = vector.broadcast %c4_i32_113 : i32 to vector<1x128xi32>
      %332 = arith.cmpi eq, %0, %331 : vector<1x128xi32>
      %c4_i32_114 = arith.constant 4 : i32
      %333 = vector.broadcast %c4_i32_114 : i32 to vector<1x128xi32>
      %334 = arith.cmpi eq, %0, %333 : vector<1x128xi32>
      %cst_115 = arith.constant 0.000000e+00 : f32
      %335 = vector.broadcast %cst_115 : f32 to vector<1x128xf32>
      %336 = arith.select %334, %224, %335 : vector<1x128xi1>, vector<1x128xf32>
      %337 = vector.shape_cast %336 : vector<1x128xf32> to vector<1x1x128xf32>
      %cst_116 = arith.constant dense<0.000000e+00> : vector<1xf32>
      %338 = vector.multi_reduction <add>, %337, %cst_116 [1, 2] : vector<1x1x128xf32> to vector<1xf32>
      %339 = vector.shape_cast %338 : vector<1xf32> to vector<1x1x1xf32>
      %340 = vector.extract %339[0, 0, 0] : f32 from vector<1x1x1xf32>
      %c11_i32_117 = arith.constant 11 : i32
      %341 = vector.broadcast %c11_i32_117 : i32 to vector<1x128xi32>
      %342 = arith.cmpi eq, %0, %341 : vector<1x128xi32>
      %cst_118 = arith.constant 0.000000e+00 : f32
      %343 = vector.broadcast %cst_118 : f32 to vector<1x128xf32>
      %344 = arith.select %342, %224, %343 : vector<1x128xi1>, vector<1x128xf32>
      %345 = vector.shape_cast %344 : vector<1x128xf32> to vector<1x1x128xf32>
      %cst_119 = arith.constant dense<0.000000e+00> : vector<1xf32>
      %346 = vector.multi_reduction <add>, %345, %cst_119 [1, 2] : vector<1x1x128xf32> to vector<1xf32>
      %347 = vector.shape_cast %346 : vector<1xf32> to vector<1x1x1xf32>
      %348 = vector.extract %347[0, 0, 0] : f32 from vector<1x1x1xf32>
      %349 = arith.divf %340, %348 : f32
      %350 = vector.broadcast %349 : f32 to vector<1x128xf32>
      %351 = arith.select %332, %350, %330 : vector<1x128xi1>, vector<1x128xf32>
      %c5_i32 = arith.constant 5 : i32
      %352 = vector.broadcast %c5_i32 : i32 to vector<1x128xi32>
      %353 = arith.cmpi eq, %0, %352 : vector<1x128xi32>
      %354 = vector.broadcast %262 : f32 to vector<1x128xf32>
      %355 = arith.select %353, %354, %351 : vector<1x128xi1>, vector<1x128xf32>
      %c0_120 = arith.constant 0 : index
      %c0_121 = arith.constant 0 : index
      %356 = vector.load %arg10[%c0_120, %c0_121] : memref<1x128xf32, #tpu.memory_space<vmem>>, vector<1x128xf32>
      tpu.vector_store %arg10[%c0_120, %c0_121], %355 {strides = array<i32>} : memref<1x128xf32, #tpu.memory_space<vmem>>, vector<1x128xf32>,
    } else {
    }
    return
  }
  func.func @transform_0(%arg0: i32) -> (i32, i32) {
    %c0_i32 = arith.constant 0 : i32
    %c0_i32_0 = arith.constant 0 : i32
    return %arg0, %c0_i32 : i32, i32
  }
  func.func @transform_1(%arg0: i32) -> (i32, i32) {
    %c0_i32 = arith.constant 0 : i32
    %c0_i32_0 = arith.constant 0 : i32
    return %arg0, %c0_i32 : i32, i32
  }
  func.func @transform_2(%arg0: i32) -> (i32, i32) {
    %c0_i32 = arith.constant 0 : i32
    %c0_i32_0 = arith.constant 0 : i32
    return %arg0, %c0_i32 : i32, i32
  }
  func.func @transform_3(%arg0: i32) -> (i32, i32) {
    %c0_i32 = arith.constant 0 : i32
    %c0_i32_0 = arith.constant 0 : i32
    %c0_i32_1 = arith.constant 0 : i32
    return %c0_i32, %c0_i32_0 : i32, i32
  }
  func.func @transform_4(%arg0: i32) -> (i32, i32) {
    %c0_i32 = arith.constant 0 : i32
    %c0_i32_0 = arith.constant 0 : i32
    %c0_i32_1 = arith.constant 0 : i32
    return %c0_i32, %c0_i32_0 : i32, i32
  }
  func.func @transform_5(%arg0: i32) -> (i32, i32) {
    %c0_i32 = arith.constant 0 : i32
    %c0_i32_0 = arith.constant 0 : i32
    %c0_i32_1 = arith.constant 0 : i32
    return %c0_i32, %c0_i32_0 : i32, i32
  }
  func.func @transform_6(%arg0: i32) -> (i32, i32) {
    %c0_i32 = arith.constant 0 : i32
    %c0_i32_0 = arith.constant 0 : i32
    %c0_i32_1 = arith.constant 0 : i32
    return %c0_i32, %c0_i32_0 : i32, i32
  }
  func.func @transform_7(%arg0: i32) -> (i32, i32) {
    %c0_i32 = arith.constant 0 : i32
    %c0_i32_0 = arith.constant 0 : i32
    %c0_i32_1 = arith.constant 0 : i32
    return %c0_i32, %c0_i32_0 : i32, i32
  }
  func.func @transform_8(%arg0: i32) -> (i32, i32) {
    %c0_i32 = arith.constant 0 : i32
    %c0_i32_0 = arith.constant 0 : i32
    %c0_i32_1 = arith.constant 0 : i32
    return %c0_i32, %c0_i32_0 : i32, i32
  }
  func.func @transform_9(%arg0: i32) -> (i32, i32) {
    %c0_i32 = arith.constant 0 : i32
    %c0_i32_0 = arith.constant 0 : i32
    %c0_i32_1 = arith.constant 0 : i32
    return %c0_i32, %c0_i32_0 : i32, i32
  }
}

</mosaic_0001>

<bundles_post_ra>
// kernel: joint_prediction_forward.1
= control target key start
LH: loop header
LB: loop body
LE: loop exit
PB: predicated region body
PF: predicated region fallthrough
CT: control target
= control target key end

     0   :  { %14 = vsyncpa [#allocation5], 0  ;;  %s4723_s30 = smov 0   ;;  %s5665_s0 = inlined_call_operand.vmem [shape: f32[32,64], index: 0, kind: input, shape index: {}]   ;;  %s5666_s1 = inlined_call_operand.vmem [shape: s32[32,1], index: 1, kind: input, shape index: {}]   ;;  %s5667_s2 = inlined_call_operand.vmem [shape: f32[32,1], index: 2, kind: input, shape index: {}]   ;;  %s5668_s3 = inlined_call_operand.vmem [shape: bf16[128,192], index: 3, kind: input, shape index: {}]   ;;  %s5669_s4 = inlined_call_operand.vmem [shape: bf16[384,32], index: 4, kind: input, shape index: {}]   ;;  %s5670_s5 = inlined_call_operand.vmem [shape: f32[32,4], index: 5, kind: input, shape index: {}]   ;;  %s5671_s6 = inlined_call_operand.vmem [shape: bf16[96,800], index: 6, kind: input, shape index: {}]   ;;  %s5672_s7 = inlined_call_operand.hbm [shape: s8[800,896], index: 7, kind: input, shape index: {}]   ;;  %s5673_s8 = inlined_call_operand.vmem [shape: f32[8,896], index: 8, kind: input, shape index: {}]   ;;  %s5674_s9 = inlined_call_operand.vmem [shape: f32[1,128], index: 9, kind: output, shape index: {}]  }
   0x1 LB: > { %s4729_s10 = sadd.s32 4294967295, %s4663_s30   ;;  %p4129_p0 = scmp.ge.s32.totalorder %s4663_s30, 1  ;;  %s4663_s30 = sphi %s4723_s30, %s20_s30  }
   0x2   : > { %p250_p1 = scmp.lt.s32.totalorder %s4663_s30, 5  ;;  %s4665_s11 = smov [#allocation4]  }
   0x3   : > { %s274_s12 = sshll.u32 %s4665_s11, 4  ;;  %p5675_p4 = scmp.eq.s32.totalorder %s4729_s10, 0  ;;  %s275_s12 = int_to_ptr.vmem [resolvable:$true] %s274_s12 }
   0x4   : > { %p4734_p3 = pnand %p4129_p0, %p250_p1  ;;  %s4625_s17 = scalar_lea.hbm %s5672_s7, 22400 }
   0x5   : > { %p4626_p7 = scmp.ne.s32.totalorder %s5672_s7, %s4625_s17  ;;  %p4632_p11 = scmp.lt.u32.totalorder %s4625_s17, %s5672_s7 }
   0x6   : > { %s5677_s13 = scalar_select %p4734_p3, 1, 0 }
   0x7   : > { %p4479_p5 = pneg %p4734_p3 }
   0x9   : > { %p4743_p6 = pnand %p5675_p4, %p4479_p5 }
   0xb   : > { %p4627_p8 = pneg %p4743_p6 }
   0xd   : > { %p4628_p9 = pnand %p4627_p8, %p4626_p7 }
   0xf   : > { %p4629_p10 = pneg %p4628_p9 }
  0x11   : > { %p4634_p12 = pnand %p4632_p11, %p4629_p10 }
  0x13   : > { %4637 = shalt.err (!%p4634_p12)
}
  0x14   : > { %s4638_s22 = scalar_lea.vmem %s275_s12, 22400  ;;  %p4646_p5 = scmp.lt.s32.totalorder %s275_s12, %s275_s12 }
  0x15   : > { %p4639_p13 = scmp.ne.s32.totalorder %s275_s12, %s4638_s22  ;;  %p4647_p2 = scmp.lt.s32.totalorder %s4638_s22, %s4638_s22 }
  0x17   : > { %p4641_p0 = pnand %p4639_p13, %p4627_p8  ;;  %p4648_p4 = por %p4647_p2, %p4646_p5 }
  0x19   : > { %p4642_p1 = pneg %p4641_p0 }
  0x1b   : > { %p4649_p3 = pnand %p4648_p4, %p4642_p1 }
  0x1d   : > { %4652 = shalt.err (!%p4649_p3)
}
  0x1e   : > { %s4666_s23 = smov 896   ;;  %s4667_s24 = smov 56  }
  0x1f   : > { %4482 = dma.hbm_to_vmem [thread:$0]  (!%p4743_p6), %s5672_s7, 22400, %s275_s12, [#allocation5], %s4666_s23, %s4666_s23, %s4667_s24  }
  0x20   : > { %p5679_p7 = scmp.ne.s32.totalorder %s5677_s13, 0 }
  0x21   : > { %p5680_p9 = scmp.eq.s32.totalorder (!%p5679_p7), %s4729_s10, 0 }
  0x22   : > { %314 = sbr.rel (%p5679_p7) target bundleno = 2771 (0xad3), region = 56 }
  0x29   : > { %4658 = dma.done.wait (%p5680_p9), [#allocation5], 22400   ;;  %p5681_p8 = pmov %p5680_p9 }
  0x2a   : > { %p352_p2 = scmp.lt.s32.totalorder %s4729_s10, 3  ;;  %v365_v0 = vlaneseq  ;;  %p5682_p3 = scmp.ne.s32.totalorder %s4729_s10, 0 }
  0x2b   : > { %4660 = vsyncadd (%p5681_p8), [#allocation5], 4294944896  ;;  %v372_v2 = vld [vmem:[#allocation4] sm:$0xff] (!%p5682_p3)  ;;  %v373_v3 = vld [vmem:[#allocation4 + $0x8] sm:$0xff] (!%p5682_p3)  ;;  %v4668_v5 = vmov (!%p5682_p3), 0.0  }
  0x2c   : > { %s353_s27 = scalar_select %p352_p2, %s4729_s10, 3  ;;  %v4772_v1 = vand.u32 127, %v365_v0 }
  0x2d   : > { %370 = sbr.rel (%p5682_p3) target bundleno = 222 (0xde), region = 64  ;;  %v374_v4 = vld [vmem:[#allocation4 + $0x10] sm:$0xff] (!%p5682_p3)  ;;  %371 = vst [vmem:[#allocation3] sm:$0x1] (!%p5682_p3), %v4668_v5  ;;  %v407_v6 = vunpack.c.l.s8.bf16 (!%p5682_p3), %v372_v2  ;;  %v408_v7 = vunpack.c.l.s8.bf16 (!%p5682_p3), %v373_v3  ;;  %v375_v9 = vld [vmem:[#allocation4 + $0x18] sm:$0xff] (!%p5682_p3)  ;;  %v376_v10 = vld [vmem:[#allocation4 + $0x20] sm:$0xff] (!%p5682_p3)  ;;  %v414_v12 = vunpack.c.h.s8.bf16 (!%p5682_p3), %v372_v2  ;;  %v415_v17 = vunpack.c.h.s8.bf16 (!%p5682_p3), %v373_v3 }
  0x2e   : > { %s4774_s28 = sshll.u32 %s353_s27, 3  ;;  %v409_v8 = vunpack.c.l.s8.bf16 (!%p5682_p3), %v374_v4  ;;  %v377_v11 = vld [vmem:[#allocation4 + $0x28] sm:$0xff] (!%p5682_p3)  ;;  %v410_v13 = vunpack.c.l.s8.bf16 (!%p5682_p3), %v375_v9  ;;  %v411_v14 = vunpack.c.l.s8.bf16 (!%p5682_p3), %v376_v10  ;;  %v378_v16 = vld [vmem:[#allocation4 + $0x30] sm:$0xff] (!%p5682_p3)  ;;  %v379_v18 = vld [vmem:[#allocation4 + $0x38] sm:$0xff] (!%p5682_p3)  ;;  %v416_v21 = vunpack.c.h.s8.bf16 (!%p5682_p3), %v374_v4 }
  0x2f   : > { %s355_s12 = scalar_lea.vmem %s5665_s0, %s4774_s28  ;;  %s359_s15 = scalar_lea.vmem %s5666_s1, %s4774_s28  ;;  %v412_v15 = vunpack.c.l.s8.bf16 (!%p5682_p3), %v377_v11  ;;  %v380_v19 = vld [vmem:[#allocation4 + $0x40] sm:$0xff] (!%p5682_p3)  ;;  %477 = vst [vmem:[#allocation2] sm:$0xff] (!%p5682_p3), %v407_v6  ;;  %478 = vst [vmem:[#allocation2 + $0x8] sm:$0xff] (!%p5682_p3), %v408_v7  ;;  %v413_v20 = vunpack.c.l.s8.bf16 (!%p5682_p3), %v378_v16  ;;  %v417_v22 = vunpack.c.h.s8.bf16 (!%p5682_p3), %v375_v9  ;;  %v418_v23 = vunpack.c.h.s8.bf16 (!%p5682_p3), %v376_v10  ;;  %v381_v24 = vld [vmem:[#allocation4 + $0x48] sm:$0xff] (!%p5682_p3) }
  0x30   : > { %s363_s18 = scalar_lea.vmem %s5667_s2, %s4774_s28  ;;  %479 = vst [vmem:[#allocation2 + $0x10] sm:$0xff] (!%p5682_p3), %v409_v8  ;;  %484 = vst [vmem:[#allocation2 + $0x38] sm:$0xff] (!%p5682_p3), %v414_v12  ;;  %v382_v25 = vld [vmem:[#allocation4 + $0x50] sm:$0xff] (!%p5682_p3)  ;;  %v383_v26 = vld [vmem:[#allocation4 + $0x58] sm:$0xff] (!%p5682_p3)  ;;  %v419_v27 = vunpack.c.h.s8.bf16 (!%p5682_p3), %v377_v11  ;;  %v420_v28 = vunpack.c.h.s8.bf16 (!%p5682_p3), %v378_v16  ;;  %v421_v29 = vunpack.c.l.s8.bf16 (!%p5682_p3), %v379_v18  ;;  %v422_v30 = vunpack.c.l.s8.bf16 (!%p5682_p3), %v380_v19 }
  0x31   : > { %480 = vst [vmem:[#allocation2 + $0x18] sm:$0xff] (!%p5682_p3), %v410_v13  ;;  %481 = vst [vmem:[#allocation2 + $0x20] sm:$0xff] (!%p5682_p3), %v411_v14  ;;  %v384_v31 = vld [vmem:[#allocation4 + $0x60] sm:$0xff] (!%p5682_p3)  ;;  %v385_v32 = vld [vmem:[#allocation4 + $0x68] sm:$0xff] (!%p5682_p3)  ;;  %v423_v34 = vunpack.c.l.s8.bf16 (!%p5682_p3), %v381_v24  ;;  %v424_v35 = vunpack.c.l.s8.bf16 (!%p5682_p3), %v382_v25  ;;  %v425_v36 = vunpack.c.l.s8.bf16 (!%p5682_p3), %v383_v26  ;;  %v428_v42 = vunpack.c.h.s8.bf16 (!%p5682_p3), %v379_v18 }
  0x32   : > { %482 = vst [vmem:[#allocation2 + $0x28] sm:$0xff] (!%p5682_p3), %v412_v15  ;;  %485 = vst [vmem:[#allocation2 + $0x40] sm:$0xff] (!%p5682_p3), %v415_v17  ;;  %v4790_v33 = vld [vmem:[#allocation4 + $0x70] sm:$0xff] (!%p5682_p3)  ;;  %v426_v37 = vunpack.c.l.s8.bf16 (!%p5682_p3), %v384_v31  ;;  %v387_v38 = vld [vmem:[#allocation4 + $0x78] sm:$0xff] (!%p5682_p3)  ;;  %v427_v41 = vunpack.c.l.s8.bf16 (!%p5682_p3), %v385_v32  ;;  %v429_v43 = vunpack.c.h.s8.bf16 (!%p5682_p3), %v380_v19  ;;  %v430_v44 = vunpack.c.h.s8.bf16 (!%p5682_p3), %v381_v24 }
  0x33   : > { %483 = vst [vmem:[#allocation2 + $0x30] sm:$0xff] (!%p5682_p3), %v413_v20  ;;  %486 = vst [vmem:[#allocation2 + $0x48] sm:$0xff] (!%p5682_p3), %v416_v21  ;;  %v388_v39 = vld [vmem:[#allocation4 + $0x80] sm:$0xff] (!%p5682_p3)  ;;  %v389_v40 = vld [vmem:[#allocation4 + $0x88] sm:$0xff] (!%p5682_p3)  ;;  %v431_v48 = vunpack.c.h.s8.bf16 (!%p5682_p3), %v382_v25  ;;  %v432_v49 = vunpack.c.h.s8.bf16 (!%p5682_p3), %v383_v26  ;;  %v433_v50 = vunpack.c.h.s8.bf16 (!%p5682_p3), %v384_v31  ;;  %v434_v51 = vunpack.c.h.s8.bf16 (!%p5682_p3), %v385_v32 }
  0x34   : > { %487 = vst [vmem:[#allocation2 + $0x50] sm:$0xff] %v417_v22  ;;  %488 = vst [vmem:[#allocation2 + $0x58] sm:$0xff] %v418_v23  ;;  %v390_v45 = vld [vmem:[#allocation4 + $0x90] sm:$0xff]  ;;  %v391_v46 = vld [vmem:[#allocation4 + $0x98] sm:$0xff]  ;;  %v435_v52 = vunpack.c.l.s8.bf16 %v4790_v33  ;;  %v436_v53 = vunpack.c.l.s8.bf16 %v387_v38  ;;  %v437_v54 = vunpack.c.l.s8.bf16 %v388_v39  ;;  %v438_v55 = vunpack.c.l.s8.bf16 %v389_v40 }
  0x35   : > { %489 = vst [vmem:[#allocation2 + $0x60] sm:$0xff] %v419_v27  ;;  %490 = vst [vmem:[#allocation2 + $0x68] sm:$0xff] %v420_v28  ;;  %v392_v47 = vld [vmem:[#allocation4 + $0xa0] sm:$0xff]  ;;  %v4793_v56 = vld [vmem:[#allocation4 + $0xa8] sm:$0xff]  ;;  %v439_v59 = vunpack.c.l.s8.bf16 %v390_v45  ;;  %v440_v60 = vunpack.c.l.s8.bf16 %v391_v46  ;;  %v442_v62 = vunpack.c.h.s8.bf16 %v4790_v33  ;;  %v443_v4 = vunpack.c.h.s8.bf16 %v387_v38 }
  0x36   : > { %491 = vst [vmem:[#allocation2 + $0x70] sm:$0xff] %v421_v29  ;;  %492 = vst [vmem:[#allocation2 + $0x78] sm:$0xff] %v422_v30  ;;  %v4795_v57 = vld [vmem:[#allocation4 + $0xb0] sm:$0xff]  ;;  %v4797_v58 = vld [vmem:[#allocation4 + $0xb8] sm:$0xff]  ;;  %v441_v61 = vunpack.c.l.s8.bf16 %v392_v47  ;;  %v444_v5 = vunpack.c.h.s8.bf16 %v388_v39  ;;  %v445_v6 = vunpack.c.h.s8.bf16 %v389_v40  ;;  %v446_v7 = vunpack.c.h.s8.bf16 %v390_v45 }
  0x37   : > { %493 = vst [vmem:[#allocation2 + $0x80] sm:$0xff] %v423_v34  ;;  %494 = vst [vmem:[#allocation2 + $0x88] sm:$0xff] %v424_v35  ;;  %v396_v63 = vld [vmem:[#allocation4 + $0xc0] sm:$0xff]  ;;  %v397_v2 = vld [vmem:[#allocation4 + $0xc8] sm:$0xff]  ;;  %v447_v9 = vunpack.c.h.s8.bf16 %v391_v46  ;;  %v448_v10 = vunpack.c.h.s8.bf16 %v392_v47  ;;  %v449_v11 = vunpack.c.l.s8.bf16 %v4793_v56  ;;  %v450_v12 = vunpack.c.l.s8.bf16 %v4795_v57 }
  0x38   : > { %495 = vst [vmem:[#allocation2 + $0x90] sm:$0xff] %v425_v36  ;;  %496 = vst [vmem:[#allocation2 + $0x98] sm:$0xff] %v426_v37  ;;  %v398_v3 = vld [vmem:[#allocation4 + $0xd0] sm:$0xff]  ;;  %v399_v8 = vld [vmem:[#allocation4 + $0xd8] sm:$0xff]  ;;  %v451_v14 = vunpack.c.l.s8.bf16 %v4797_v58  ;;  %v452_v15 = vunpack.c.l.s8.bf16 %v396_v63  ;;  %v453_v16 = vunpack.c.l.s8.bf16 %v397_v2  ;;  %v456_v22 = vunpack.c.h.s8.bf16 %v4793_v56 }
  0x39   : > { %497 = vst [vmem:[#allocation2 + $0xa0] sm:$0xff] %v427_v41  ;;  %498 = vst [vmem:[#allocation2 + $0xa8] sm:$0xff] %v428_v42  ;;  %v4802_v13 = vld [vmem:[#allocation4 + $0xe0] sm:$0xff]  ;;  %v454_v17 = vunpack.c.l.s8.bf16 %v398_v3  ;;  %v401_v18 = vld [vmem:[#allocation4 + $0xe8] sm:$0xff]  ;;  %v455_v21 = vunpack.c.l.s8.bf16 %v399_v8  ;;  %v457_v23 = vunpack.c.h.s8.bf16 %v4795_v57  ;;  %v458_v24 = vunpack.c.h.s8.bf16 %v4797_v58 }
  0x3a   : > { %499 = vst [vmem:[#allocation2 + $0xb0] sm:$0xff] %v429_v43  ;;  %500 = vst [vmem:[#allocation2 + $0xb8] sm:$0xff] %v430_v44  ;;  %v402_v19 = vld [vmem:[#allocation4 + $0xf0] sm:$0xff]  ;;  %v403_v20 = vld [vmem:[#allocation4 + $0xf8] sm:$0xff]  ;;  %v459_v28 = vunpack.c.h.s8.bf16 %v396_v63  ;;  %v460_v29 = vunpack.c.h.s8.bf16 %v397_v2  ;;  %v461_v30 = vunpack.c.h.s8.bf16 %v398_v3  ;;  %v462_v31 = vunpack.c.h.s8.bf16 %v399_v8 }
  0x3b   : > { %501 = vst [vmem:[#allocation2 + $0xc0] sm:$0xff] %v431_v48  ;;  %502 = vst [vmem:[#allocation2 + $0xc8] sm:$0xff] %v432_v49  ;;  %v404_v25 = vld [vmem:[#allocation4 + $0x100] sm:$0xff]  ;;  %v405_v26 = vld [vmem:[#allocation4 + $0x108] sm:$0xff]  ;;  %v463_v32 = vunpack.c.l.s8.bf16 %v4802_v13  ;;  %v464_v33 = vunpack.c.l.s8.bf16 %v401_v18  ;;  %v465_v34 = vunpack.c.l.s8.bf16 %v402_v19  ;;  %v466_v35 = vunpack.c.l.s8.bf16 %v403_v20 }
  0x3c   : > { %503 = vst [vmem:[#allocation2 + $0xd0] sm:$0xff] %v433_v50  ;;  %504 = vst [vmem:[#allocation2 + $0xd8] sm:$0xff] %v434_v51  ;;  %v406_v27 = vld [vmem:[#allocation4 + $0x110] sm:$0xff]  ;;  %v4809_v36 = vld [vmem:[#allocation4 + $0x118] sm:$0xff]  ;;  %v467_v39 = vunpack.c.l.s8.bf16 %v404_v25  ;;  %v468_v40 = vunpack.c.l.s8.bf16 %v405_v26  ;;  %v470_v42 = vunpack.c.h.s8.bf16 %v4802_v13  ;;  %v471_v46 = vunpack.c.h.s8.bf16 %v401_v18 }
  0x3d   : > { %505 = vst [vmem:[#allocation2 + $0xe0] sm:$0xff] %v435_v52  ;;  %506 = vst [vmem:[#allocation2 + $0xe8] sm:$0xff] %v436_v53  ;;  %v4811_v37 = vld [vmem:[#allocation4 + $0x120] sm:$0xff]  ;;  %v4813_v38 = vld [vmem:[#allocation4 + $0x128] sm:$0xff]  ;;  %v469_v41 = vunpack.c.l.s8.bf16 %v406_v27  ;;  %v472_v47 = vunpack.c.h.s8.bf16 %v402_v19  ;;  %v473_v48 = vunpack.c.h.s8.bf16 %v403_v20  ;;  %v474_v49 = vunpack.c.h.s8.bf16 %v404_v25 }
  0x3e   : > { %507 = vst [vmem:[#allocation2 + $0xf0] sm:$0xff] %v437_v54  ;;  %508 = vst [vmem:[#allocation2 + $0xf8] sm:$0xff] %v438_v55  ;;  %v550_v43 = vld [vmem:[#allocation4 + $0x130] sm:$0xff]  ;;  %v551_v44 = vld [vmem:[#allocation4 + $0x138] sm:$0xff]  ;;  %v475_v51 = vunpack.c.h.s8.bf16 %v405_v26  ;;  %v476_v52 = vunpack.c.h.s8.bf16 %v406_v27  ;;  %v582_v53 = vunpack.c.l.s8.bf16 %v4809_v36  ;;  %v583_v54 = vunpack.c.l.s8.bf16 %v4811_v37 }
  0x3f   : > { %509 = vst [vmem:[#allocation2 + $0x100] sm:$0xff] %v439_v59  ;;  %510 = vst [vmem:[#allocation2 + $0x108] sm:$0xff] %v440_v60  ;;  %v552_v45 = vld [vmem:[#allocation4 + $0x140] sm:$0xff]  ;;  %v553_v50 = vld [vmem:[#allocation4 + $0x148] sm:$0xff]  ;;  %v584_v56 = vunpack.c.l.s8.bf16 %v4813_v38  ;;  %v585_v57 = vunpack.c.l.s8.bf16 %v550_v43  ;;  %v586_v58 = vunpack.c.l.s8.bf16 %v551_v44  ;;  %v589_v2 = vunpack.c.h.s8.bf16 %v4809_v36 }
  0x40   : > { %511 = vst [vmem:[#allocation2 + $0x110] sm:$0xff] %v441_v61  ;;  %512 = vst [vmem:[#allocation2 + $0x118] sm:$0xff] %v442_v62  ;;  %v4818_v55 = vld [vmem:[#allocation4 + $0x150] sm:$0xff]  ;;  %v587_v59 = vunpack.c.l.s8.bf16 %v552_v45  ;;  %v555_v60 = vld [vmem:[#allocation4 + $0x158] sm:$0xff]  ;;  %v588_v63 = vunpack.c.l.s8.bf16 %v553_v50  ;;  %v590_v3 = vunpack.c.h.s8.bf16 %v4811_v37  ;;  %v592_v8 = vunpack.c.h.s8.bf16 %v550_v43 }
  0x41   : > { %513 = vst [vmem:[#allocation2 + $0x120] sm:$0xff] %v443_v4  ;;  %514 = vst [vmem:[#allocation2 + $0x128] sm:$0xff] %v444_v5  ;;  %v556_v61 = vld [vmem:[#allocation4 + $0x160] sm:$0xff]  ;;  %v557_v62 = vld [vmem:[#allocation4 + $0x168] sm:$0xff]  ;;  %v591_v4 = vunpack.c.h.s8.bf16 %v4813_v38  ;;  %v597_v13 = vunpack.c.l.s8.bf16 %v555_v60  ;;  %v604_v26 = vunpack.c.h.s8.bf16 %v555_v60 }
  0x42   : > { %515 = vst [vmem:[#allocation2 + $0x130] sm:$0xff] %v445_v6  ;;  %516 = vst [vmem:[#allocation2 + $0x138] sm:$0xff] %v446_v7  ;;  %v558_v5 = vld [vmem:[#allocation4 + $0x170] sm:$0xff]  ;;  %v559_v6 = vld [vmem:[#allocation4 + $0x178] sm:$0xff]  ;;  %v605_v27 = vunpack.c.h.s8.bf16 %v556_v61 }
  0x43   : > { %517 = vst [vmem:[#allocation2 + $0x140] sm:$0xff] %v447_v9  ;;  %518 = vst [vmem:[#allocation2 + $0x148] sm:$0xff] %v448_v10  ;;  %v560_v7 = vld [vmem:[#allocation4 + $0x180] sm:$0xff]  ;;  %v593_v9 = vunpack.c.h.s8.bf16 %v551_v44  ;;  %v594_v10 = vunpack.c.h.s8.bf16 %v552_v45  ;;  %v4829_v18 = vld [vmem:[#allocation4 + $0x198] sm:$0xff]  ;;  %v600_v19 = vunpack.c.l.s8.bf16 %v558_v5  ;;  %v601_v20 = vunpack.c.l.s8.bf16 %v559_v6 }
  0x44   : > { %519 = vst [vmem:[#allocation2 + $0x150] sm:$0xff] %v449_v11  ;;  %520 = vst [vmem:[#allocation2 + $0x158] sm:$0xff] %v450_v12  ;;  %v595_v11 = vunpack.c.h.s8.bf16 %v553_v50  ;;  %v596_v12 = vunpack.c.l.s8.bf16 %v4818_v55  ;;  %v566_v25 = vld [vmem:[#allocation4 + $0x1b0] sm:$0xff]  ;;  %v612_v36 = vunpack.c.l.s8.bf16 %v4829_v18  ;;  %v4845_v60 = vld [vmem:[#allocation4 + $0x208] sm:$0xff] }
  0x45   : > { %521 = vst [vmem:[#allocation2 + $0x160] sm:$0xff] %v451_v14  ;;  %522 = vst [vmem:[#allocation2 + $0x168] sm:$0xff] %v452_v15  ;;  %v598_v14 = vunpack.c.l.s8.bf16 %v556_v61  ;;  %v599_v15 = vunpack.c.l.s8.bf16 %v557_v62 }
  0x46   : > { %523 = vst [vmem:[#allocation2 + $0x170] sm:$0xff] %v453_v16  ;;  %524 = vst [vmem:[#allocation2 + $0x178] sm:$0xff] %v454_v17  ;;  %v4825_v16 = vld [vmem:[#allocation4 + $0x188] sm:$0xff]  ;;  %v4827_v17 = vld [vmem:[#allocation4 + $0x190] sm:$0xff] }
  0x47   : > { %525 = vst [vmem:[#allocation2 + $0x180] sm:$0xff] %v455_v21  ;;  %526 = vst [vmem:[#allocation2 + $0x188] sm:$0xff] %v456_v22  ;;  %v602_v21 = vunpack.c.l.s8.bf16 %v560_v7  ;;  %v603_v22 = vunpack.c.h.s8.bf16 %v4818_v55  ;;  %v617_v44 = vunpack.c.h.s8.bf16 %v4825_v16  ;;  %v618_v45 = vunpack.c.h.s8.bf16 %v4827_v17 }
  0x48   : > { %527 = vst [vmem:[#allocation2 + $0x190] sm:$0xff] %v457_v23  ;;  %528 = vst [vmem:[#allocation2 + $0x198] sm:$0xff] %v458_v24  ;;  %v564_v23 = vld [vmem:[#allocation4 + $0x1a0] sm:$0xff]  ;;  %v565_v24 = vld [vmem:[#allocation4 + $0x1a8] sm:$0xff] }
  0x49   : > { %529 = vst [vmem:[#allocation2 + $0x1a0] sm:$0xff] %v459_v28  ;;  %530 = vst [vmem:[#allocation2 + $0x1a8] sm:$0xff] %v460_v29  ;;  %v606_v28 = vunpack.c.h.s8.bf16 %v557_v62  ;;  %v607_v29 = vunpack.c.h.s8.bf16 %v558_v5  ;;  %v613_v37 = vunpack.c.l.s8.bf16 %v564_v23  ;;  %v614_v38 = vunpack.c.l.s8.bf16 %v565_v24  ;;  %v580_v5 = vld [vmem:[#allocation4 + $0x220] sm:$0xff] }
  0x4a   : > { %531 = vst [vmem:[#allocation2 + $0x1b0] sm:$0xff] %v461_v30  ;;  %532 = vst [vmem:[#allocation2 + $0x1b8] sm:$0xff] %v462_v31  ;;  %v567_v30 = vld [vmem:[#allocation4 + $0x1b8] sm:$0xff]  ;;  %v608_v31 = vunpack.c.h.s8.bf16 %v559_v6  ;;  %v620_v50 = vunpack.c.h.s8.bf16 %v564_v23 }
  0x4b   : > { %533 = vst [vmem:[#allocation2 + $0x1c0] sm:$0xff] %v463_v32  ;;  %534 = vst [vmem:[#allocation2 + $0x1c8] sm:$0xff] %v464_v33  ;;  %v609_v32 = vunpack.c.h.s8.bf16 %v560_v7  ;;  %v610_v33 = vunpack.c.l.s8.bf16 %v4825_v16  ;;  %v616_v43 = vunpack.c.l.s8.bf16 %v567_v30  ;;  %v640_v16 = vunpack.c.l.s8.bf16 %v4845_v60 }
  0x4c   : > { %535 = vst [vmem:[#allocation2 + $0x1d0] sm:$0xff] %v465_v34  ;;  %536 = vst [vmem:[#allocation2 + $0x1d8] sm:$0xff] %v466_v35  ;;  %v611_v34 = vunpack.c.l.s8.bf16 %v4827_v17  ;;  %v4834_v35 = vld [vmem:[#allocation4 + $0x1c0] sm:$0xff] }
  0x4d   : > { %537 = vst [vmem:[#allocation2 + $0x1e0] sm:$0xff] %v467_v39  ;;  %538 = vst [vmem:[#allocation2 + $0x1e8] sm:$0xff] %v468_v40  ;;  %v615_v39 = vunpack.c.l.s8.bf16 %v566_v25  ;;  %v569_v40 = vld [vmem:[#allocation4 + $0x1c8] sm:$0xff] }
  0x4e   : > { %539 = vst [vmem:[#allocation2 + $0x1f0] sm:$0xff] %v469_v41  ;;  %540 = vst [vmem:[#allocation2 + $0x1f8] sm:$0xff] %v470_v42  ;;  %v570_v41 = vld [vmem:[#allocation4 + $0x1d0] sm:$0xff]  ;;  %v571_v42 = vld [vmem:[#allocation4 + $0x1d8] sm:$0xff]  ;;  %v625_v55 = vunpack.c.l.s8.bf16 %v569_v40  ;;  %v632_v6 = vunpack.c.h.s8.bf16 %v569_v40 }
  0x4f   : > { %541 = vst [vmem:[#allocation2 + $0x200] sm:$0xff] %v471_v46  ;;  %542 = vst [vmem:[#allocation2 + $0x208] sm:$0xff] %v472_v47  ;;  %v619_v46 = vunpack.c.h.s8.bf16 %v4829_v18  ;;  %v572_v47 = vld [vmem:[#allocation4 + $0x1e0] sm:$0xff]  ;;  %v633_v7 = vunpack.c.h.s8.bf16 %v570_v41  ;;  %v4861_v40 = vld [vmem:[#allocation4 + $0x278] sm:$0xff] }
  0x50   : > { %543 = vst [vmem:[#allocation2 + $0x210] sm:$0xff] %v473_v48  ;;  %544 = vst [vmem:[#allocation2 + $0x218] sm:$0xff] %v474_v49  ;;  %v573_v48 = vld [vmem:[#allocation4 + $0x1e8] sm:$0xff]  ;;  %v574_v49 = vld [vmem:[#allocation4 + $0x1f0] sm:$0xff]  ;;  %v628_v61 = vunpack.c.l.s8.bf16 %v572_v47 }
  0x51   : > { %545 = vst [vmem:[#allocation2 + $0x220] sm:$0xff] %v475_v51  ;;  %546 = vst [vmem:[#allocation2 + $0x228] sm:$0xff] %v476_v52  ;;  %v621_v51 = vunpack.c.h.s8.bf16 %v565_v24  ;;  %v622_v52 = vunpack.c.h.s8.bf16 %v566_v25  ;;  %v629_v62 = vunpack.c.l.s8.bf16 %v573_v48 }
  0x52   : > { %652 = vst [vmem:[#allocation2 + $0x230] sm:$0xff] %v582_v53  ;;  %653 = vst [vmem:[#allocation2 + $0x238] sm:$0xff] %v583_v54  ;;  %v623_v53 = vunpack.c.h.s8.bf16 %v567_v30  ;;  %v624_v54 = vunpack.c.l.s8.bf16 %v4834_v35 }
  0x53   : > { %654 = vst [vmem:[#allocation2 + $0x240] sm:$0xff] %v584_v56  ;;  %655 = vst [vmem:[#allocation2 + $0x248] sm:$0xff] %v585_v57  ;;  %v626_v56 = vunpack.c.l.s8.bf16 %v570_v41  ;;  %v627_v57 = vunpack.c.l.s8.bf16 %v571_v42 }
  0x54   : > { %656 = vst [vmem:[#allocation2 + $0x250] sm:$0xff] %v586_v58  ;;  %657 = vst [vmem:[#allocation2 + $0x258] sm:$0xff] %v587_v59  ;;  %v4841_v58 = vld [vmem:[#allocation4 + $0x1f8] sm:$0xff]  ;;  %v4843_v59 = vld [vmem:[#allocation4 + $0x200] sm:$0xff] }
  0x55   : > { %658 = vst [vmem:[#allocation2 + $0x260] sm:$0xff] %v588_v63  ;;  %659 = vst [vmem:[#allocation2 + $0x268] sm:$0xff] %v589_v2  ;;  %v630_v63 = vunpack.c.l.s8.bf16 %v574_v49  ;;  %v631_v2 = vunpack.c.h.s8.bf16 %v4834_v35  ;;  %v645_v24 = vunpack.c.h.s8.bf16 %v4841_v58  ;;  %v646_v25 = vunpack.c.h.s8.bf16 %v4843_v59 }
  0x56   : > { %660 = vst [vmem:[#allocation2 + $0x270] sm:$0xff] %v590_v3  ;;  %661 = vst [vmem:[#allocation2 + $0x278] sm:$0xff] %v591_v4  ;;  %v578_v3 = vld [vmem:[#allocation4 + $0x210] sm:$0xff]  ;;  %v579_v4 = vld [vmem:[#allocation4 + $0x218] sm:$0xff] }
  0x57   : > { %662 = vst [vmem:[#allocation2 + $0x280] sm:$0xff] %v592_v8  ;;  %663 = vst [vmem:[#allocation2 + $0x288] sm:$0xff] %v593_v9  ;;  %v634_v8 = vunpack.c.h.s8.bf16 %v571_v42  ;;  %v635_v9 = vunpack.c.h.s8.bf16 %v572_v47  ;;  %v641_v17 = vunpack.c.l.s8.bf16 %v578_v3  ;;  %v642_v18 = vunpack.c.l.s8.bf16 %v579_v4  ;;  %v734_v47 = vld [vmem:[#allocation4 + $0x290] sm:$0xff] }
  0x58   : > { %664 = vst [vmem:[#allocation2 + $0x290] sm:$0xff] %v594_v10  ;;  %665 = vst [vmem:[#allocation2 + $0x298] sm:$0xff] %v595_v11  ;;  %v581_v10 = vld [vmem:[#allocation4 + $0x228] sm:$0xff]  ;;  %v636_v11 = vunpack.c.h.s8.bf16 %v573_v48  ;;  %v648_v30 = vunpack.c.h.s8.bf16 %v578_v3 }
  0x59   : > { %666 = vst [vmem:[#allocation2 + $0x2a0] sm:$0xff] %v596_v12  ;;  %667 = vst [vmem:[#allocation2 + $0x2a8] sm:$0xff] %v597_v13  ;;  %v637_v12 = vunpack.c.h.s8.bf16 %v574_v49  ;;  %v638_v13 = vunpack.c.l.s8.bf16 %v4841_v58  ;;  %v644_v23 = vunpack.c.l.s8.bf16 %v581_v10  ;;  %v773_v58 = vunpack.c.l.s8.bf16 %v4861_v40 }
  0x5a   : > { %668 = vst [vmem:[#allocation2 + $0x2b0] sm:$0xff] %v598_v14  ;;  %669 = vst [vmem:[#allocation2 + $0x2b8] sm:$0xff] %v599_v15  ;;  %v639_v14 = vunpack.c.l.s8.bf16 %v4843_v59  ;;  %v4850_v15 = vld [vmem:[#allocation4 + $0x230] sm:$0xff] }
  0x5b   : > { %670 = vst [vmem:[#allocation2 + $0x2c0] sm:$0xff] %v600_v19  ;;  %671 = vst [vmem:[#allocation2 + $0x2c8] sm:$0xff] %v601_v20  ;;  %v643_v19 = vunpack.c.l.s8.bf16 %v580_v5  ;;  %v723_v20 = vld [vmem:[#allocation4 + $0x238] sm:$0xff] }
  0x5c   : > { %672 = vst [vmem:[#allocation2 + $0x2d0] sm:$0xff] %v602_v21  ;;  %673 = vst [vmem:[#allocation2 + $0x2d8] sm:$0xff] %v603_v22  ;;  %v724_v21 = vld [vmem:[#allocation4 + $0x240] sm:$0xff]  ;;  %v725_v22 = vld [vmem:[#allocation4 + $0x248] sm:$0xff]  ;;  %v758_v35 = vunpack.c.l.s8.bf16 %v723_v20  ;;  %v765_v48 = vunpack.c.h.s8.bf16 %v723_v20 }
  0x5d   : > { %674 = vst [vmem:[#allocation2 + $0x2e0] sm:$0xff] %v604_v26  ;;  %675 = vst [vmem:[#allocation2 + $0x2e8] sm:$0xff] %v605_v27  ;;  %v647_v26 = vunpack.c.h.s8.bf16 %v4845_v60  ;;  %v726_v27 = vld [vmem:[#allocation4 + $0x250] sm:$0xff]  ;;  %v766_v49 = vunpack.c.h.s8.bf16 %v724_v21  ;;  %v4877_v20 = vld [vmem:[#allocation4 + $0x2e8] sm:$0xff] }
  0x5e   : > { %676 = vst [vmem:[#allocation2 + $0x2f0] sm:$0xff] %v606_v28  ;;  %677 = vst [vmem:[#allocation2 + $0x2f8] sm:$0xff] %v607_v29  ;;  %v727_v28 = vld [vmem:[#allocation4 + $0x258] sm:$0xff]  ;;  %v728_v29 = vld [vmem:[#allocation4 + $0x260] sm:$0xff]  ;;  %v761_v41 = vunpack.c.l.s8.bf16 %v726_v27 }
  0x5f   : > { %678 = vst [vmem:[#allocation2 + $0x300] sm:$0xff] %v608_v31  ;;  %679 = vst [vmem:[#allocation2 + $0x308] sm:$0xff] %v609_v32  ;;  %v649_v31 = vunpack.c.h.s8.bf16 %v579_v4  ;;  %v650_v32 = vunpack.c.h.s8.bf16 %v580_v5  ;;  %v762_v42 = vunpack.c.l.s8.bf16 %v727_v28 }
  0x60   : > { %680 = vst [vmem:[#allocation2 + $0x310] sm:$0xff] %v610_v33  ;;  %681 = vst [vmem:[#allocation2 + $0x318] sm:$0xff] %v611_v34  ;;  %v651_v33 = vunpack.c.h.s8.bf16 %v581_v10  ;;  %v757_v34 = vunpack.c.l.s8.bf16 %v4850_v15 }
  0x61   : > { %682 = vst [vmem:[#allocation2 + $0x320] sm:$0xff] %v612_v36  ;;  %683 = vst [vmem:[#allocation2 + $0x328] sm:$0xff] %v613_v37  ;;  %v759_v36 = vunpack.c.l.s8.bf16 %v724_v21  ;;  %v760_v37 = vunpack.c.l.s8.bf16 %v725_v22 }
  0x62   : > { %684 = vst [vmem:[#allocation2 + $0x330] sm:$0xff] %v614_v38  ;;  %685 = vst [vmem:[#allocation2 + $0x338] sm:$0xff] %v615_v39  ;;  %v4857_v38 = vld [vmem:[#allocation4 + $0x268] sm:$0xff]  ;;  %v4859_v39 = vld [vmem:[#allocation4 + $0x270] sm:$0xff] }
  0x63   : > { %686 = vst [vmem:[#allocation2 + $0x340] sm:$0xff] %v616_v43  ;;  %687 = vst [vmem:[#allocation2 + $0x348] sm:$0xff] %v617_v44  ;;  %v763_v43 = vunpack.c.l.s8.bf16 %v728_v29  ;;  %v764_v44 = vunpack.c.h.s8.bf16 %v4850_v15  ;;  %v778_v4 = vunpack.c.h.s8.bf16 %v4857_v38  ;;  %v779_v5 = vunpack.c.h.s8.bf16 %v4859_v39 }
  0x64   : > { %688 = vst [vmem:[#allocation2 + $0x350] sm:$0xff] %v618_v45  ;;  %689 = vst [vmem:[#allocation2 + $0x358] sm:$0xff] %v619_v46  ;;  %v732_v45 = vld [vmem:[#allocation4 + $0x280] sm:$0xff]  ;;  %v733_v46 = vld [vmem:[#allocation4 + $0x288] sm:$0xff] }
  0x65   : > { %690 = vst [vmem:[#allocation2 + $0x360] sm:$0xff] %v620_v50  ;;  %691 = vst [vmem:[#allocation2 + $0x368] sm:$0xff] %v621_v51  ;;  %v767_v50 = vunpack.c.h.s8.bf16 %v725_v22  ;;  %v768_v51 = vunpack.c.h.s8.bf16 %v726_v27  ;;  %v774_v59 = vunpack.c.l.s8.bf16 %v732_v45  ;;  %v775_v60 = vunpack.c.l.s8.bf16 %v733_v46  ;;  %v748_v27 = vld [vmem:[#allocation4 + $0x300] sm:$0xff] }
  0x66   : > { %692 = vst [vmem:[#allocation2 + $0x370] sm:$0xff] %v622_v52  ;;  %693 = vst [vmem:[#allocation2 + $0x378] sm:$0xff] %v623_v53  ;;  %v735_v52 = vld [vmem:[#allocation4 + $0x298] sm:$0xff]  ;;  %v769_v53 = vunpack.c.h.s8.bf16 %v727_v28  ;;  %v781_v10 = vunpack.c.h.s8.bf16 %v732_v45 }
  0x67   : > { %694 = vst [vmem:[#allocation2 + $0x380] sm:$0xff] %v624_v54  ;;  %695 = vst [vmem:[#allocation2 + $0x388] sm:$0xff] %v625_v55  ;;  %v770_v54 = vunpack.c.h.s8.bf16 %v728_v29  ;;  %v771_v55 = vunpack.c.l.s8.bf16 %v4857_v38  ;;  %v777_v3 = vunpack.c.l.s8.bf16 %v735_v52  ;;  %v801_v38 = vunpack.c.l.s8.bf16 %v4877_v20 }
  0x68   : > { %696 = vst [vmem:[#allocation2 + $0x390] sm:$0xff] %v626_v56  ;;  %697 = vst [vmem:[#allocation2 + $0x398] sm:$0xff] %v627_v57  ;;  %v772_v56 = vunpack.c.l.s8.bf16 %v4859_v39  ;;  %v4866_v57 = vld [vmem:[#allocation4 + $0x2a0] sm:$0xff] }
  0x69   : > { %698 = vst [vmem:[#allocation2 + $0x3a0] sm:$0xff] %v628_v61  ;;  %699 = vst [vmem:[#allocation2 + $0x3a8] sm:$0xff] %v629_v62  ;;  %v776_v61 = vunpack.c.l.s8.bf16 %v734_v47  ;;  %v737_v62 = vld [vmem:[#allocation4 + $0x2a8] sm:$0xff] }
  0x6a   : > { %700 = vst [vmem:[#allocation2 + $0x3b0] sm:$0xff] %v630_v63  ;;  %701 = vst [vmem:[#allocation2 + $0x3b8] sm:$0xff] %v631_v2  ;;  %v738_v63 = vld [vmem:[#allocation4 + $0x2b0] sm:$0xff]  ;;  %v739_v2 = vld [vmem:[#allocation4 + $0x2b8] sm:$0xff]  ;;  %v786_v15 = vunpack.c.l.s8.bf16 %v737_v62  ;;  %v793_v28 = vunpack.c.h.s8.bf16 %v737_v62 }
  0x6b   : > { %702 = vst [vmem:[#allocation2 + $0x3c0] sm:$0xff] %v632_v6  ;;  %703 = vst [vmem:[#allocation2 + $0x3c8] sm:$0xff] %v633_v7  ;;  %v780_v6 = vunpack.c.h.s8.bf16 %v4861_v40  ;;  %v740_v7 = vld [vmem:[#allocation4 + $0x2c0] sm:$0xff]  ;;  %v794_v29 = vunpack.c.h.s8.bf16 %v738_v63  ;;  %v4893_v62 = vld [vmem:[#allocation4 + $0x358] sm:$0xff] }
  0x6c   : > { %704 = vst [vmem:[#allocation2 + $0x3d0] sm:$0xff] %v634_v8  ;;  %705 = vst [vmem:[#allocation2 + $0x3d8] sm:$0xff] %v635_v9  ;;  %v741_v8 = vld [vmem:[#allocation4 + $0x2c8] sm:$0xff]  ;;  %v742_v9 = vld [vmem:[#allocation4 + $0x2d0] sm:$0xff]  ;;  %v789_v21 = vunpack.c.l.s8.bf16 %v740_v7 }
  0x6d   : > { %706 = vst [vmem:[#allocation2 + $0x3e0] sm:$0xff] %v636_v11  ;;  %707 = vst [vmem:[#allocation2 + $0x3e8] sm:$0xff] %v637_v12  ;;  %v782_v11 = vunpack.c.h.s8.bf16 %v733_v46  ;;  %v783_v12 = vunpack.c.h.s8.bf16 %v734_v47  ;;  %v790_v22 = vunpack.c.l.s8.bf16 %v741_v8 }
  0x6e   : > { %708 = vst [vmem:[#allocation2 + $0x3f0] sm:$0xff] %v638_v13  ;;  %709 = vst [vmem:[#allocation2 + $0x3f8] sm:$0xff] %v639_v14  ;;  %v784_v13 = vunpack.c.h.s8.bf16 %v735_v52  ;;  %v785_v14 = vunpack.c.l.s8.bf16 %v4866_v57 }
  0x6f   : > { %710 = vst [vmem:[#allocation2 + $0x400] sm:$0xff] %v640_v16  ;;  %711 = vst [vmem:[#allocation2 + $0x408] sm:$0xff] %v641_v17  ;;  %v787_v16 = vunpack.c.l.s8.bf16 %v738_v63  ;;  %v788_v17 = vunpack.c.l.s8.bf16 %v739_v2 }
  0x70   : > { %712 = vst [vmem:[#allocation2 + $0x410] sm:$0xff] %v642_v18  ;;  %713 = vst [vmem:[#allocation2 + $0x418] sm:$0xff] %v643_v19  ;;  %v4873_v18 = vld [vmem:[#allocation4 + $0x2d8] sm:$0xff]  ;;  %v4875_v19 = vld [vmem:[#allocation4 + $0x2e0] sm:$0xff] }
  0x71   : > { %714 = vst [vmem:[#allocation2 + $0x420] sm:$0xff] %v644_v23  ;;  %715 = vst [vmem:[#allocation2 + $0x428] sm:$0xff] %v645_v24  ;;  %v791_v23 = vunpack.c.l.s8.bf16 %v742_v9  ;;  %v792_v24 = vunpack.c.h.s8.bf16 %v4866_v57  ;;  %v806_v46 = vunpack.c.h.s8.bf16 %v4873_v18  ;;  %v807_v47 = vunpack.c.h.s8.bf16 %v4875_v19 }
  0x72   : > { %716 = vst [vmem:[#allocation2 + $0x430] sm:$0xff] %v646_v25  ;;  %717 = vst [vmem:[#allocation2 + $0x438] sm:$0xff] %v647_v26  ;;  %v746_v25 = vld [vmem:[#allocation4 + $0x2f0] sm:$0xff]  ;;  %v747_v26 = vld [vmem:[#allocation4 + $0x2f8] sm:$0xff] }
  0x73   : > { %718 = vst [vmem:[#allocation2 + $0x440] sm:$0xff] %v648_v30  ;;  %719 = vst [vmem:[#allocation2 + $0x448] sm:$0xff] %v649_v31  ;;  %v795_v30 = vunpack.c.h.s8.bf16 %v739_v2  ;;  %v796_v31 = vunpack.c.h.s8.bf16 %v740_v7  ;;  %v802_v39 = vunpack.c.l.s8.bf16 %v746_v25  ;;  %v803_v40 = vunpack.c.l.s8.bf16 %v747_v26  ;;  %v902_v7 = vld [vmem:[#allocation4 + $0x370] sm:$0xff] }
  0x74   : > { %720 = vst [vmem:[#allocation2 + $0x450] sm:$0xff] %v650_v32  ;;  %721 = vst [vmem:[#allocation2 + $0x458] sm:$0xff] %v651_v33  ;;  %v749_v32 = vld [vmem:[#allocation4 + $0x308] sm:$0xff]  ;;  %v797_v33 = vunpack.c.h.s8.bf16 %v741_v8  ;;  %v809_v52 = vunpack.c.h.s8.bf16 %v746_v25 }
  0x75   : > { %827 = vst [vmem:[#allocation2 + $0x460] sm:$0xff] %v757_v34  ;;  %828 = vst [vmem:[#allocation2 + $0x468] sm:$0xff] %v758_v35  ;;  %v798_v34 = vunpack.c.h.s8.bf16 %v742_v9  ;;  %v799_v35 = vunpack.c.l.s8.bf16 %v4873_v18  ;;  %v805_v45 = vunpack.c.l.s8.bf16 %v749_v32  ;;  %v934_v18 = vunpack.c.l.s8.bf16 %v4893_v62 }
  0x76   : > { %829 = vst [vmem:[#allocation2 + $0x470] sm:$0xff] %v759_v36  ;;  %830 = vst [vmem:[#allocation2 + $0x478] sm:$0xff] %v760_v37  ;;  %v800_v36 = vunpack.c.l.s8.bf16 %v4875_v19  ;;  %v4882_v37 = vld [vmem:[#allocation4 + $0x310] sm:$0xff] }
  0x77   : > { %831 = vst [vmem:[#allocation2 + $0x480] sm:$0xff] %v761_v41  ;;  %832 = vst [vmem:[#allocation2 + $0x488] sm:$0xff] %v762_v42  ;;  %v804_v41 = vunpack.c.l.s8.bf16 %v748_v27  ;;  %v751_v42 = vld [vmem:[#allocation4 + $0x318] sm:$0xff] }
  0x78   : > { %833 = vst [vmem:[#allocation2 + $0x490] sm:$0xff] %v763_v43  ;;  %834 = vst [vmem:[#allocation2 + $0x498] sm:$0xff] %v764_v44  ;;  %v752_v43 = vld [vmem:[#allocation4 + $0x320] sm:$0xff]  ;;  %v753_v44 = vld [vmem:[#allocation4 + $0x328] sm:$0xff]  ;;  %v814_v57 = vunpack.c.l.s8.bf16 %v751_v42  ;;  %v821_v8 = vunpack.c.h.s8.bf16 %v751_v42 }
  0x79   : > { %835 = vst [vmem:[#allocation2 + $0x4a0] sm:$0xff] %v765_v48  ;;  %836 = vst [vmem:[#allocation2 + $0x4a8] sm:$0xff] %v766_v49  ;;  %v808_v48 = vunpack.c.h.s8.bf16 %v4877_v20  ;;  %v754_v49 = vld [vmem:[#allocation4 + $0x330] sm:$0xff]  ;;  %v822_v9 = vunpack.c.h.s8.bf16 %v752_v43  ;;  %v4909_v42 = vld [vmem:[#allocation4 + $0x3c8] sm:$0xff] }
  0x7a   : > { %837 = vst [vmem:[#allocation2 + $0x4b0] sm:$0xff] %v767_v50  ;;  %838 = vst [vmem:[#allocation2 + $0x4b8] sm:$0xff] %v768_v51  ;;  %v755_v50 = vld [vmem:[#allocation4 + $0x338] sm:$0xff]  ;;  %v756_v51 = vld [vmem:[#allocation4 + $0x340] sm:$0xff]  ;;  %v817_v63 = vunpack.c.l.s8.bf16 %v754_v49 }
  0x7b   : > { %839 = vst [vmem:[#allocation2 + $0x4c0] sm:$0xff] %v769_v53  ;;  %840 = vst [vmem:[#allocation2 + $0x4c8] sm:$0xff] %v770_v54  ;;  %v810_v53 = vunpack.c.h.s8.bf16 %v747_v26  ;;  %v811_v54 = vunpack.c.h.s8.bf16 %v748_v27  ;;  %v818_v2 = vunpack.c.l.s8.bf16 %v755_v50 }
  0x7c   : > { %841 = vst [vmem:[#allocation2 + $0x4d0] sm:$0xff] %v771_v55  ;;  %842 = vst [vmem:[#allocation2 + $0x4d8] sm:$0xff] %v772_v56  ;;  %v812_v55 = vunpack.c.h.s8.bf16 %v749_v32  ;;  %v813_v56 = vunpack.c.l.s8.bf16 %v4882_v37 }
  0x7d   : > { %843 = vst [vmem:[#allocation2 + $0x4e0] sm:$0xff] %v773_v58  ;;  %844 = vst [vmem:[#allocation2 + $0x4e8] sm:$0xff] %v774_v59  ;;  %v815_v58 = vunpack.c.l.s8.bf16 %v752_v43  ;;  %v816_v59 = vunpack.c.l.s8.bf16 %v753_v44 }
  0x7e   : > { %845 = vst [vmem:[#allocation2 + $0x4f0] sm:$0xff] %v775_v60  ;;  %846 = vst [vmem:[#allocation2 + $0x4f8] sm:$0xff] %v776_v61  ;;  %v4889_v60 = vld [vmem:[#allocation4 + $0x348] sm:$0xff]  ;;  %v4891_v61 = vld [vmem:[#allocation4 + $0x350] sm:$0xff] }
  0x7f   : > { %847 = vst [vmem:[#allocation2 + $0x500] sm:$0xff] %v777_v3  ;;  %848 = vst [vmem:[#allocation2 + $0x508] sm:$0xff] %v778_v4  ;;  %v819_v3 = vunpack.c.l.s8.bf16 %v756_v51  ;;  %v820_v4 = vunpack.c.h.s8.bf16 %v4882_v37  ;;  %v939_v26 = vunpack.c.h.s8.bf16 %v4889_v60  ;;  %v940_v27 = vunpack.c.h.s8.bf16 %v4891_v61 }
  0x80   : > { %849 = vst [vmem:[#allocation2 + $0x510] sm:$0xff] %v779_v5  ;;  %850 = vst [vmem:[#allocation2 + $0x518] sm:$0xff] %v780_v6  ;;  %v900_v5 = vld [vmem:[#allocation4 + $0x360] sm:$0xff]  ;;  %v901_v6 = vld [vmem:[#allocation4 + $0x368] sm:$0xff] }
  0x81   : > { %851 = vst [vmem:[#allocation2 + $0x520] sm:$0xff] %v781_v10  ;;  %852 = vst [vmem:[#allocation2 + $0x528] sm:$0xff] %v782_v11  ;;  %v823_v10 = vunpack.c.h.s8.bf16 %v753_v44  ;;  %v824_v11 = vunpack.c.h.s8.bf16 %v754_v49  ;;  %v935_v19 = vunpack.c.l.s8.bf16 %v900_v5  ;;  %v936_v20 = vunpack.c.l.s8.bf16 %v901_v6  ;;  %v916_v49 = vld [vmem:[#allocation4 + $0x3e0] sm:$0xff] }
  0x82   : > { %853 = vst [vmem:[#allocation2 + $0x530] sm:$0xff] %v783_v12  ;;  %854 = vst [vmem:[#allocation2 + $0x538] sm:$0xff] %v784_v13  ;;  %v903_v12 = vld [vmem:[#allocation4 + $0x378] sm:$0xff]  ;;  %v825_v13 = vunpack.c.h.s8.bf16 %v755_v50  ;;  %v942_v32 = vunpack.c.h.s8.bf16 %v900_v5 }
  0x83   : > { %855 = vst [vmem:[#allocation2 + $0x540] sm:$0xff] %v785_v14  ;;  %856 = vst [vmem:[#allocation2 + $0x548] sm:$0xff] %v786_v15  ;;  %v826_v14 = vunpack.c.h.s8.bf16 %v756_v51  ;;  %v932_v15 = vunpack.c.l.s8.bf16 %v4889_v60  ;;  %v938_v25 = vunpack.c.l.s8.bf16 %v903_v12  ;;  %v962_v60 = vunpack.c.l.s8.bf16 %v4909_v42 }
  0x84   : > { %857 = vst [vmem:[#allocation2 + $0x550] sm:$0xff] %v787_v16  ;;  %858 = vst [vmem:[#allocation2 + $0x558] sm:$0xff] %v788_v17  ;;  %v933_v16 = vunpack.c.l.s8.bf16 %v4891_v61  ;;  %v4898_v17 = vld [vmem:[#allocation4 + $0x380] sm:$0xff] }
  0x85   : > { %859 = vst [vmem:[#allocation2 + $0x560] sm:$0xff] %v789_v21  ;;  %860 = vst [vmem:[#allocation2 + $0x568] sm:$0xff] %v790_v22  ;;  %v937_v21 = vunpack.c.l.s8.bf16 %v902_v7  ;;  %v905_v22 = vld [vmem:[#allocation4 + $0x388] sm:$0xff] }
  0x86   : > { %861 = vst [vmem:[#allocation2 + $0x570] sm:$0xff] %v791_v23  ;;  %862 = vst [vmem:[#allocation2 + $0x578] sm:$0xff] %v792_v24  ;;  %v906_v23 = vld [vmem:[#allocation4 + $0x390] sm:$0xff]  ;;  %v907_v24 = vld [vmem:[#allocation4 + $0x398] sm:$0xff]  ;;  %v947_v37 = vunpack.c.l.s8.bf16 %v905_v22  ;;  %v954_v50 = vunpack.c.h.s8.bf16 %v905_v22 }
  0x87   : > { %863 = vst [vmem:[#allocation2 + $0x580] sm:$0xff] %v793_v28  ;;  %864 = vst [vmem:[#allocation2 + $0x588] sm:$0xff] %v794_v29  ;;  %v941_v28 = vunpack.c.h.s8.bf16 %v4893_v62  ;;  %v908_v29 = vld [vmem:[#allocation4 + $0x3a0] sm:$0xff]  ;;  %v955_v51 = vunpack.c.h.s8.bf16 %v906_v23  ;;  %v4925_v22 = vld [vmem:[#allocation4 + $0x438] sm:$0xff] }
  0x88   : > { %865 = vst [vmem:[#allocation2 + $0x590] sm:$0xff] %v795_v30  ;;  %866 = vst [vmem:[#allocation2 + $0x598] sm:$0xff] %v796_v31  ;;  %v909_v30 = vld [vmem:[#allocation4 + $0x3a8] sm:$0xff]  ;;  %v910_v31 = vld [vmem:[#allocation4 + $0x3b0] sm:$0xff]  ;;  %v950_v43 = vunpack.c.l.s8.bf16 %v908_v29 }
  0x89   : > { %867 = vst [vmem:[#allocation2 + $0x5a0] sm:$0xff] %v797_v33  ;;  %868 = vst [vmem:[#allocation2 + $0x5a8] sm:$0xff] %v798_v34  ;;  %v943_v33 = vunpack.c.h.s8.bf16 %v901_v6  ;;  %v944_v34 = vunpack.c.h.s8.bf16 %v902_v7  ;;  %v951_v44 = vunpack.c.l.s8.bf16 %v909_v30 }
  0x8a   : > { %869 = vst [vmem:[#allocation2 + $0x5b0] sm:$0xff] %v799_v35  ;;  %870 = vst [vmem:[#allocation2 + $0x5b8] sm:$0xff] %v800_v36  ;;  %v945_v35 = vunpack.c.h.s8.bf16 %v903_v12  ;;  %v946_v36 = vunpack.c.l.s8.bf16 %v4898_v17 }
  0x8b   : > { %871 = vst [vmem:[#allocation2 + $0x5c0] sm:$0xff] %v801_v38  ;;  %872 = vst [vmem:[#allocation2 + $0x5c8] sm:$0xff] %v802_v39  ;;  %v948_v38 = vunpack.c.l.s8.bf16 %v906_v23  ;;  %v949_v39 = vunpack.c.l.s8.bf16 %v907_v24 }
  0x8c   : > { %873 = vst [vmem:[#allocation2 + $0x5d0] sm:$0xff] %v803_v40  ;;  %874 = vst [vmem:[#allocation2 + $0x5d8] sm:$0xff] %v804_v41  ;;  %v4905_v40 = vld [vmem:[#allocation4 + $0x3b8] sm:$0xff]  ;;  %v4907_v41 = vld [vmem:[#allocation4 + $0x3c0] sm:$0xff] }
  0x8d   : > { %875 = vst [vmem:[#allocation2 + $0x5e0] sm:$0xff] %v805_v45  ;;  %876 = vst [vmem:[#allocation2 + $0x5e8] sm:$0xff] %v806_v46  ;;  %v952_v45 = vunpack.c.l.s8.bf16 %v910_v31  ;;  %v953_v46 = vunpack.c.h.s8.bf16 %v4898_v17  ;;  %v967_v6 = vunpack.c.h.s8.bf16 %v4905_v40  ;;  %v968_v7 = vunpack.c.h.s8.bf16 %v4907_v41 }
  0x8e   : > { %877 = vst [vmem:[#allocation2 + $0x5f0] sm:$0xff] %v807_v47  ;;  %878 = vst [vmem:[#allocation2 + $0x5f8] sm:$0xff] %v808_v48  ;;  %v914_v47 = vld [vmem:[#allocation4 + $0x3d0] sm:$0xff]  ;;  %v915_v48 = vld [vmem:[#allocation4 + $0x3d8] sm:$0xff] }
  0x8f   : > { %879 = vst [vmem:[#allocation2 + $0x600] sm:$0xff] %v809_v52  ;;  %880 = vst [vmem:[#allocation2 + $0x608] sm:$0xff] %v810_v53  ;;  %v956_v52 = vunpack.c.h.s8.bf16 %v907_v24  ;;  %v957_v53 = vunpack.c.h.s8.bf16 %v908_v29  ;;  %v963_v61 = vunpack.c.l.s8.bf16 %v914_v47  ;;  %v964_v62 = vunpack.c.l.s8.bf16 %v915_v48  ;;  %v930_v29 = vld [vmem:[#allocation4 + $0x450] sm:$0xff] }
  0x90   : > { %881 = vst [vmem:[#allocation2 + $0x610] sm:$0xff] %v811_v54  ;;  %882 = vst [vmem:[#allocation2 + $0x618] sm:$0xff] %v812_v55  ;;  %v917_v54 = vld [vmem:[#allocation4 + $0x3e8] sm:$0xff]  ;;  %v958_v55 = vunpack.c.h.s8.bf16 %v909_v30  ;;  %v970_v12 = vunpack.c.h.s8.bf16 %v914_v47 }
  0x91   : > { %883 = vst [vmem:[#allocation2 + $0x620] sm:$0xff] %v813_v56  ;;  %884 = vst [vmem:[#allocation2 + $0x628] sm:$0xff] %v814_v57  ;;  %v959_v56 = vunpack.c.h.s8.bf16 %v910_v31  ;;  %v960_v57 = vunpack.c.l.s8.bf16 %v4905_v40  ;;  %v966_v5 = vunpack.c.l.s8.bf16 %v917_v54  ;;  %v990_v40 = vunpack.c.l.s8.bf16 %v4925_v22 }
  0x92   : > { %885 = vst [vmem:[#allocation2 + $0x630] sm:$0xff] %v815_v58  ;;  %886 = vst [vmem:[#allocation2 + $0x638] sm:$0xff] %v816_v59  ;;  %v961_v58 = vunpack.c.l.s8.bf16 %v4907_v41  ;;  %v4914_v59 = vld [vmem:[#allocation4 + $0x3f0] sm:$0xff] }
  0x93   : > { %887 = vst [vmem:[#allocation2 + $0x640] sm:$0xff] %v817_v63  ;;  %888 = vst [vmem:[#allocation2 + $0x648] sm:$0xff] %v818_v2  ;;  %v965_v63 = vunpack.c.l.s8.bf16 %v916_v49  ;;  %v919_v2 = vld [vmem:[#allocation4 + $0x3f8] sm:$0xff] }
  0x94   : > { %889 = vst [vmem:[#allocation2 + $0x650] sm:$0xff] %v819_v3  ;;  %890 = vst [vmem:[#allocation2 + $0x658] sm:$0xff] %v820_v4  ;;  %v920_v3 = vld [vmem:[#allocation4 + $0x400] sm:$0xff]  ;;  %v921_v4 = vld [vmem:[#allocation4 + $0x408] sm:$0xff]  ;;  %v975_v17 = vunpack.c.l.s8.bf16 %v919_v2  ;;  %v982_v30 = vunpack.c.h.s8.bf16 %v919_v2 }
  0x95   : > { %891 = vst [vmem:[#allocation2 + $0x660] sm:$0xff] %v821_v8  ;;  %892 = vst [vmem:[#allocation2 + $0x668] sm:$0xff] %v822_v9  ;;  %v969_v8 = vunpack.c.h.s8.bf16 %v4909_v42  ;;  %v922_v9 = vld [vmem:[#allocation4 + $0x410] sm:$0xff]  ;;  %v983_v31 = vunpack.c.h.s8.bf16 %v920_v3  ;;  %v4941_v2 = vld [vmem:[#allocation4 + $0x4a8] sm:$0xff] }
  0x96   : > { %893 = vst [vmem:[#allocation2 + $0x670] sm:$0xff] %v823_v10  ;;  %894 = vst [vmem:[#allocation2 + $0x678] sm:$0xff] %v824_v11  ;;  %v923_v10 = vld [vmem:[#allocation4 + $0x418] sm:$0xff]  ;;  %v924_v11 = vld [vmem:[#allocation4 + $0x420] sm:$0xff]  ;;  %v978_v23 = vunpack.c.l.s8.bf16 %v922_v9 }
  0x97   : > { %895 = vst [vmem:[#allocation2 + $0x680] sm:$0xff] %v825_v13  ;;  %896 = vst [vmem:[#allocation2 + $0x688] sm:$0xff] %v826_v14  ;;  %v971_v13 = vunpack.c.h.s8.bf16 %v915_v48  ;;  %v972_v14 = vunpack.c.h.s8.bf16 %v916_v49  ;;  %v979_v24 = vunpack.c.l.s8.bf16 %v923_v10 }
  0x98   : > { %1002 = vst [vmem:[#allocation2 + $0x690] sm:$0xff] %v932_v15  ;;  %1003 = vst [vmem:[#allocation2 + $0x698] sm:$0xff] %v933_v16  ;;  %v973_v15 = vunpack.c.h.s8.bf16 %v917_v54  ;;  %v974_v16 = vunpack.c.l.s8.bf16 %v4914_v59 }
  0x99   : > { %1004 = vst [vmem:[#allocation2 + $0x6a0] sm:$0xff] %v934_v18  ;;  %1005 = vst [vmem:[#allocation2 + $0x6a8] sm:$0xff] %v935_v19  ;;  %v976_v18 = vunpack.c.l.s8.bf16 %v920_v3  ;;  %v977_v19 = vunpack.c.l.s8.bf16 %v921_v4 }
  0x9a   : > { %1006 = vst [vmem:[#allocation2 + $0x6b0] sm:$0xff] %v936_v20  ;;  %1007 = vst [vmem:[#allocation2 + $0x6b8] sm:$0xff] %v937_v21  ;;  %v4921_v20 = vld [vmem:[#allocation4 + $0x428] sm:$0xff]  ;;  %v4923_v21 = vld [vmem:[#allocation4 + $0x430] sm:$0xff] }
  0x9b   : > { %1008 = vst [vmem:[#allocation2 + $0x6c0] sm:$0xff] %v938_v25  ;;  %1009 = vst [vmem:[#allocation2 + $0x6c8] sm:$0xff] %v939_v26  ;;  %v980_v25 = vunpack.c.l.s8.bf16 %v924_v11  ;;  %v981_v26 = vunpack.c.h.s8.bf16 %v4914_v59  ;;  %v995_v48 = vunpack.c.h.s8.bf16 %v4921_v20  ;;  %v996_v49 = vunpack.c.h.s8.bf16 %v4923_v21 }
  0x9c   : > { %1010 = vst [vmem:[#allocation2 + $0x6d0] sm:$0xff] %v940_v27  ;;  %1011 = vst [vmem:[#allocation2 + $0x6d8] sm:$0xff] %v941_v28  ;;  %v928_v27 = vld [vmem:[#allocation4 + $0x440] sm:$0xff]  ;;  %v929_v28 = vld [vmem:[#allocation4 + $0x448] sm:$0xff] }
  0x9d   : > { %1012 = vst [vmem:[#allocation2 + $0x6e0] sm:$0xff] %v942_v32  ;;  %1013 = vst [vmem:[#allocation2 + $0x6e8] sm:$0xff] %v943_v33  ;;  %v984_v32 = vunpack.c.h.s8.bf16 %v921_v4  ;;  %v985_v33 = vunpack.c.h.s8.bf16 %v922_v9  ;;  %v991_v41 = vunpack.c.l.s8.bf16 %v928_v27  ;;  %v992_v42 = vunpack.c.l.s8.bf16 %v929_v28  ;;  %v1084_v9 = vld [vmem:[#allocation4 + $0x4c0] sm:$0xff] }
  0x9e   : > { %1014 = vst [vmem:[#allocation2 + $0x6f0] sm:$0xff] %v944_v34  ;;  %1015 = vst [vmem:[#allocation2 + $0x6f8] sm:$0xff] %v945_v35  ;;  %v931_v34 = vld [vmem:[#allocation4 + $0x458] sm:$0xff]  ;;  %v986_v35 = vunpack.c.h.s8.bf16 %v923_v10  ;;  %v998_v54 = vunpack.c.h.s8.bf16 %v928_v27 }
  0x9f   : > { %1016 = vst [vmem:[#allocation2 + $0x700] sm:$0xff] %v946_v36  ;;  %1017 = vst [vmem:[#allocation2 + $0x708] sm:$0xff] %v947_v37  ;;  %v987_v36 = vunpack.c.h.s8.bf16 %v924_v11  ;;  %v988_v37 = vunpack.c.l.s8.bf16 %v4921_v20  ;;  %v994_v47 = vunpack.c.l.s8.bf16 %v931_v34  ;;  %v1123_v20 = vunpack.c.l.s8.bf16 %v4941_v2 }
  0xa0   : > { %1018 = vst [vmem:[#allocation2 + $0x710] sm:$0xff] %v948_v38  ;;  %1019 = vst [vmem:[#allocation2 + $0x718] sm:$0xff] %v949_v39  ;;  %v989_v38 = vunpack.c.l.s8.bf16 %v4923_v21  ;;  %v4930_v39 = vld [vmem:[#allocation4 + $0x460] sm:$0xff] }
  0xa1   : > { %1020 = vst [vmem:[#allocation2 + $0x720] sm:$0xff] %v950_v43  ;;  %1021 = vst [vmem:[#allocation2 + $0x728] sm:$0xff] %v951_v44  ;;  %v993_v43 = vunpack.c.l.s8.bf16 %v930_v29  ;;  %v1073_v44 = vld [vmem:[#allocation4 + $0x468] sm:$0xff] }
  0xa2   : > { %1022 = vst [vmem:[#allocation2 + $0x730] sm:$0xff] %v952_v45  ;;  %1023 = vst [vmem:[#allocation2 + $0x738] sm:$0xff] %v953_v46  ;;  %v1074_v45 = vld [vmem:[#allocation4 + $0x470] sm:$0xff]  ;;  %v1075_v46 = vld [vmem:[#allocation4 + $0x478] sm:$0xff]  ;;  %v1108_v59 = vunpack.c.l.s8.bf16 %v1073_v44  ;;  %v1115_v10 = vunpack.c.h.s8.bf16 %v1073_v44 }
  0xa3   : > { %1024 = vst [vmem:[#allocation2 + $0x740] sm:$0xff] %v954_v50  ;;  %1025 = vst [vmem:[#allocation2 + $0x748] sm:$0xff] %v955_v51  ;;  %v997_v50 = vunpack.c.h.s8.bf16 %v4925_v22  ;;  %v1076_v51 = vld [vmem:[#allocation4 + $0x480] sm:$0xff]  ;;  %v1116_v11 = vunpack.c.h.s8.bf16 %v1074_v45  ;;  %v4957_v44 = vld [vmem:[#allocation4 + $0x518] sm:$0xff] }
  0xa4   : > { %1026 = vst [vmem:[#allocation2 + $0x750] sm:$0xff] %v956_v52  ;;  %1027 = vst [vmem:[#allocation2 + $0x758] sm:$0xff] %v957_v53  ;;  %v1077_v52 = vld [vmem:[#allocation4 + $0x488] sm:$0xff]  ;;  %v1078_v53 = vld [vmem:[#allocation4 + $0x490] sm:$0xff]  ;;  %v1111_v3 = vunpack.c.l.s8.bf16 %v1076_v51 }
  0xa5   : > { %1028 = vst [vmem:[#allocation2 + $0x760] sm:$0xff] %v958_v55  ;;  %1029 = vst [vmem:[#allocation2 + $0x768] sm:$0xff] %v959_v56  ;;  %v999_v55 = vunpack.c.h.s8.bf16 %v929_v28  ;;  %v1000_v56 = vunpack.c.h.s8.bf16 %v930_v29  ;;  %v1112_v4 = vunpack.c.l.s8.bf16 %v1077_v52 }
  0xa6   : > { %1030 = vst [vmem:[#allocation2 + $0x770] sm:$0xff] %v960_v57  ;;  %1031 = vst [vmem:[#allocation2 + $0x778] sm:$0xff] %v961_v58  ;;  %v1001_v57 = vunpack.c.h.s8.bf16 %v931_v34  ;;  %v1107_v58 = vunpack.c.l.s8.bf16 %v4930_v39 }
  0xa7   : > { %1032 = vst [vmem:[#allocation2 + $0x780] sm:$0xff] %v962_v60  ;;  %1033 = vst [vmem:[#allocation2 + $0x788] sm:$0xff] %v963_v61  ;;  %v1109_v60 = vunpack.c.l.s8.bf16 %v1074_v45  ;;  %v1110_v61 = vunpack.c.l.s8.bf16 %v1075_v46 }
  0xa8   : > { %1034 = vst [vmem:[#allocation2 + $0x790] sm:$0xff] %v964_v62  ;;  %1035 = vst [vmem:[#allocation2 + $0x798] sm:$0xff] %v965_v63  ;;  %v4937_v62 = vld [vmem:[#allocation4 + $0x498] sm:$0xff]  ;;  %v4939_v63 = vld [vmem:[#allocation4 + $0x4a0] sm:$0xff] }
  0xa9   : > { %1036 = vst [vmem:[#allocation2 + $0x7a0] sm:$0xff] %v966_v5  ;;  %1037 = vst [vmem:[#allocation2 + $0x7a8] sm:$0xff] %v967_v6  ;;  %v1113_v5 = vunpack.c.l.s8.bf16 %v1078_v53  ;;  %v1114_v6 = vunpack.c.h.s8.bf16 %v4930_v39  ;;  %v1128_v28 = vunpack.c.h.s8.bf16 %v4937_v62  ;;  %v1129_v29 = vunpack.c.h.s8.bf16 %v4939_v63 }
  0xaa   : > { %1038 = vst [vmem:[#allocation2 + $0x7b0] sm:$0xff] %v968_v7  ;;  %1039 = vst [vmem:[#allocation2 + $0x7b8] sm:$0xff] %v969_v8  ;;  %v1082_v7 = vld [vmem:[#allocation4 + $0x4b0] sm:$0xff]  ;;  %v1083_v8 = vld [vmem:[#allocation4 + $0x4b8] sm:$0xff] }
  0xab   : > { %1040 = vst [vmem:[#allocation2 + $0x7c0] sm:$0xff] %v970_v12  ;;  %1041 = vst [vmem:[#allocation2 + $0x7c8] sm:$0xff] %v971_v13  ;;  %v1117_v12 = vunpack.c.h.s8.bf16 %v1075_v46  ;;  %v1118_v13 = vunpack.c.h.s8.bf16 %v1076_v51  ;;  %v1124_v21 = vunpack.c.l.s8.bf16 %v1082_v7  ;;  %v1125_v22 = vunpack.c.l.s8.bf16 %v1083_v8  ;;  %v1098_v51 = vld [vmem:[#allocation4 + $0x530] sm:$0xff] }
  0xac   : > { %1042 = vst [vmem:[#allocation2 + $0x7d0] sm:$0xff] %v972_v14  ;;  %1043 = vst [vmem:[#allocation2 + $0x7d8] sm:$0xff] %v973_v15  ;;  %v1085_v14 = vld [vmem:[#allocation4 + $0x4c8] sm:$0xff]  ;;  %v1119_v15 = vunpack.c.h.s8.bf16 %v1077_v52  ;;  %v1131_v34 = vunpack.c.h.s8.bf16 %v1082_v7 }
  0xad   : > { %1044 = vst [vmem:[#allocation2 + $0x7e0] sm:$0xff] %v974_v16  ;;  %1045 = vst [vmem:[#allocation2 + $0x7e8] sm:$0xff] %v975_v17  ;;  %v1120_v16 = vunpack.c.h.s8.bf16 %v1078_v53  ;;  %v1121_v17 = vunpack.c.l.s8.bf16 %v4937_v62  ;;  %v1127_v27 = vunpack.c.l.s8.bf16 %v1085_v14  ;;  %v1151_v62 = vunpack.c.l.s8.bf16 %v4957_v44 }
  0xae   : > { %1046 = vst [vmem:[#allocation2 + $0x7f0] sm:$0xff] %v976_v18  ;;  %1047 = vst [vmem:[#allocation2 + $0x7f8] sm:$0xff] %v977_v19  ;;  %v1122_v18 = vunpack.c.l.s8.bf16 %v4939_v63  ;;  %v4946_v19 = vld [vmem:[#allocation4 + $0x4d0] sm:$0xff] }
  0xaf   : > { %1048 = vst [vmem:[#allocation2 + $0x800] sm:$0xff] %v978_v23  ;;  %1049 = vst [vmem:[#allocation2 + $0x808] sm:$0xff] %v979_v24  ;;  %v1126_v23 = vunpack.c.l.s8.bf16 %v1084_v9  ;;  %v1087_v24 = vld [vmem:[#allocation4 + $0x4d8] sm:$0xff] }
  0xb0   : > { %1050 = vst [vmem:[#allocation2 + $0x810] sm:$0xff] %v980_v25  ;;  %1051 = vst [vmem:[#allocation2 + $0x818] sm:$0xff] %v981_v26  ;;  %v1088_v25 = vld [vmem:[#allocation4 + $0x4e0] sm:$0xff]  ;;  %v1089_v26 = vld [vmem:[#allocation4 + $0x4e8] sm:$0xff]  ;;  %v1136_v39 = vunpack.c.l.s8.bf16 %v1087_v24  ;;  %v1143_v52 = vunpack.c.h.s8.bf16 %v1087_v24 }
  0xb1   : > { %1052 = vst [vmem:[#allocation2 + $0x820] sm:$0xff] %v982_v30  ;;  %1053 = vst [vmem:[#allocation2 + $0x828] sm:$0xff] %v983_v31  ;;  %v1130_v30 = vunpack.c.h.s8.bf16 %v4941_v2  ;;  %v1090_v31 = vld [vmem:[#allocation4 + $0x4f0] sm:$0xff]  ;;  %v1144_v53 = vunpack.c.h.s8.bf16 %v1088_v25 }
  0xb2   : > { %1054 = vst [vmem:[#allocation2 + $0x830] sm:$0xff] %v984_v32  ;;  %1055 = vst [vmem:[#allocation2 + $0x838] sm:$0xff] %v985_v33  ;;  %v1091_v32 = vld [vmem:[#allocation4 + $0x4f8] sm:$0xff]  ;;  %v1092_v33 = vld [vmem:[#allocation4 + $0x500] sm:$0xff]  ;;  %v1139_v45 = vunpack.c.l.s8.bf16 %v1090_v31 }
  0xb3   : > { %1056 = vst [vmem:[#allocation2 + $0x840] sm:$0xff] %v986_v35  ;;  %1057 = vst [vmem:[#allocation2 + $0x848] sm:$0xff] %v987_v36  ;;  %v1132_v35 = vunpack.c.h.s8.bf16 %v1083_v8  ;;  %v1133_v36 = vunpack.c.h.s8.bf16 %v1084_v9  ;;  %v1140_v46 = vunpack.c.l.s8.bf16 %v1091_v32 }
  0xb4   : > { %1058 = vst [vmem:[#allocation2 + $0x850] sm:$0xff] %v988_v37  ;;  %1059 = vst [vmem:[#allocation2 + $0x858] sm:$0xff] %v989_v38  ;;  %v1134_v37 = vunpack.c.h.s8.bf16 %v1085_v14  ;;  %v1135_v38 = vunpack.c.l.s8.bf16 %v4946_v19 }
  0xb5   : > { %1060 = vst [vmem:[#allocation2 + $0x860] sm:$0xff] %v990_v40  ;;  %1061 = vst [vmem:[#allocation2 + $0x868] sm:$0xff] %v991_v41  ;;  %v1137_v40 = vunpack.c.l.s8.bf16 %v1088_v25  ;;  %v1138_v41 = vunpack.c.l.s8.bf16 %v1089_v26 }
  0xb6   : > { %1062 = vst [vmem:[#allocation2 + $0x870] sm:$0xff] %v992_v42  ;;  %1063 = vst [vmem:[#allocation2 + $0x878] sm:$0xff] %v993_v43  ;;  %v4953_v42 = vld [vmem:[#allocation4 + $0x508] sm:$0xff]  ;;  %v4955_v43 = vld [vmem:[#allocation4 + $0x510] sm:$0xff] }
  0xb7   : > { %1064 = vst [vmem:[#allocation2 + $0x880] sm:$0xff] %v994_v47  ;;  %1065 = vst [vmem:[#allocation2 + $0x888] sm:$0xff] %v995_v48  ;;  %v1141_v47 = vunpack.c.l.s8.bf16 %v1092_v33  ;;  %v1142_v48 = vunpack.c.h.s8.bf16 %v4946_v19  ;;  %v1156_v8 = vunpack.c.h.s8.bf16 %v4953_v42  ;;  %v1157_v9 = vunpack.c.h.s8.bf16 %v4955_v43 }
  0xb8   : > { %1066 = vst [vmem:[#allocation2 + $0x890] sm:$0xff] %v996_v49  ;;  %1067 = vst [vmem:[#allocation2 + $0x898] sm:$0xff] %v997_v50  ;;  %v1096_v49 = vld [vmem:[#allocation4 + $0x520] sm:$0xff]  ;;  %v1097_v50 = vld [vmem:[#allocation4 + $0x528] sm:$0xff] }
  0xb9   : > { %1068 = vst [vmem:[#allocation2 + $0x8a0] sm:$0xff] %v998_v54  ;;  %1069 = vst [vmem:[#allocation2 + $0x8a8] sm:$0xff] %v999_v55  ;;  %v1145_v54 = vunpack.c.h.s8.bf16 %v1089_v26  ;;  %v1146_v55 = vunpack.c.h.s8.bf16 %v1090_v31  ;;  %v1152_v63 = vunpack.c.l.s8.bf16 %v1096_v49  ;;  %v1153_v2 = vunpack.c.l.s8.bf16 %v1097_v50 }
  0xba   : > { %1070 = vst [vmem:[#allocation2 + $0x8b0] sm:$0xff] %v1000_v56  ;;  %1071 = vst [vmem:[#allocation2 + $0x8b8] sm:$0xff] %v1001_v57  ;;  %v1099_v56 = vld [vmem:[#allocation4 + $0x538] sm:$0xff]  ;;  %v1147_v57 = vunpack.c.h.s8.bf16 %v1091_v32  ;;  %v1159_v14 = vunpack.c.h.s8.bf16 %v1096_v49 }
  0xbb   : > { %1177 = vst [vmem:[#allocation2 + $0x8c0] sm:$0xff] %v1107_v58  ;;  %1178 = vst [vmem:[#allocation2 + $0x8c8] sm:$0xff] %v1108_v59  ;;  %v1148_v58 = vunpack.c.h.s8.bf16 %v1092_v33  ;;  %v1149_v59 = vunpack.c.l.s8.bf16 %v4953_v42  ;;  %v1155_v7 = vunpack.c.l.s8.bf16 %v1099_v56 }
  0xbc   : > { %1179 = vst [vmem:[#allocation2 + $0x8d0] sm:$0xff] %v1109_v60  ;;  %1180 = vst [vmem:[#allocation2 + $0x8d8] sm:$0xff] %v1110_v61  ;;  %v1150_v60 = vunpack.c.l.s8.bf16 %v4955_v43  ;;  %v1100_v61 = vld [vmem:[#allocation4 + $0x540] sm:$0xff] }
  0xbd   : > { %1181 = vst [vmem:[#allocation2 + $0x8e0] sm:$0xff] %v1111_v3  ;;  %1182 = vst [vmem:[#allocation2 + $0x8e8] sm:$0xff] %v1112_v4  ;;  %v1154_v3 = vunpack.c.l.s8.bf16 %v1098_v51  ;;  %v1101_v4 = vld [vmem:[#allocation4 + $0x548] sm:$0xff]  ;;  %v1170_v25 = vunpack.c.h.s8.bf16 %v1100_v61 }
  0xbe   : > { %1183 = vst [vmem:[#allocation2 + $0x8f0] sm:$0xff] %v1113_v5  ;;  %1184 = vst [vmem:[#allocation2 + $0x8f8] sm:$0xff] %v1114_v6  ;;  %v1102_v5 = vld [vmem:[#allocation4 + $0x550] sm:$0xff]  ;;  %v1103_v6 = vld [vmem:[#allocation4 + $0x558] sm:$0xff]  ;;  %v1164_v19 = vunpack.c.l.s8.bf16 %v1101_v4  ;;  %v1171_v26 = vunpack.c.h.s8.bf16 %v1101_v4 }
  0xbf   : > { %1185 = vst [vmem:[#allocation2 + $0x900] sm:$0xff] %v1115_v10  ;;  %1186 = vst [vmem:[#allocation2 + $0x908] sm:$0xff] %v1116_v11  ;;  %v1158_v10 = vunpack.c.h.s8.bf16 %v4957_v44  ;;  %v1104_v11 = vld [vmem:[#allocation4 + $0x560] sm:$0xff] }
  0xc0   : > { %1187 = vst [vmem:[#allocation2 + $0x910] sm:$0xff] %v1117_v12  ;;  %1188 = vst [vmem:[#allocation2 + $0x918] sm:$0xff] %v1118_v13  ;;  %v1105_v12 = vld [vmem:[#allocation4 + $0x568] sm:$0xff]  ;;  %v1106_v13 = vld [vmem:[#allocation4 + $0x570] sm:$0xff] }
  0xc1   : > { %1189 = vst [vmem:[#allocation2 + $0x920] sm:$0xff] %v1119_v15  ;;  %1190 = vst [vmem:[#allocation2 + $0x928] sm:$0xff] %v1120_v16  ;;  %v1160_v15 = vunpack.c.h.s8.bf16 %v1097_v50  ;;  %v1161_v16 = vunpack.c.h.s8.bf16 %v1098_v51  ;;  %v1169_v24 = vunpack.c.l.s8.bf16 %v1106_v13  ;;  %v1176_v31 = vunpack.c.h.s8.bf16 %v1106_v13 }
  0xc2   : > { %1191 = vst [vmem:[#allocation2 + $0x930] sm:$0xff] %v1121_v17  ;;  %1192 = vst [vmem:[#allocation2 + $0x938] sm:$0xff] %v1122_v18  ;;  %v1162_v17 = vunpack.c.h.s8.bf16 %v1099_v56  ;;  %v1163_v18 = vunpack.c.l.s8.bf16 %v1100_v61 }
  0xc3   : > { %1193 = vst [vmem:[#allocation2 + $0x940] sm:$0xff] %v1123_v20  ;;  %1194 = vst [vmem:[#allocation2 + $0x948] sm:$0xff] %v1124_v21  ;;  %v1165_v20 = vunpack.c.l.s8.bf16 %v1102_v5  ;;  %v1166_v21 = vunpack.c.l.s8.bf16 %v1103_v6 }
  0xc4   : > { %1195 = vst [vmem:[#allocation2 + $0x950] sm:$0xff] %v1125_v22  ;;  %1196 = vst [vmem:[#allocation2 + $0x958] sm:$0xff] %v1126_v23  ;;  %v1167_v22 = vunpack.c.l.s8.bf16 %v1104_v11  ;;  %v1168_v23 = vunpack.c.l.s8.bf16 %v1105_v12 }
  0xc5   : > { %1197 = vst [vmem:[#allocation2 + $0x960] sm:$0xff] %v1127_v27  ;;  %1198 = vst [vmem:[#allocation2 + $0x968] sm:$0xff] %v1128_v28  ;;  %v1172_v27 = vunpack.c.h.s8.bf16 %v1102_v5  ;;  %v1173_v28 = vunpack.c.h.s8.bf16 %v1103_v6 }
  0xc6   : > { %1199 = vst [vmem:[#allocation2 + $0x970] sm:$0xff] %v1129_v29  ;;  %1200 = vst [vmem:[#allocation2 + $0x978] sm:$0xff] %v1130_v30  ;;  %v1174_v29 = vunpack.c.h.s8.bf16 %v1104_v11  ;;  %v1175_v30 = vunpack.c.h.s8.bf16 %v1105_v12 }
  0xc7   : > { %1201 = vst [vmem:[#allocation2 + $0x980] sm:$0xff] %v1131_v34  ;;  %1202 = vst [vmem:[#allocation2 + $0x988] sm:$0xff] %v1132_v35 }
  0xc8   : > { %1203 = vst [vmem:[#allocation2 + $0x990] sm:$0xff] %v1133_v36  ;;  %1204 = vst [vmem:[#allocation2 + $0x998] sm:$0xff] %v1134_v37 }
  0xc9   : > { %1205 = vst [vmem:[#allocation2 + $0x9a0] sm:$0xff] %v1135_v38  ;;  %1206 = vst [vmem:[#allocation2 + $0x9a8] sm:$0xff] %v1136_v39 }
  0xca   : > { %1207 = vst [vmem:[#allocation2 + $0x9b0] sm:$0xff] %v1137_v40  ;;  %1208 = vst [vmem:[#allocation2 + $0x9b8] sm:$0xff] %v1138_v41 }
  0xcb   : > { %1209 = vst [vmem:[#allocation2 + $0x9c0] sm:$0xff] %v1139_v45  ;;  %1210 = vst [vmem:[#allocation2 + $0x9c8] sm:$0xff] %v1140_v46 }
  0xcc   : > { %1211 = vst [vmem:[#allocation2 + $0x9d0] sm:$0xff] %v1141_v47  ;;  %1212 = vst [vmem:[#allocation2 + $0x9d8] sm:$0xff] %v1142_v48 }
  0xcd   : > { %1213 = vst [vmem:[#allocation2 + $0x9e0] sm:$0xff] %v1143_v52  ;;  %1214 = vst [vmem:[#allocation2 + $0x9e8] sm:$0xff] %v1144_v53 }
  0xce   : > { %1215 = vst [vmem:[#allocation2 + $0x9f0] sm:$0xff] %v1145_v54  ;;  %1216 = vst [vmem:[#allocation2 + $0x9f8] sm:$0xff] %v1146_v55 }
  0xcf   : > { %1217 = vst [vmem:[#allocation2 + $0xa00] sm:$0xff] %v1147_v57  ;;  %1218 = vst [vmem:[#allocation2 + $0xa08] sm:$0xff] %v1148_v58 }
  0xd0   : > { %1219 = vst [vmem:[#allocation2 + $0xa10] sm:$0xff] %v1149_v59  ;;  %1220 = vst [vmem:[#allocation2 + $0xa18] sm:$0xff] %v1150_v60 }
  0xd1   : > { %1221 = vst [vmem:[#allocation2 + $0xa20] sm:$0xff] %v1151_v62  ;;  %1222 = vst [vmem:[#allocation2 + $0xa28] sm:$0xff] %v1152_v63 }
  0xd2   : > { %1223 = vst [vmem:[#allocation2 + $0xa30] sm:$0xff] %v1153_v2  ;;  %1224 = vst [vmem:[#allocation2 + $0xa38] sm:$0xff] %v1154_v3 }
  0xd3   : > { %1225 = vst [vmem:[#allocation2 + $0xa40] sm:$0xff] %v1155_v7  ;;  %1226 = vst [vmem:[#allocation2 + $0xa48] sm:$0xff] %v1156_v8 }
  0xd4   : > { %1227 = vst [vmem:[#allocation2 + $0xa50] sm:$0xff] %v1157_v9  ;;  %1228 = vst [vmem:[#allocation2 + $0xa58] sm:$0xff] %v1158_v10 }
  0xd5   : > { %1229 = vst [vmem:[#allocation2 + $0xa60] sm:$0xff] %v1159_v14  ;;  %1230 = vst [vmem:[#allocation2 + $0xa68] sm:$0xff] %v1160_v15 }
  0xd6   : > { %1231 = vst [vmem:[#allocation2 + $0xa70] sm:$0xff] %v1161_v16  ;;  %1232 = vst [vmem:[#allocation2 + $0xa78] sm:$0xff] %v1162_v17 }
  0xd7   : > { %1233 = vst [vmem:[#allocation2 + $0xa80] sm:$0xff] %v1163_v18  ;;  %1234 = vst [vmem:[#allocation2 + $0xa88] sm:$0xff] %v1164_v19 }
  0xd8   : > { %1235 = vst [vmem:[#allocation2 + $0xa90] sm:$0xff] %v1165_v20  ;;  %1236 = vst [vmem:[#allocation2 + $0xa98] sm:$0xff] %v1166_v21 }
  0xd9   : > { %1237 = vst [vmem:[#allocation2 + $0xaa0] sm:$0xff] %v1167_v22  ;;  %1238 = vst [vmem:[#allocation2 + $0xaa8] sm:$0xff] %v1168_v23 }
  0xda   : > { %1239 = vst [vmem:[#allocation2 + $0xab0] sm:$0xff] %v1169_v24  ;;  %1240 = vst [vmem:[#allocation2 + $0xab8] sm:$0xff] %v1170_v25 }
  0xdb   : > { %1241 = vst [vmem:[#allocation2 + $0xac0] sm:$0xff] %v1171_v26  ;;  %1242 = vst [vmem:[#allocation2 + $0xac8] sm:$0xff] %v1172_v27 }
  0xdc   : > { %1243 = vst [vmem:[#allocation2 + $0xad0] sm:$0xff] %v1173_v28  ;;  %1244 = vst [vmem:[#allocation2 + $0xad8] sm:$0xff] %v1174_v29 }
  0xdd   : > { %1245 = vst [vmem:[#allocation2 + $0xae0] sm:$0xff] %v1175_v30  ;;  %1246 = vst [vmem:[#allocation2 + $0xae8] sm:$0xff] %v1176_v31 }
  0xde PF: > { %v4501_v32 = vld [vmem:[%s5668_s3 + $0x4] ss:$8 sps:$4 sm:$0xff]   ;;  %v4503_v33 = vld [vmem:[%s5668_s3] ss:$8 sps:$4 sm:$0xff]   ;;  %v4669_v34 = vmov 0   ;;  %vm1337_vm0 = vcmask 523264  }
  0xdf   : > { %1373 = vmatprep.mubr.bf16.mxu0 %v4669_v34  ;;  %1482 = vmatprep.mubr.bf16.mxu1 %v4669_v34  ;;  %v4504_v35 = vld [vmem:[%s5668_s3 + $0x14] ss:$8 sps:$4 sm:$0xff]   ;;  %v4506_v36 = vld [vmem:[%s5668_s3 + $0x10] ss:$8 sps:$4 sm:$0xff]   ;;  %v4507_v37 = vld [vmem:[%s5668_s3 + $0x24] ss:$8 sps:$4 sm:$0xff]  }
  0xe0   : > { %1341 = vmatprep.subr.bf16.mxu0 %v4501_v32  ;;  %v4509_v38 = vld [vmem:[%s5668_s3 + $0x20] ss:$8 sps:$4 sm:$0xff]   ;;  %v4510_v39 = vld [vmem:[%s5668_s3 + $0x34] ss:$8 sps:$4 sm:$0xff]   ;;  %v4512_v40 = vld [vmem:[%s5668_s3 + $0x30] ss:$8 sps:$4 sm:$0xff]  }
  0xe1   : > { %1342 = vmatpush1.bf16.msra.mxu0 %v4503_v33  ;;  %v1268_v41 = vld [vmem:[%s355_s12] sm:$0xff]  ;;  %v4516_v45 = vld [vmem:[%s5668_s3 + $0x54] ss:$8 sps:$4 sm:$0xff]   ;;  %v4518_v46 = vld [vmem:[%s5668_s3 + $0x50] ss:$8 sps:$4 sm:$0xff]   ;;  %v5030_v51 = vshrl.u32 %v365_v0, 7 }
  0xe2   : > { %1343 = vmatprep.subr.bf16.mxu0 %v4504_v35  ;;  %v4997_v42 = vpack.c.bf16 %v1268_v41, %v1268_v41  ;;  %v4513_v43 = vld [vmem:[%s5668_s3 + $0x44] ss:$8 sps:$4 sm:$0xff]   ;;  %v4515_v44 = vld [vmem:[%s5668_s3 + $0x40] ss:$8 sps:$4 sm:$0xff]   ;;  %v4522_v49 = vld [vmem:[%s5668_s3 + $0x74] ss:$8 sps:$4 sm:$0xff]  }
  0xe3   : > { %1450 = vmatprep.subr.bf16.mxu1 %v4513_v43  ;;  %v4519_v47 = vld [vmem:[%s5668_s3 + $0x64] ss:$8 sps:$4 sm:$0xff]   ;;  %v4521_v48 = vld [vmem:[%s5668_s3 + $0x60] ss:$8 sps:$4 sm:$0xff]   ;;  %v4524_v50 = vld [vmem:[%s5668_s3 + $0x70] ss:$8 sps:$4 sm:$0xff]  }
  0xe4   : > { %1451 = vmatpush1.bf16.msra.mxu1 %v4515_v44  ;;  %v5033_v52 = vsub.s32 1, %v5030_v51  ;;  %v1247_v53 = vld [vmem:[%s5673_s8] ss:$8 sm:$0x3]  ;;  %v5039_v54 = vsub.s32 0, %v5030_v51  ;;  %v4527_v4 = vld [vmem:[%s5669_s4 + $0x70] sm:$0xff]  }
  0xe5   : > { %1344 = vmatpush1.bf16.msra.mxu0 %v4506_v36  ;;  %1452 = vmatprep.subr.bf16.mxu1 %v4516_v45  ;;  %v4525_v2 = vld [vmem:[%s5669_s4 + $0x60] sm:$0xff]   ;;  %v4526_v3 = vld [vmem:[%s5669_s4 + $0x68] sm:$0xff]   ;;  %v4528_v5 = vld [vmem:[%s5669_s4 + $0x78] sm:$0xff]   ;;  %vm4671_vm1 = vmmov 0   ;;  %vm1791_vm2 = vcmask 31744   ;;  %vm1783_vm3 = vcmask 261120  }
  0xe6   : > { %1345 = vmatprep.subr.bf16.mxu0 %v4507_v37  ;;  %v1294_v55 = vrot.slane %v1247_v53, %v5033_v52  ;;  %v1290_v56 = vrot.slane %v1247_v53, %v5039_v54  ;;  %v4529_v6 = vld [vmem:[%s5669_s4 + $0x80] sm:$0xff]   ;;  %v4530_v7 = vld [vmem:[%s5669_s4 + $0x88] sm:$0xff]   ;;  %v4531_v8 = vld [vmem:[%s5669_s4 + $0x90] sm:$0xff]   ;;  %vm1906_vm7 = vcmask 7168   ;;  %vm3848_vm12 = vcmp.eq.s32.totalorder %v4772_v1, 0  ;;  %p4251_p4 = scmp.ne.s32.totalorder %s4729_s10, 3 }
  0xe7   : > { %v4532_v9 = vld [vmem:[%s5669_s4 + $0x98] sm:$0xff]   ;;  %v4533_v19 = vld [vmem:[%s5669_s4 + $0xa0] sm:$0xff]   ;;  %v4534_v21 = vld [vmem:[%s5669_s4 + $0xa8] sm:$0xff]   ;;  %vm3851_vm13 = vcmp.eq.s32.totalorder %v4772_v1, 1  ;;  %vm3854_vm14 = vcmp.eq.s32.totalorder %v4772_v1, 8  ;;  %vm3857_vm15 = vcmp.eq.s32.totalorder %v4772_v1, 2 }
  0xe8   : > { %1453 = vmatpush1.bf16.msra.mxu1 %v4518_v46  ;;  %v4535_v25 = vld [vmem:[%s5669_s4 + $0xb0] sm:$0xff]   ;;  %v4536_v26 = vld [vmem:[%s5669_s4 + $0xb8] sm:$0xff]   ;;  %v4138_v27 = vld [vmem:[%s5673_s8 + $0x1] ss:$8 sm:$0x3] }
  0xe9   : > { %1346 = vmatpush1.bf16.msra.mxu0 %v4509_v38  ;;  %1454 = vmatprep.subr.bf16.mxu1 %v4519_v47  ;;  %v1403_v29 = vrot.slane %v4138_v27, %v5039_v54  ;;  %v1407_v30 = vrot.slane %v4138_v27, %v5033_v52  ;;  %v4537_v44 = vld [vmem:[%s5669_s4] sm:$0xff]   ;;  %v4538_v46 = vld [vmem:[%s5669_s4 + $0x8] sm:$0xff]   ;;  %v4539_v47 = vld [vmem:[%s5669_s4 + $0x10] sm:$0xff]  }
  0xea   : > { %1347 = vmatprep.subr.bf16.mxu0 %v4510_v39  ;;  %v4543_v53 = vld [vmem:[%s5669_s4 + $0x30] sm:$0xff]   ;;  %v1250_v27 = vld [vmem:[%s5673_s8 + $0x2] ss:$0 sm:$0xff] }
  0xec   : > { %1455 = vmatpush1.bf16.msra.mxu1 %v4521_v48  ;;  %v4540_v48 = vld [vmem:[%s5669_s4 + $0x18] sm:$0xff]  }
  0xed   : > { %1348 = vmatpush1.bf16.msra.mxu0 %v4512_v40  ;;  %1456 = vmatprep.subr.bf16.mxu1 %v4522_v49  ;;  %v4541_v49 = vld [vmem:[%s5669_s4 + $0x20] sm:$0xff]  }
  0xee   : > { %1622 = vmatprep.subr.bf16.mxu0 %v4669_v34 }
  0xf0   : > { %4155 = vmatmul.mubr.msk.bf16.vlgmr.msra.gmra.mrb[0].mxu0 %vm1337_vm0, %v4997_v42  ;;  %1457 = vmatpush1.bf16.msra.mxu1 %v4524_v50  ;;  %v4542_v50 = vld [vmem:[%s5669_s4 + $0x28] sm:$0xff]  }
  0xf1   : > { %1623 = vmatpush1.bf16.msra.mxu0 %v4525_v2 }
  0xf2   : > { %1624 = vmatprep.subr.bf16.mxu0 %v4669_v34 }
  0xf3   : > { %4164 = vmatmul.mubr.msk.bf16.vlgmr.msra.gmra.mrb[0].mxu1 %vm1337_vm0, %v4997_v42 }
  0xf4   : > { %2169 = vmatprep.mubr.bf16.mxu1 %v4669_v34 }
  0xf5   : > { %1625 = vmatpush1.bf16.msra.mxu0 %v4526_v3  ;;  %v4551_v3 = vld [vmem:[%s5671_s6 + $0xe4] ss:$28 sps:$4 sm:$0xff]  }
  0xf6   : > { %1626 = vmatprep.subr.bf16.mxu0 %v4669_v34  ;;  %2137 = vmatprep.subr.bf16.mxu1 %v4551_v3  ;;  %v4590_v3 = vld [vmem:[%s5671_s6 + $0x10] ss:$28 sps:$4 sm:$0xff]  }
  0xf9   : > { %1627 = vmatpush1.bf16.msra.mxu0 %v4527_v4  ;;  %v1780_v4 = vld [vmem:[%s5670_s5 + $0x10] sm:$0xff] }
  0xfa   : > { %1628 = vmatprep.subr.bf16.mxu0 %v4669_v34 }
  0xfd   : > { %1629 = vmatpush1.bf16.msra.mxu0 %v4528_v5  ;;  %v1781_v5 = vld [vmem:[%s5670_s5 + $0x18] sm:$0xff] }
  0xfe   : > { %1630 = vmatprep.subr.bf16.mxu0 %v4669_v34 }
 0x101   : > { %1631 = vmatpush1.bf16.msra.mxu0 %v4529_v6  ;;  %v4379_v6 = vpack.c.bf16 %v1781_v5, %v1780_v4 }
 0x102   : > { %1632 = vmatprep.subr.bf16.mxu0 %v4669_v34 }
 0x105   : > { %1633 = vmatpush1.bf16.msra.mxu0 %v4530_v7  ;;  %v4554_v7 = vld [vmem:[%s5671_s6 + $0x11c] ss:$28 sps:$4 sm:$0xff]  }
 0x106   : > { %1634 = vmatprep.subr.bf16.mxu0 %v4669_v34 }
 0x109   : > { %1635 = vmatpush1.bf16.msra.mxu0 %v4531_v8  ;;  %v4552_v8 = vld [vmem:[%s5671_s6 + $0x118] ss:$28 sps:$4 sm:$0xff]  }
 0x10a   : > { %1636 = vmatprep.subr.bf16.mxu0 %v4669_v34 }
 0x10d   : > { %1637 = vmatpush1.bf16.msra.mxu0 %v4532_v9  ;;  %v4557_v9 = vld [vmem:[%s5671_s6 + $0xec] ss:$28 sps:$4 sm:$0xff]  }
 0x10e   : > { %1638 = vmatprep.subr.bf16.mxu0 %v4669_v34 }
 0x111   : > { %1639 = vmatpush1.bf16.msra.mxu0 %v4533_v19 }
 0x112   : > { %1640 = vmatprep.subr.bf16.mxu0 %v4669_v34 }
 0x115   : > { %1641 = vmatpush1.bf16.msra.mxu0 %v4534_v21 }
 0x116   : > { %1642 = vmatprep.subr.bf16.mxu0 %v4669_v34 }
 0x119   : > { %1643 = vmatpush1.bf16.msra.mxu0 %v4535_v25 }
 0x11a   : > { %1644 = vmatprep.subr.bf16.mxu0 %v4669_v34 }
 0x11d   : > { %1645 = vmatpush1.bf16.msra.mxu0 %v4536_v26 }
 0x11e   : > { %1737 = vmatprep.subr.bf16.mxu0 %v4669_v34 }
 0x1c3   : > { %v1375_v57 = vpop.f32.mrb[0].mxu0 }
 0x1c4   : > { %v1377_v58 = vpop.f32.mrb[1].mxu0  ;;  %v1376_v0 = vadd.f32 %v1375_v57, %v1290_v56  ;;  %v4545_v56 = vld [vmem:[%s5669_s4 + $0x40] sm:$0xff]   ;;  %v4546_v57 = vld [vmem:[%s5669_s4 + $0x48] sm:$0xff]  }
 0x1c5   : > { %v1378_v59 = vadd.f32 %v1377_v58, %v1294_v55  ;;  %v1379_v60 = vpop.f32.mrb[2].mxu0  ;;  %v4544_v55 = vld [vmem:[%s5669_s4 + $0x38] sm:$0xff]   ;;  %v4547_v58 = vld [vmem:[%s5669_s4 + $0x50] sm:$0xff]  }
 0x1c6   : > { %v1380_v61 = vpop.f32.mrb[3].mxu0  ;;  %v1484_v20 = vpop.f32.mrb[0].mxu1 }
 0x1c7   : > { %v1382_v62 = vsel %vm1337_vm0, %v1378_v59, -inf  ;;  %v1486_v22 = vpop.f32.mrb[1].mxu1  ;;  %v1485_v31 = vadd.f32 %v1484_v20, %v1403_v29  ;;  %v1779_v61 = vld [vmem:[%s5670_s5 + $0x8] sm:$0xff] }
 0x1c8   : > { %v1383_v63 = vmax.f32 %v1376_v0, %v1382_v62  ;;  %v1488_v23 = vpop.f32.mrb[2].mxu1  ;;  %v1487_v32 = vadd.f32 %v1486_v22, %v1407_v30  ;;  %v4549_v62 = vld [vmem:[%s5671_s6 + $0xe0] ss:$28 sps:$4 sm:$0xff]  }
 0x1c9   : > { %v1489_v24 = vpop.f32.mrb[3].mxu1  ;;  %v1491_v33 = vmax.f32 %v1485_v31, 0.0  ;;  %2138 = vmatpush1.bf16.msra.mxu1 %v4549_v62  ;;  %v4592_v62 = vld [vmem:[%s5671_s6 + $0x14] ss:$28 sps:$4 sm:$0xff]  }
 0x1ca   : > { %1384 = vmax.xlane.f32.xlu0 %v1383_v63  ;;  %v1492_v35 = vmax.f32 %v1487_v32, 0.0  ;;  %v4670_v63 = vmov 0.0|0.0   ;;  %2139 = vmatprep.subr.bf16.mxu1 %v4554_v7  ;;  %v4555_v32 = vld [vmem:[%s5671_s6 + $0xe8] ss:$28 sps:$4 sm:$0xff]  }
 0x1cb   : > { %v1543_v60 = vpack.c.bf16 %v1491_v33, %v1491_v33  ;;  %v4602_v7 = vld [vmem:[%s5671_s6 + $0x84] ss:$28 sps:$4 sm:$0xff]  }
 0x1cc   : > { %v1544_v45 = vpack.c.bf16 %v1492_v35, %v1492_v35 }
 0x1cd   : > { %2140 = vmatpush1.bf16.msra.mxu1 %v4552_v8  ;;  %v4599_v8 = vld [vmem:[%s5671_s6 + $0x18] ss:$28 sps:$4 sm:$0xff]  }
 0x257   : > { %v1385_v10 = vpop.xlane.xlu0 %1384 }
 0x258   : > { %v1386_v11 = vsub.f32 %v1376_v0, %v1385_v10  ;;  %v1387_v12 = vsub.f32 %v1378_v59, %v1385_v10  ;;  %v4548_v59 = vld [vmem:[%s5669_s4 + $0x58] sm:$0xff]   ;;  %v1778_v0 = vld [vmem:[%s5670_s5] sm:$0xff]  ;;  %v4672_v10 = vmov 0.0  }
 0x259   : > { %v4376_v2 = vpack.c.bf16 %v1779_v61, %v1778_v0 }
 0x25a   : > { %v1388_v13 = vmul.f32 1.442695, %v1386_v11  ;;  %v1390_v14 = vmul.f32 1.442695, %v1387_v12  ;;  %v4560_v11 = vld [vmem:[%s5671_s6 + $0xf4] ss:$28 sps:$4 sm:$0xff]   ;;  %v1787_v12 = vmul.f32 %v1778_v0, %v1778_v0 }
 0x25b   : > { %2219 = vmatprep.subr.bf16.mxu1 %v4560_v11  ;;  %v4589_v0 = vld [vmem:[%s5671_s6 + $0x7c] ss:$28 sps:$4 sm:$0xff]  }
 0x25c   : > { %4609 = vpow2.f32 %v1388_v13  ;;  %v1788_v13 = vmul.f32 %v1779_v61, %v1779_v61  ;;  %v4584_v61 = vld [vmem:[%s5671_s6 + $0xa8] ss:$28 sps:$4 sm:$0xff]   ;;  %v4606_v11 = vld [vmem:[%s5671_s6 + $0xbc] ss:$28 sps:$4 sm:$0xff]  }
 0x25d   : > { %4611 = vpow2.f32 %v1390_v14  ;;  %v1789_v14 = vmul.f32 %v1780_v4, %v1780_v4  ;;  %v4598_v4 = vld [vmem:[%s5671_s6 + $0x4c] ss:$28 sps:$4 sm:$0xff]  }
 0x266   : > { %v4610_v15 = vpop.eup %4609 }
 0x267   : > { %v4612_v16 = vpop.eup %4611 }
 0x268   : > { %v1392_v17 = vsel %vm1337_vm0, %v4612_v16, 0.0 }
 0x269   : > { %v1393_v18 = vadd.f32 %v4610_v15, %v1392_v17  ;;  %v1793_v17 = vsel %vm1791_vm2, %v1788_v13, 0.0  ;;  %v4604_v13 = vld [vmem:[%s5671_s6 + $0xb8] ss:$28 sps:$4 sm:$0xff]  }
 0x26b   : > { %1394 = vadd.xlane.f32.xlu0 %v1393_v18  ;;  %v1795_v18 = vsel %vm1791_vm2, %v1789_v14, 0.0  ;;  %v4607_v14 = vld [vmem:[%s5671_s6 + $0x88] ss:$28 sps:$4 sm:$0xff]  }
 0x2f8   : > { %v1395_v28 = vpop.xlane.xlu0 %1394 }
 0x2f9   : > { %4613 = vrcp.f32 %v1395_v28 }
 0x303   : > { %v4614_v36 = vpop.eup %4613 }
 0x304   : > { %v1397_v37 = vmul.f32 %v4614_v36, %v4610_v15  ;;  %v1398_v38 = vmul.f32 %v4614_v36, %v4612_v16  ;;  %v1790_v15 = vmul.f32 %v1781_v5, %v1781_v5  ;;  %v1792_v16 = vsel %vm1791_vm2, %v1787_v12, 0.0  ;;  %v4563_v36 = vld [vmem:[%s5671_s6 + $0x124] ss:$28 sps:$4 sm:$0xff]   ;;  %v4593_v5 = vld [vmem:[%s5671_s6 + $0xb0] ss:$28 sps:$4 sm:$0xff]  }
 0x305   : > { %v1794_v19 = vadd.f32 %v1793_v17, %v1792_v16  ;;  %v4603_v12 = vld [vmem:[%s5671_s6 + $0x50] ss:$28 sps:$4 sm:$0xff]   ;;  %v2664_v16 = vld [vmem:[#allocation2] sm:$0xff] }
 0x306   : > { %v1493_v39 = vmul.f32 %v1491_v33, %v1397_v37  ;;  %v1494_v40 = vmul.f32 %v1492_v35, %v1398_v38  ;;  %v1797_v20 = vsel %vm1791_vm2, %v1790_v15, 0.0  ;;  %v4558_v37 = vld [vmem:[%s5671_s6 + $0xf0] ss:$28 sps:$4 sm:$0xff]   ;;  %v4608_v17 = vld [vmem:[%s5671_s6 + $0xc0] ss:$28 sps:$4 sm:$0xff]  }
 0x307   : > { %v1796_v21 = vadd.f32 %v1795_v18, %v1794_v19  ;;  %v2665_v15 = vld [vmem:[#allocation2 + $0x8] sm:$0xff]  ;;  %v2672_v18 = vld [vmem:[#allocation2 + $0x40] sm:$0xff]  ;;  %v2667_v19 = vld [vmem:[#allocation2 + $0x18] sm:$0xff] }
 0x308   : > { %v1545_v41 = vpack.c.bf16 %v1493_v39, %v1493_v39  ;;  %v1546_v43 = vpack.c.bf16 %v1494_v40, %v1494_v40  ;;  %v4566_v40 = vld [vmem:[%s5671_s6 + $0x12c] ss:$28 sps:$4 sm:$0xff]  }
 0x309   : > { %v5183_v22 = vadd.f32 %v1797_v20, %v1796_v21  ;;  %v2671_v20 = vld [vmem:[#allocation2 + $0x38] sm:$0xff] }
 0x30a   : > { %4177 = vmatprep.mubr.msk.bf16.mxu0 %vm1337_vm0, %v1546_v43  ;;  %v2679_v21 = vld [vmem:[#allocation2 + $0x78] sm:$0xff] }
 0x30b   : > { %1655 = vmatmul.mubr.bf16.vlgmr.msra.gmra.mrb[4].mxu0 %v1545_v41  ;;  %v4561_v41 = vld [vmem:[%s5671_s6 + $0x120] ss:$28 sps:$4 sm:$0xff]  }
 0x30c   : > { %1738 = vmatpush1.bf16.msra.mxu0 %v4537_v44  ;;  %4190 = vmatprep.mubr.msk.bf16.mxu0 %vm1337_vm0, %v1544_v45  ;;  %v4564_v44 = vld [vmem:[%s5671_s6 + $0x128] ss:$28 sps:$4 sm:$0xff]  }
 0x30d   : > { %1739 = vmatprep.subr.bf16.mxu0 %v4669_v34  ;;  %v4570_v45 = vld [vmem:[%s5671_s6 + $0x4] ss:$28 sps:$4 sm:$0xff]  }
 0x310   : > { %1740 = vmatpush1.bf16.msra.mxu0 %v4538_v46  ;;  %v4567_v46 = vld [vmem:[%s5671_s6 + $0xf8] ss:$28 sps:$4 sm:$0xff]  }
 0x311   : > { %1741 = vmatprep.subr.bf16.mxu0 %v4669_v34 }
 0x314   : > { %1742 = vmatpush1.bf16.msra.mxu0 %v4539_v47  ;;  %v4568_v47 = vld [vmem:[%s5671_s6] ss:$28 sps:$4 sm:$0xff]  }
 0x315   : > { %1743 = vmatprep.subr.bf16.mxu0 %v4669_v34 }
 0x318   : > { %1744 = vmatpush1.bf16.msra.mxu0 %v4540_v48  ;;  %v4574_v48 = vld [vmem:[%s5671_s6 + $0x3c] ss:$28 sps:$4 sm:$0xff]  }
 0x319   : > { %1745 = vmatprep.subr.bf16.mxu0 %v4669_v34 }
 0x31c   : > { %1746 = vmatpush1.bf16.msra.mxu0 %v4541_v49  ;;  %v4571_v49 = vld [vmem:[%s5671_s6 + $0x130] ss:$28 sps:$4 sm:$0xff]  }
 0x31d   : > { %1747 = vmatprep.subr.bf16.mxu0 %v4669_v34 }
 0x320   : > { %1748 = vmatpush1.bf16.msra.mxu0 %v4542_v50  ;;  %v4577_v50 = vld [vmem:[%s5671_s6 + $0xc] ss:$28 sps:$4 sm:$0xff]  }
 0x321   : > { %1749 = vmatprep.subr.bf16.mxu0 %v4669_v34 }
 0x324   : > { %1750 = vmatpush1.bf16.msra.mxu0 %v4543_v53  ;;  %v4572_v53 = vld [vmem:[%s5671_s6 + $0x38] ss:$28 sps:$4 sm:$0xff]  }
 0x325   : > { %1751 = vmatprep.subr.bf16.mxu0 %v4669_v34 }
 0x328   : > { %1752 = vmatpush1.bf16.msra.mxu0 %v4544_v55  ;;  %v4580_v55 = vld [vmem:[%s5671_s6 + $0x74] ss:$28 sps:$4 sm:$0xff]  }
 0x329   : > { %1753 = vmatprep.subr.bf16.mxu0 %v4669_v34 }
 0x32c   : > { %1754 = vmatpush1.bf16.msra.mxu0 %v4545_v56  ;;  %v4575_v56 = vld [vmem:[%s5671_s6 + $0x8] ss:$28 sps:$4 sm:$0xff]  }
 0x32d   : > { %1755 = vmatprep.subr.bf16.mxu0 %v4669_v34 }
 0x330   : > { %1756 = vmatpush1.bf16.msra.mxu0 %v4546_v57  ;;  %v4583_v57 = vld [vmem:[%s5671_s6 + $0x44] ss:$28 sps:$4 sm:$0xff]  }
 0x331   : > { %1757 = vmatprep.subr.bf16.mxu0 %v4669_v34 }
 0x334   : > { %1758 = vmatpush1.bf16.msra.mxu0 %v4547_v58  ;;  %v4578_v58 = vld [vmem:[%s5671_s6 + $0x70] ss:$28 sps:$4 sm:$0xff]  }
 0x335   : > { %1759 = vmatprep.subr.bf16.mxu0 %v4669_v34 }
 0x338   : > { %1760 = vmatpush1.bf16.msra.mxu0 %v4548_v59  ;;  %v4586_v59 = vld [vmem:[%s5671_s6 + $0xac] ss:$28 sps:$4 sm:$0xff]  }
 0x339   : > { %4375 = vmatprep.subr.bf16.mxu0 %v4670_v63 }
 0x33b   : > { %1770 = vmatmul.mubr.bf16.vlgmr.msra.gmra.mrb[8].mxu0 %v1543_v60  ;;  %v4581_v60 = vld [vmem:[%s5671_s6 + $0x40] ss:$28 sps:$4 sm:$0xff]  }
 0x33c   : > { %4377 = vmatpush3.bf16.msra.mxu0 %v4376_v2  ;;  %4344 = vmatprep.mubr.msk.f32.mxu0 %vm4671_vm1, %v4672_v10  ;;  %v4595_v2 = vld [vmem:[%s5671_s6 + $0xb4] ss:$28 sps:$4 sm:$0xff]  }
 0x33d   : > { %4378 = vmatprep.subr.bf16.mxu0 %v4670_v63  ;;  %v4587_v63 = vld [vmem:[%s5671_s6 + $0x78] ss:$28 sps:$4 sm:$0xff]  }
 0x340   : > { %4380 = vmatpush3.bf16.msra.mxu0 %v4379_v6  ;;  %v4596_v6 = vld [vmem:[%s5671_s6 + $0x48] ss:$28 sps:$4 sm:$0xff]  }
 0x341   : > { %2178 = vmatprep.subr.bf16.mxu0 %v4557_v9  ;;  %v4600_v9 = vld [vmem:[%s5671_s6 + $0x80] ss:$28 sps:$4 sm:$0xff]  }
 0x3de   : > { %v1656_v23 = vpop.f32.mrb[4].mxu0 }
 0x3df   : > { %v1658_v24 = vpop.f32.mrb[5].mxu0 }
 0x3e0   : > { %v1659_v25 = vpop.f32.mrb[6].mxu0  ;;  %v2674_v24 = vld [vmem:[#allocation2 + $0x50] sm:$0xff] }
 0x3e1   : > { %v1660_v26 = vpop.f32.mrb[7].mxu0  ;;  %v2678_v25 = vld [vmem:[#allocation2 + $0x70] sm:$0xff] }
 0x3e2   : > { %v2686_v26 = vld [vmem:[#allocation2 + $0xb0] sm:$0xff] }
 0x40e   : > { %v1771_v28 = vpop.f32.mrb[8].mxu0 }
 0x40f   : > { %v1772_v29 = vadd.f32 %v1771_v28, %v1656_v23  ;;  %v1773_v30 = vpop.f32.mrb[9].mxu0  ;;  %v2666_v23 = vld [vmem:[#allocation2 + $0x10] sm:$0xff]  ;;  %v2681_v28 = vld [vmem:[#allocation2 + $0x88] sm:$0xff] }
 0x410   : > { %v1774_v31 = vpop.f32.mrb[10].mxu0  ;;  %v2693_v30 = vld [vmem:[#allocation2 + $0xe8] sm:$0xff] }
 0x411   : > { %v1777_v33 = vadd.f32 %v1772_v29, %v1250_v27  ;;  %v1775_v35 = vpop.f32.mrb[11].mxu0  ;;  %v2673_v27 = vld [vmem:[#allocation2 + $0x48] sm:$0xff]  ;;  %v2680_v31 = vld [vmem:[#allocation2 + $0x80] sm:$0xff] }
 0x412   : > { %v2685_v29 = vld [vmem:[#allocation2 + $0xa8] sm:$0xff]  ;;  %v2687_v35 = vld [vmem:[#allocation2 + $0xb8] sm:$0xff] }
 0x413   : > { %v2061_v38 = vpack.c.bf16 %v1777_v33, %v1777_v33  ;;  %4345 = vmatmul.mubr.msk.f32.vlgmr.msra.gmra.mrb[12].mxu0 %vm1783_vm3, %v1777_v33  ;;  %v1782_v39 = vmul.f32 %v1777_v33, %v1777_v33  ;;  %v2692_v33 = vld [vmem:[#allocation2 + $0xe0] sm:$0xff] }
 0x414   : > { %2179 = vmatpush1.bf16.msra.mxu0 %v4555_v32  ;;  %2210 = vmatprep.mubr.bf16.mxu0 %v4669_v34  ;;  %v2688_v32 = vld [vmem:[#allocation2 + $0xc0] sm:$0xff] }
 0x415   : > { %4211 = vmatmul.mubr.msk.bf16.vlgmr.msra.gmra.mrb[4].mxu1 %vm1783_vm3, %v2061_v38  ;;  %2180 = vmatprep.subr.bf16.mxu0 %v4563_v36  ;;  %v1784_v43 = vsel %vm1783_vm3, %v1782_v39, 0.0  ;;  %v2695_v36 = vld [vmem:[#allocation2 + $0xf8] sm:$0xff]  ;;  %v2694_v39 = vld [vmem:[#allocation2 + $0xf0] sm:$0xff] }
 0x416   : > { %2220 = vmatpush1.bf16.msra.mxu1 %v4558_v37  ;;  %1785 = vadd.xlane.f32.xlu1 %v1784_v43  ;;  %v2699_v37 = vld [vmem:[#allocation2 + $0x118] sm:$0xff]  ;;  %v2714_v43 = vld [vmem:[#allocation2 + $0x190] sm:$0xff] }
 0x417   : > { %2221 = vmatprep.subr.bf16.mxu1 %v4566_v40  ;;  %2251 = vmatprep.mubr.bf16.mxu1 %v4669_v34  ;;  %v2702_v40 = vld [vmem:[#allocation2 + $0x130] sm:$0xff] }
 0x418   : > { %2181 = vmatpush1.bf16.msra.mxu0 %v4561_v41  ;;  %v2706_v41 = vld [vmem:[#allocation2 + $0x150] sm:$0xff] }
 0x419   : > { %4347 = vmatprep.subr.bf16.mxu0 %v4672_v10 }
 0x41a   : > { %2222 = vmatpush1.bf16.msra.mxu1 %v4564_v44  ;;  %v2701_v44 = vld [vmem:[#allocation2 + $0x128] sm:$0xff] }
 0x41b   : > { %4212 = vmatmul.mubr.msk.bf16.vlgmr.msra.gmra.mrb[16].mxu0 %vm1783_vm3, %v2061_v38  ;;  %2444 = vmatprep.subr.bf16.mxu1 %v4570_v45  ;;  %v2709_v45 = vld [vmem:[#allocation2 + $0x168] sm:$0xff] }
 0x41c   : > { %4348 = vmatpush3.bf16.msra.mxu0 %v4567_v46  ;;  %4351 = vmatprep.mubr.msk.bf16.mxu0 %vm4671_vm1, %v4672_v10  ;;  %v2708_v46 = vld [vmem:[#allocation2 + $0x160] sm:$0xff] }
 0x41d   : > { %4213 = vmatmul.mubr.msk.bf16.vlgmr.msra.gmra.mrb[8].mxu1 %vm1783_vm3, %v2061_v38  ;;  %4349 = vmatprep.subr.bf16.mxu0 %v4672_v10 }
 0x41e   : > { %2445 = vmatpush1.bf16.msra.mxu1 %v4568_v47  ;;  %2476 = vmatprep.mubr.bf16.mxu1 %v4669_v34  ;;  %v2716_v47 = vld [vmem:[#allocation2 + $0x1a0] sm:$0xff] }
 0x41f   : > { %2446 = vmatprep.subr.bf16.mxu1 %v4574_v48  ;;  %v2713_v48 = vld [vmem:[#allocation2 + $0x188] sm:$0xff] }
 0x420   : > { %4350 = vmatpush3.bf16.msra.mxu0 %v4571_v49  ;;  %v2715_v49 = vld [vmem:[#allocation2 + $0x198] sm:$0xff] }
 0x421   : > { %2485 = vmatprep.subr.bf16.mxu0 %v4577_v50  ;;  %v2721_v50 = vld [vmem:[#allocation2 + $0x1c8] sm:$0xff] }
 0x422   : > { %2447 = vmatpush1.bf16.msra.mxu1 %v4572_v53  ;;  %v2723_v53 = vld [vmem:[#allocation2 + $0x1d8] sm:$0xff] }
 0x423   : > { %4352 = vmatmul.mubr.msk.bf16.vlgmr.msra.gmra.mrb[20].mxu0 %vm1783_vm3, %v2061_v38  ;;  %2448 = vmatprep.subr.bf16.mxu1 %v4580_v55  ;;  %v2707_v38 = vld [vmem:[#allocation2 + $0x158] sm:$0xff]  ;;  %v2720_v55 = vld [vmem:[#allocation2 + $0x1c0] sm:$0xff] }
 0x424   : > { %2486 = vmatpush1.bf16.msra.mxu0 %v4575_v56  ;;  %2517 = vmatprep.mubr.bf16.mxu0 %v4669_v34  ;;  %v2722_v56 = vld [vmem:[#allocation2 + $0x1d0] sm:$0xff] }
 0x425   : > { %2487 = vmatprep.subr.bf16.mxu0 %v4583_v57  ;;  %v2728_v57 = vld [vmem:[#allocation2 + $0x200] sm:$0xff] }
 0x426   : > { %2449 = vmatpush1.bf16.msra.mxu1 %v4578_v58  ;;  %v2730_v58 = vld [vmem:[#allocation2 + $0x210] sm:$0xff] }
 0x427   : > { %2450 = vmatprep.subr.bf16.mxu1 %v4586_v59  ;;  %v2727_v59 = vld [vmem:[#allocation2 + $0x1f8] sm:$0xff] }
 0x428   : > { %2488 = vmatpush1.bf16.msra.mxu0 %v4581_v60  ;;  %v2729_v60 = vld [vmem:[#allocation2 + $0x208] sm:$0xff] }
 0x429   : > { %2489 = vmatprep.subr.bf16.mxu0 %v4589_v0  ;;  %v2735_v0 = vld [vmem:[#allocation2 + $0x238] sm:$0xff] }
 0x42a   : > { %2451 = vmatpush1.bf16.msra.mxu1 %v4584_v61  ;;  %v2737_v61 = vld [vmem:[#allocation2 + $0x248] sm:$0xff] }
 0x42b   : > { %2526 = vmatprep.subr.bf16.mxu1 %v4592_v62  ;;  %v2734_v62 = vld [vmem:[#allocation2 + $0x230] sm:$0xff] }
 0x42c   : > { %2490 = vmatpush1.bf16.msra.mxu0 %v4587_v63  ;;  %v2736_v63 = vld [vmem:[#allocation2 + $0x240] sm:$0xff] }
 0x42d   : > { %4243 = vmatmul.mubr.msk.bf16.vlgmr.msra.gmra.mrb[12].mxu1 %vm1337_vm0, %v4997_v42  ;;  %2491 = vmatprep.subr.bf16.mxu0 %v4595_v2  ;;  %v2742_v2 = vld [vmem:[#allocation2 + $0x270] sm:$0xff] }
 0x42e   : > { %2527 = vmatpush1.bf16.msra.mxu1 %v4590_v3  ;;  %2558 = vmatprep.mubr.bf16.mxu1 %v4669_v34  ;;  %v2744_v3 = vld [vmem:[#allocation2 + $0x280] sm:$0xff] }
 0x42f   : > { %2528 = vmatprep.subr.bf16.mxu1 %v4598_v4  ;;  %v2741_v4 = vld [vmem:[#allocation2 + $0x268] sm:$0xff] }
 0x430   : > { %2492 = vmatpush1.bf16.msra.mxu0 %v4593_v5  ;;  %v2743_v5 = vld [vmem:[#allocation2 + $0x278] sm:$0xff] }
 0x431   : > { %4355 = vmatprep.subr.bf16.mxu0 %v4672_v10 }
 0x432   : > { %2529 = vmatpush1.bf16.msra.mxu1 %v4596_v6  ;;  %v2749_v6 = vld [vmem:[#allocation2 + $0x2a8] sm:$0xff] }
 0x433   : > { %4244 = vmatmul.mubr.msk.bf16.vlgmr.msra.gmra.mrb[24].mxu0 %vm1337_vm0, %v4997_v42  ;;  %2530 = vmatprep.subr.bf16.mxu1 %v4602_v7  ;;  %v2751_v7 = vld [vmem:[#allocation2 + $0x2b8] sm:$0xff] }
 0x434   : > { %4356 = vmatpush3.bf16.msra.mxu0 %v4599_v8  ;;  %4363 = vmatprep.mubr.msk.bf16.mxu0 %vm4671_vm1, %v4672_v10  ;;  %v2748_v8 = vld [vmem:[#allocation2 + $0x2a0] sm:$0xff] }
 0x435   : > { %4357 = vmatprep.subr.bf16.mxu0 %v4672_v10 }
 0x436   : > { %2531 = vmatpush1.bf16.msra.mxu1 %v4600_v9  ;;  %v2750_v9 = vld [vmem:[#allocation2 + $0x2b0] sm:$0xff] }
 0x437   : > { %2532 = vmatprep.subr.bf16.mxu1 %v4606_v11  ;;  %v2756_v11 = vld [vmem:[#allocation2 + $0x2e0] sm:$0xff] }
 0x438   : > { %4358 = vmatpush3.bf16.msra.mxu0 %v4603_v12  ;;  %v2758_v12 = vld [vmem:[#allocation2 + $0x2f0] sm:$0xff] }
 0x439   : > { %4359 = vmatprep.subr.bf16.mxu0 %v4672_v10 }
 0x43a   : > { %2533 = vmatpush1.bf16.msra.mxu1 %v4604_v13  ;;  %v2755_v13 = vld [vmem:[#allocation2 + $0x2d8] sm:$0xff] }
 0x43b   : > { %3017 = vmatprep.subr.bf16.mxu1 %v2665_v15  ;;  %v2763_v15 = vld [vmem:[#allocation2 + $0x318] sm:$0xff] }
 0x43c   : > { %4360 = vmatpush3.bf16.msra.mxu0 %v4607_v14  ;;  %v2757_v14 = vld [vmem:[#allocation2 + $0x2e8] sm:$0xff] }
 0x43d   : > { %4245 = vmatmul.mubr.msk.bf16.vlgmr.msra.gmra.mrb[16].mxu1 %vm1337_vm0, %v4997_v42  ;;  %4361 = vmatprep.subr.bf16.mxu0 %v4672_v10 }
 0x43e   : > { %3018 = vmatpush1.bf16.msra.mxu1 %v2664_v16  ;;  %v2765_v16 = vld [vmem:[#allocation2 + $0x328] sm:$0xff] }
 0x43f   : > { %3019 = vmatprep.subr.bf16.mxu1 %v2672_v18  ;;  %v2764_v18 = vld [vmem:[#allocation2 + $0x320] sm:$0xff] }
 0x440   : > { %4362 = vmatpush3.bf16.msra.mxu0 %v4608_v17  ;;  %v2762_v17 = vld [vmem:[#allocation2 + $0x310] sm:$0xff] }
 0x441   : > { %3181 = vmatprep.subr.bf16.mxu0 %v2667_v19  ;;  %v2770_v19 = vld [vmem:[#allocation2 + $0x350] sm:$0xff] }
 0x442   : > { %3020 = vmatpush1.bf16.msra.mxu1 %v2671_v20  ;;  %v2772_v20 = vld [vmem:[#allocation2 + $0x360] sm:$0xff] }
 0x443   : > { %4364 = vmatmul.mubr.msk.bf16.vlgmr.msra.gmra.mrb[28].mxu0 %vm1337_vm0, %v4997_v42  ;;  %3021 = vmatprep.subr.bf16.mxu1 %v2679_v21  ;;  %v2700_v42 = vld [vmem:[#allocation2 + $0x120] sm:$0xff]  ;;  %v2769_v21 = vld [vmem:[#allocation2 + $0x348] sm:$0xff]  ;;  %vm3860_vm0 = vcmp.eq.s32.totalorder %v4772_v1, 9 }
 0x444   : > { %3182 = vmatpush1.bf16.msra.mxu0 %v2666_v23  ;;  %v2771_v23 = vld [vmem:[#allocation2 + $0x358] sm:$0xff] }
 0x445   : > { %3183 = vmatprep.subr.bf16.mxu0 %v2674_v24  ;;  %v2777_v24 = vld [vmem:[#allocation2 + $0x388] sm:$0xff] }
 0x446   : > { %3022 = vmatpush1.bf16.msra.mxu1 %v2678_v25  ;;  %v2779_v25 = vld [vmem:[#allocation2 + $0x398] sm:$0xff] }
 0x447   : > { %3023 = vmatprep.subr.bf16.mxu1 %v2686_v26  ;;  %v1799_v26 = vrot.slane %v5183_v22, 4 }
 0x448   : > { %3184 = vmatpush1.bf16.msra.mxu0 %v2673_v27 }
 0x449   : > { %3185 = vmatprep.subr.bf16.mxu0 %v2681_v28  ;;  %v1800_v27 = vadd.f32 %v1799_v26, %v5183_v22  ;;  %v2778_v26 = vld [vmem:[#allocation2 + $0x390] sm:$0xff] }
 0x44a   : > { %3024 = vmatpush1.bf16.msra.mxu1 %v2685_v29 }
 0x44b   : > { %3025 = vmatprep.subr.bf16.mxu1 %v2693_v30  ;;  %v1801_v28 = vrot.slane %v1800_v27, 2 }
 0x44c   : > { %3186 = vmatpush1.bf16.msra.mxu0 %v2680_v31 }
 0x44d   : > { %3187 = vmatprep.subr.bf16.mxu0 %v2688_v32  ;;  %v1802_v29 = vadd.f32 %v1801_v28, %v1800_v27 }
 0x44e   : > { %3026 = vmatpush1.bf16.msra.mxu1 %v2692_v33 }
 0x44f   : > { %3027 = vmatprep.subr.bf16.mxu1 %v2700_v42  ;;  %v1803_v30 = vrot.slane %v1802_v29, 1 }
 0x450   : > { %3188 = vmatpush1.bf16.msra.mxu0 %v2687_v35 }
 0x451   : > { %3189 = vmatprep.subr.bf16.mxu0 %v2695_v36  ;;  %v1804_v31 = vadd.f32 %v1803_v30, %v1802_v29  ;;  %v2784_v29 = vld [vmem:[#allocation2 + $0x3c0] sm:$0xff]  ;;  %v2786_v30 = vld [vmem:[#allocation2 + $0x3d0] sm:$0xff] }
 0x452   : > { %3028 = vmatpush1.bf16.msra.mxu1 %v2699_v37 }
 0x453   : > { %3029 = vmatprep.subr.bf16.mxu1 %v2707_v38 }
 0x454   : > { %3190 = vmatpush1.bf16.msra.mxu0 %v2694_v39 }
 0x455   : > { %3191 = vmatprep.subr.bf16.mxu0 %v2702_v40 }
 0x456   : > { %3030 = vmatpush1.bf16.msra.mxu1 %v2706_v41 }
 0x457   : > { %3031 = vmatprep.subr.bf16.mxu1 %v2714_v43 }
 0x458   : > { %3192 = vmatpush1.bf16.msra.mxu0 %v2701_v44 }
 0x459   : > { %3193 = vmatprep.subr.bf16.mxu0 %v2709_v45 }
 0x45a   : > { %3032 = vmatpush1.bf16.msra.mxu1 %v2713_v48 }
 0x45b   : > { %3033 = vmatprep.subr.bf16.mxu1 %v2721_v50 }
 0x45c   : > { %3194 = vmatpush1.bf16.msra.mxu0 %v2708_v46 }
 0x45d   : > { %3195 = vmatprep.subr.bf16.mxu0 %v2716_v47 }
 0x45e   : > { %3034 = vmatpush1.bf16.msra.mxu1 %v2720_v55 }
 0x45f   : > { %3035 = vmatprep.subr.bf16.mxu1 %v2728_v57  ;;  %v4139_v57 = vld [vmem:[%s5673_s8 + $0x3] ss:$8 sm:$0xf] }
 0x460   : > { %3196 = vmatpush1.bf16.msra.mxu0 %v2715_v49 }
 0x461   : > { %3197 = vmatprep.subr.bf16.mxu0 %v2723_v53 }
 0x462   : > { %3036 = vmatpush1.bf16.msra.mxu1 %v2727_v59  ;;  %v4140_v59 = vld [vmem:[%s5673_s8 + $0x3] ss:$8 sm:$0x70] }
 0x463   : > { %3037 = vmatprep.subr.bf16.mxu1 %v2735_v0  ;;  %v5343_v0 = vor.u32 %v4140_v59, %v4139_v57 }
 0x464   : > { %3198 = vmatpush1.bf16.msra.mxu0 %v2722_v56 }
 0x465   : > { %3199 = vmatprep.subr.bf16.mxu0 %v2730_v58 }
 0x466   : > { %3038 = vmatpush1.bf16.msra.mxu1 %v2734_v62 }
 0x467   : > { %3039 = vmatprep.subr.bf16.mxu1 %v2742_v2 }
 0x468   : > { %3200 = vmatpush1.bf16.msra.mxu0 %v2729_v60 }
 0x469   : > { %3201 = vmatprep.subr.bf16.mxu0 %v2737_v61  ;;  %v2611_v61 = vrot.slane %v5343_v0, %v5039_v54 }
 0x46a   : > { %3040 = vmatpush1.bf16.msra.mxu1 %v2741_v4  ;;  %v5350_v4 = vsub.s32 2, %v5030_v51 }
 0x46b   : > { %3041 = vmatprep.subr.bf16.mxu1 %v2749_v6 }
 0x46c   : > { %3202 = vmatpush1.bf16.msra.mxu0 %v2736_v63  ;;  %v2615_v63 = vrot.slane %v5343_v0, %v5033_v52 }
 0x46d   : > { %3203 = vmatprep.subr.bf16.mxu0 %v2744_v3 }
 0x46e   : > { %3042 = vmatpush1.bf16.msra.mxu1 %v2748_v8 }
 0x46f   : > { %3043 = vmatprep.subr.bf16.mxu1 %v2756_v11 }
 0x470   : > { %3204 = vmatpush1.bf16.msra.mxu0 %v2743_v5 }
 0x471   : > { %3205 = vmatprep.subr.bf16.mxu0 %v2751_v7  ;;  %v5353_v7 = vsub.s32 3, %v5030_v51 }
 0x472   : > { %3044 = vmatpush1.bf16.msra.mxu1 %v2755_v13  ;;  %v2619_v13 = vrot.slane %v5343_v0, %v5350_v4 }
 0x473   : > { %3045 = vmatprep.subr.bf16.mxu1 %v2763_v15 }
 0x474   : > { %3206 = vmatpush1.bf16.msra.mxu0 %v2750_v9 }
 0x475   : > { %3207 = vmatprep.subr.bf16.mxu0 %v2758_v12 }
 0x476   : > { %3046 = vmatpush1.bf16.msra.mxu1 %v2762_v17 }
 0x477   : > { %3047 = vmatprep.subr.bf16.mxu1 %v2770_v19 }
 0x478   : > { %3208 = vmatpush1.bf16.msra.mxu0 %v2757_v14 }
 0x479   : > { %3209 = vmatprep.subr.bf16.mxu0 %v2765_v16  ;;  %v2623_v16 = vrot.slane %v5343_v0, %v5353_v7 }
 0x47a   : > { %3048 = vmatpush1.bf16.msra.mxu1 %v2769_v21 }
 0x47b   : > { %3058 = vmatprep.subr.bf16.mxu1 %v2777_v24 }
 0x47c   : > { %3210 = vmatpush1.bf16.msra.mxu0 %v2764_v18 }
 0x47d   : > { %3211 = vmatprep.subr.bf16.mxu0 %v2772_v20 }
 0x480   : > { %3212 = vmatpush1.bf16.msra.mxu0 %v2771_v23 }
 0x481   : > { %3222 = vmatprep.subr.bf16.mxu0 %v2779_v25  ;;  %v2776_v25 = vld [vmem:[#allocation2 + $0x380] sm:$0xff] }
 0x4a3   : > { %v1786_v32 = vpop.xlane.xlu1 %1785 }
 0x4a4   : > { %v1878_v42 = vadd.f32 %v1804_v31, %v1786_v32  ;;  %v5370_v31 = vsub.s32 4, %v5030_v51 }
 0x4e6   : > { %v1874_v33 = vpop.f32.mrb[12].mxu0 }
 0x4e7   : > { %v1879_v35 = vmul.f32 2.0, %v1874_v33  ;;  %v4346_v36 = vpop.f32.mrb[13].mxu0  ;;  %v5373_v33 = vsub.s32 5, %v5030_v51 }
 0x4e8   : > { %v2171_v37 = vpop.f32.mrb[4].mxu1 }
 0x4e9   : > { %v1880_v38 = vsub.f32 %v1878_v42, %v1879_v35  ;;  %v2173_v39 = vpop.f32.mrb[5].mxu1  ;;  %v2783_v42 = vld [vmem:[#allocation2 + $0x3b8] sm:$0xff]  ;;  %v2785_v35 = vld [vmem:[#allocation2 + $0x3c8] sm:$0xff] }
 0x4ea   : > { %v2175_v40 = vpop.f32.mrb[6].mxu1 }
 0x4eb   : > { %v2176_v41 = vpop.f32.mrb[7].mxu1  ;;  %v5327_v43 = vsub.f32 0.0, %v1880_v38  ;;  %v2791_v38 = vld [vmem:[#allocation2 + $0x3f8] sm:$0xff] }
 0x4ec   : > { %v2631_v41 = vrot.slane %v5343_v0, %v5373_v33 }
 0x4ed   : > { %v1882_v44 = vsel %vm1791_vm2, %v5327_v43, -inf }
 0x4ee   : > { %v2212_v22 = vpop.f32.mrb[16].mxu0  ;;  %1883 = vmax.xlane.f32.xlu1 %v1882_v44 }
 0x4ef   : > { %v2214_v45 = vpop.f32.mrb[17].mxu0 }
 0x4f0   : > { %v2216_v46 = vpop.f32.mrb[18].mxu0  ;;  %v5331_v47 = vpop.f32.mrb[8].mxu1 }
 0x4f1   : > { %v2217_v48 = vpop.f32.mrb[19].mxu0  ;;  %v5333_v49 = vpop.f32.mrb[9].mxu1  ;;  %v2792_v46 = vld [vmem:[#allocation2 + $0x400] sm:$0xff] }
 0x4f2   : > { %v2257_v50 = vpop.f32.mrb[10].mxu1  ;;  %v5385_v48 = vsub.s32 6, %v5030_v51  ;;  %v2797_v51 = vld [vmem:[#allocation2 + $0x428] sm:$0xff] }
 0x4f3   : > { %v2258_v53 = vpop.f32.mrb[11].mxu1 }
 0x4f4   : > { %v2798_v53 = vld [vmem:[#allocation2 + $0x430] sm:$0xff] }
 0x4f6   : > { %v5335_v55 = vpop.f32.mrb[20].mxu0 }
 0x4f7   : > { %v4353_v56 = vpop.f32.mrb[21].mxu0 }
 0x4f8   : > { %v2297_v58 = vpop.f32.mrb[22].mxu0  ;;  %v2800_v56 = vld [vmem:[#allocation2 + $0x440] sm:$0xff] }
 0x4f9   : > { %v4354_v60 = vpop.f32.mrb[23].mxu0 }
 0x4fa   : > { %v2635_v60 = vrot.slane %v5343_v0, %v5385_v48 }
 0x500   : > { %v2478_v62 = vpop.f32.mrb[12].mxu1 }
 0x501   : > { %v2479_v2 = vadd.f32 %v2478_v62, %v2171_v37  ;;  %v2480_v3 = vpop.f32.mrb[13].mxu1  ;;  %v2627_v37 = vrot.slane %v5343_v0, %v5370_v31  ;;  %v2805_v62 = vld [vmem:[#allocation2 + $0x468] sm:$0xff] }
 0x502   : > { %v2481_v5 = vadd.f32 %v2480_v3, %v2173_v39  ;;  %v2482_v6 = vpop.f32.mrb[14].mxu1  ;;  %v2793_v39 = vld [vmem:[#allocation2 + $0x408] sm:$0xff] }
 0x503   : > { %v2643_v8 = vadd.f32 %v2611_v61, %v2479_v2  ;;  %v2483_v9 = vpop.f32.mrb[15].mxu1  ;;  %v2799_v61 = vld [vmem:[#allocation2 + $0x438] sm:$0xff] }
 0x504   : > { %v2644_v11 = vadd.f32 %v2615_v63, %v2481_v5  ;;  %v2807_v63 = vld [vmem:[#allocation2 + $0x478] sm:$0xff]  ;;  %v2806_v9 = vld [vmem:[#allocation2 + $0x470] sm:$0xff] }
 0x505   : > { %v2650_v12 = vmax.f32 %v2643_v8, 0.0  ;;  %v2804_v8 = vld [vmem:[#allocation2 + $0x460] sm:$0xff] }
 0x506   : > { %v2651_v14 = vmax.f32 %v2644_v11, 0.0  ;;  %v2519_v15 = vpop.f32.mrb[24].mxu0  ;;  %v2812_v11 = vld [vmem:[#allocation2 + $0x4a0] sm:$0xff] }
 0x507   : > { %v2520_v17 = vadd.f32 %v2519_v15, %v2212_v22  ;;  %v2521_v18 = vpop.f32.mrb[25].mxu0  ;;  %v5361_v23 = vpack.c.bf16 %v2650_v12, %v2650_v12  ;;  %v2814_v12 = vld [vmem:[#allocation2 + $0x4b0] sm:$0xff]  ;;  %v2821_v15 = vld [vmem:[#allocation2 + $0x4e8] sm:$0xff] }
 0x508   : > { %v5359_v19 = vpack.c.bf16 %v2651_v14, %v2651_v14  ;;  %v2522_v20 = vadd.f32 %v2521_v18, %v2214_v45  ;;  %v2523_v21 = vpop.f32.mrb[26].mxu0  ;;  %v2790_v45 = vld [vmem:[#allocation2 + $0x3f0] sm:$0xff]  ;;  %v2813_v14 = vld [vmem:[#allocation2 + $0x4a8] sm:$0xff] }
 0x509   : > { %v5363_v24 = vadd.f32 %v2619_v13, %v2520_v17  ;;  %v2524_v27 = vpop.f32.mrb[27].mxu0  ;;  %v2811_v13 = vld [vmem:[#allocation2 + $0x498] sm:$0xff]  ;;  %v2820_v17 = vld [vmem:[#allocation2 + $0x4e0] sm:$0xff]  ;;  %v2826_v18 = vld [vmem:[#allocation2 + $0x510] sm:$0xff] }
 0x50a   : > { %v2646_v28 = vadd.f32 %v2623_v16, %v2522_v20  ;;  %3049 = vmatprep.mubr.bf16.mxu1 %v5359_v19  ;;  %3213 = vmatprep.mubr.bf16.mxu0 %v5359_v19  ;;  %v2818_v16 = vld [vmem:[#allocation2 + $0x4d0] sm:$0xff]  ;;  %v2828_v20 = vld [vmem:[#allocation2 + $0x520] sm:$0xff]  ;;  %v2825_v21 = vld [vmem:[#allocation2 + $0x508] sm:$0xff] }
 0x50b   : > { %3050 = vmatmul.mubr.bf16.vlgmr.msra.gmra.mrb[20].mxu1 %v5361_v23  ;;  %3214 = vmatmul.mubr.bf16.vlgmr.msra.gmra.mrb[32].mxu0 %v5361_v23  ;;  %v2835_v27 = vld [vmem:[#allocation2 + $0x558] sm:$0xff] }
 0x50c   : > { %v2653_v32 = vmax.f32 %v2646_v28, 0.0  ;;  %3059 = vmatpush1.bf16.msra.mxu1 %v2776_v25  ;;  %3223 = vmatpush1.bf16.msra.mxu0 %v2778_v26  ;;  %v2827_v25 = vld [vmem:[#allocation2 + $0x518] sm:$0xff]  ;;  %v2833_v26 = vld [vmem:[#allocation2 + $0x548] sm:$0xff]  ;;  %v2832_v28 = vld [vmem:[#allocation2 + $0x540] sm:$0xff] }
 0x50d   : > { %3060 = vmatprep.subr.bf16.mxu1 %v2784_v29  ;;  %3224 = vmatprep.subr.bf16.mxu0 %v2786_v30  ;;  %v2834_v29 = vld [vmem:[#allocation2 + $0x550] sm:$0xff]  ;;  %v2840_v30 = vld [vmem:[#allocation2 + $0x580] sm:$0xff] }
 0x50e   : > { %v5375_v36 = vpack.c.bf16 %v2653_v32, %v2653_v32  ;;  %v2842_v32 = vld [vmem:[#allocation2 + $0x590] sm:$0xff] }
 0x510   : > { %3061 = vmatpush1.bf16.msra.mxu1 %v2783_v42  ;;  %3225 = vmatpush1.bf16.msra.mxu0 %v2785_v35  ;;  %v2560_v40 = vpop.f32.mrb[16].mxu1  ;;  %v2839_v42 = vld [vmem:[#allocation2 + $0x578] sm:$0xff]  ;;  %v2841_v35 = vld [vmem:[#allocation2 + $0x588] sm:$0xff] }
 0x511   : > { %v2561_v44 = vadd.f32 %v2560_v40, %v5331_v47  ;;  %3090 = vmatprep.mubr.bf16.mxu1 %v5375_v36  ;;  %3254 = vmatprep.mubr.bf16.mxu0 %v5375_v36  ;;  %v2562_v22 = vpop.f32.mrb[17].mxu1  ;;  %v2848_v40 = vld [vmem:[#allocation2 + $0x5c0] sm:$0xff] }
 0x512   : > { %v2563_v50 = vadd.f32 %v2562_v22, %v5333_v49  ;;  %3062 = vmatprep.subr.bf16.mxu1 %v2791_v38  ;;  %3226 = vmatprep.subr.bf16.mxu0 %v2793_v39  ;;  %v2564_v57 = vpop.f32.mrb[18].mxu1  ;;  %v2849_v38 = vld [vmem:[#allocation2 + $0x5c8] sm:$0xff]  ;;  %v2846_v39 = vld [vmem:[#allocation2 + $0x5b0] sm:$0xff] }
 0x513   : > { %v5388_v58 = vadd.f32 %v2627_v37, %v2561_v44  ;;  %v2565_v47 = vpop.f32.mrb[19].mxu1  ;;  %v2847_v37 = vld [vmem:[#allocation2 + $0x5b8] sm:$0xff]  ;;  %v2856_v44 = vld [vmem:[#allocation2 + $0x600] sm:$0xff]  ;;  %v2853_v22 = vld [vmem:[#allocation2 + $0x5e8] sm:$0xff] }
 0x514   : > { %v5390_v59 = vadd.f32 %v2631_v41, %v2563_v50  ;;  %3063 = vmatpush1.bf16.msra.mxu1 %v2790_v45  ;;  %3227 = vmatpush1.bf16.msra.mxu0 %v2792_v46  ;;  %v2854_v41 = vld [vmem:[#allocation2 + $0x5f0] sm:$0xff]  ;;  %v2855_v45 = vld [vmem:[#allocation2 + $0x5f8] sm:$0xff]  ;;  %v2861_v46 = vld [vmem:[#allocation2 + $0x628] sm:$0xff] }
 0x515   : > { %3064 = vmatprep.subr.bf16.mxu1 %v2798_v53  ;;  %3228 = vmatprep.subr.bf16.mxu0 %v2800_v56  ;;  %v2863_v50 = vld [vmem:[#allocation2 + $0x638] sm:$0xff]  ;;  %v2860_v53 = vld [vmem:[#allocation2 + $0x620] sm:$0xff]  ;;  %v2862_v56 = vld [vmem:[#allocation2 + $0x630] sm:$0xff] }
 0x516   : > { %v2601_v49 = vpop.f32.mrb[28].mxu0  ;;  %v2868_v57 = vld [vmem:[#allocation2 + $0x660] sm:$0xff]  ;;  %v2870_v47 = vld [vmem:[#allocation2 + $0x670] sm:$0xff] }
 0x517   : > { %v2602_v2 = vadd.f32 %v2601_v49, %v5335_v55  ;;  %v4365_v3 = vpop.f32.mrb[29].mxu0  ;;  %v2819_v55 = vld [vmem:[#allocation2 + $0x4d8] sm:$0xff]  ;;  %v2877_v49 = vld [vmem:[#allocation2 + $0x6a8] sm:$0xff] }
 0x518   : > { %3065 = vmatpush1.bf16.msra.mxu1 %v2797_v51  ;;  %3229 = vmatpush1.bf16.msra.mxu0 %v2799_v61  ;;  %v2604_v5 = vpop.f32.mrb[30].mxu0  ;;  %v2869_v51 = vld [vmem:[#allocation2 + $0x668] sm:$0xff]  ;;  %v2875_v61 = vld [vmem:[#allocation2 + $0x698] sm:$0xff]  ;;  %v2884_v3 = vld [vmem:[#allocation2 + $0x6e0] sm:$0xff] }
 0x519   : > { %v5395_v6 = vadd.f32 %v2635_v60, %v2602_v2  ;;  %3066 = vmatprep.subr.bf16.mxu1 %v2805_v62  ;;  %3230 = vmatprep.subr.bf16.mxu0 %v2807_v63  ;;  %v4366_v0 = vpop.f32.mrb[31].mxu0  ;;  %v2867_v60 = vld [vmem:[#allocation2 + $0x658] sm:$0xff]  ;;  %v2874_v62 = vld [vmem:[#allocation2 + $0x690] sm:$0xff]  ;;  %v2876_v63 = vld [vmem:[#allocation2 + $0x6a0] sm:$0xff]  ;;  %v2652_v5 = vmax.f32 %v5363_v24, 0.0 }
 0x51a   : > { %v2882_v2 = vld [vmem:[#allocation2 + $0x6d0] sm:$0xff]  ;;  %v2655_v0 = vmax.f32 %v5390_v59, 0.0  ;;  %v2896_v24 = vld [vmem:[#allocation2 + $0x740] sm:$0xff]  ;;  %v2895_v59 = vld [vmem:[#allocation2 + $0x738] sm:$0xff] }
 0x51c   : > { %3067 = vmatpush1.bf16.msra.mxu1 %v2804_v8  ;;  %3231 = vmatpush1.bf16.msra.mxu0 %v2806_v9  ;;  %v2881_v8 = vld [vmem:[#allocation2 + $0x6c8] sm:$0xff]  ;;  %v2883_v9 = vld [vmem:[#allocation2 + $0x6d8] sm:$0xff] }
 0x51d   : > { %3068 = vmatprep.subr.bf16.mxu1 %v2812_v11  ;;  %3232 = vmatprep.subr.bf16.mxu0 %v2814_v12  ;;  %v2889_v11 = vld [vmem:[#allocation2 + $0x708] sm:$0xff]  ;;  %v2891_v12 = vld [vmem:[#allocation2 + $0x718] sm:$0xff] }
 0x520   : > { %3069 = vmatpush1.bf16.msra.mxu1 %v2811_v13  ;;  %3233 = vmatpush1.bf16.msra.mxu0 %v2813_v14  ;;  %v5399_v13 = vpack.c.bf16 %v2652_v5, %v2652_v5  ;;  %v2888_v14 = vld [vmem:[#allocation2 + $0x700] sm:$0xff]  ;;  %v2958_v5 = vld [vmem:[#allocation2 + $0x930] sm:$0xff] }
 0x521   : > { %3070 = vmatprep.subr.bf16.mxu1 %v2819_v55  ;;  %3234 = vmatprep.subr.bf16.mxu0 %v2821_v15  ;;  %v5401_v55 = vpack.c.bf16 %v2655_v0, %v2655_v0  ;;  %v2890_v15 = vld [vmem:[#allocation2 + $0x710] sm:$0xff]  ;;  %v2968_v0 = vld [vmem:[#allocation2 + $0x980] sm:$0xff] }
 0x524   : > { %3071 = vmatpush1.bf16.msra.mxu1 %v2818_v16  ;;  %3235 = vmatpush1.bf16.msra.mxu0 %v2820_v17  ;;  %v2898_v16 = vld [vmem:[#allocation2 + $0x750] sm:$0xff]  ;;  %v2897_v17 = vld [vmem:[#allocation2 + $0x748] sm:$0xff] }
 0x525   : > { %3072 = vmatprep.subr.bf16.mxu1 %v2826_v18  ;;  %3236 = vmatprep.subr.bf16.mxu0 %v2828_v20  ;;  %v2903_v18 = vld [vmem:[#allocation2 + $0x778] sm:$0xff]  ;;  %v2905_v20 = vld [vmem:[#allocation2 + $0x788] sm:$0xff] }
 0x528   : > { %3073 = vmatpush1.bf16.msra.mxu1 %v2825_v21  ;;  %3237 = vmatpush1.bf16.msra.mxu0 %v2827_v25  ;;  %v2902_v21 = vld [vmem:[#allocation2 + $0x770] sm:$0xff]  ;;  %v2904_v25 = vld [vmem:[#allocation2 + $0x780] sm:$0xff] }
 0x529   : > { %3074 = vmatprep.subr.bf16.mxu1 %v2833_v26  ;;  %3238 = vmatprep.subr.bf16.mxu0 %v2835_v27  ;;  %v2910_v26 = vld [vmem:[#allocation2 + $0x7b0] sm:$0xff]  ;;  %v2912_v27 = vld [vmem:[#allocation2 + $0x7c0] sm:$0xff] }
 0x52c   : > { %3075 = vmatpush1.bf16.msra.mxu1 %v2832_v28  ;;  %3239 = vmatpush1.bf16.msra.mxu0 %v2834_v29  ;;  %v2909_v28 = vld [vmem:[#allocation2 + $0x7a8] sm:$0xff]  ;;  %v2911_v29 = vld [vmem:[#allocation2 + $0x7b8] sm:$0xff] }
 0x52d   : > { %3076 = vmatprep.subr.bf16.mxu1 %v2840_v30  ;;  %3240 = vmatprep.subr.bf16.mxu0 %v2842_v32  ;;  %v2917_v30 = vld [vmem:[#allocation2 + $0x7e8] sm:$0xff]  ;;  %v2919_v32 = vld [vmem:[#allocation2 + $0x7f8] sm:$0xff] }
 0x530   : > { %3077 = vmatpush1.bf16.msra.mxu1 %v2839_v42  ;;  %3241 = vmatpush1.bf16.msra.mxu0 %v2841_v35  ;;  %v2916_v42 = vld [vmem:[#allocation2 + $0x7e0] sm:$0xff]  ;;  %v2918_v35 = vld [vmem:[#allocation2 + $0x7f0] sm:$0xff] }
 0x531   : > { %3078 = vmatprep.subr.bf16.mxu1 %v2847_v37  ;;  %3242 = vmatprep.subr.bf16.mxu0 %v2849_v38  ;;  %v2924_v37 = vld [vmem:[#allocation2 + $0x820] sm:$0xff]  ;;  %v2926_v38 = vld [vmem:[#allocation2 + $0x830] sm:$0xff] }
 0x534   : > { %3079 = vmatpush1.bf16.msra.mxu1 %v2846_v39  ;;  %3243 = vmatpush1.bf16.msra.mxu0 %v2848_v40  ;;  %v2923_v39 = vld [vmem:[#allocation2 + $0x818] sm:$0xff]  ;;  %v2925_v40 = vld [vmem:[#allocation2 + $0x828] sm:$0xff] }
 0x535   : > { %3080 = vmatprep.subr.bf16.mxu1 %v2854_v41  ;;  %3244 = vmatprep.subr.bf16.mxu0 %v2856_v44  ;;  %v2931_v41 = vld [vmem:[#allocation2 + $0x858] sm:$0xff]  ;;  %v2933_v44 = vld [vmem:[#allocation2 + $0x868] sm:$0xff] }
 0x538   : > { %3081 = vmatpush1.bf16.msra.mxu1 %v2853_v22  ;;  %3245 = vmatpush1.bf16.msra.mxu0 %v2855_v45  ;;  %v2930_v22 = vld [vmem:[#allocation2 + $0x850] sm:$0xff]  ;;  %v2932_v45 = vld [vmem:[#allocation2 + $0x860] sm:$0xff] }
 0x539   : > { %3082 = vmatprep.subr.bf16.mxu1 %v2861_v46  ;;  %3246 = vmatprep.subr.bf16.mxu0 %v2863_v50  ;;  %v2938_v46 = vld [vmem:[#allocation2 + $0x890] sm:$0xff]  ;;  %v2940_v50 = vld [vmem:[#allocation2 + $0x8a0] sm:$0xff] }
 0x53c   : > { %3083 = vmatpush1.bf16.msra.mxu1 %v2860_v53  ;;  %3247 = vmatpush1.bf16.msra.mxu0 %v2862_v56  ;;  %v2937_v53 = vld [vmem:[#allocation2 + $0x888] sm:$0xff]  ;;  %v2939_v56 = vld [vmem:[#allocation2 + $0x898] sm:$0xff] }
 0x53d   : > { %3084 = vmatprep.subr.bf16.mxu1 %v2868_v57  ;;  %3248 = vmatprep.subr.bf16.mxu0 %v2870_v47  ;;  %v2945_v57 = vld [vmem:[#allocation2 + $0x8c8] sm:$0xff]  ;;  %v2947_v47 = vld [vmem:[#allocation2 + $0x8d8] sm:$0xff] }
 0x540   : > { %3085 = vmatpush1.bf16.msra.mxu1 %v2867_v60  ;;  %3249 = vmatpush1.bf16.msra.mxu0 %v2869_v51  ;;  %v2944_v60 = vld [vmem:[#allocation2 + $0x8c0] sm:$0xff]  ;;  %v2946_v51 = vld [vmem:[#allocation2 + $0x8d0] sm:$0xff] }
 0x541   : > { %3086 = vmatprep.subr.bf16.mxu1 %v2875_v61  ;;  %3250 = vmatprep.subr.bf16.mxu0 %v2877_v49  ;;  %v2952_v61 = vld [vmem:[#allocation2 + $0x900] sm:$0xff]  ;;  %v2954_v49 = vld [vmem:[#allocation2 + $0x910] sm:$0xff] }
 0x544   : > { %3087 = vmatpush1.bf16.msra.mxu1 %v2874_v62  ;;  %3251 = vmatpush1.bf16.msra.mxu0 %v2876_v63  ;;  %v2951_v62 = vld [vmem:[#allocation2 + $0x8f8] sm:$0xff]  ;;  %v2953_v63 = vld [vmem:[#allocation2 + $0x908] sm:$0xff] }
 0x545   : > { %3088 = vmatprep.subr.bf16.mxu1 %v2882_v2  ;;  %3252 = vmatprep.subr.bf16.mxu0 %v2884_v3  ;;  %v2959_v2 = vld [vmem:[#allocation2 + $0x938] sm:$0xff]  ;;  %v2961_v3 = vld [vmem:[#allocation2 + $0x948] sm:$0xff] }
 0x548   : > { %3089 = vmatpush1.bf16.msra.mxu1 %v2881_v8  ;;  %3253 = vmatpush1.bf16.msra.mxu0 %v2883_v9  ;;  %v2960_v8 = vld [vmem:[#allocation2 + $0x940] sm:$0xff]  ;;  %v2966_v9 = vld [vmem:[#allocation2 + $0x970] sm:$0xff] }
 0x549   : > { %3099 = vmatprep.subr.bf16.mxu1 %v2889_v11  ;;  %3263 = vmatprep.subr.bf16.mxu0 %v2891_v12  ;;  %v2965_v11 = vld [vmem:[#allocation2 + $0x968] sm:$0xff]  ;;  %v2967_v12 = vld [vmem:[#allocation2 + $0x978] sm:$0xff] }
 0x54b   : > { %3091 = vmatmul.mubr.bf16.vlgmr.msra.gmra.mrb[20].mxu1 %v5399_v13  ;;  %3255 = vmatmul.mubr.bf16.vlgmr.msra.gmra.mrb[32].mxu0 %v5399_v13 }
 0x54c   : > { %3100 = vmatpush1.bf16.msra.mxu1 %v2888_v14  ;;  %3131 = vmatprep.mubr.bf16.mxu1 %v5401_v55  ;;  %v2973_v14 = vld [vmem:[#allocation2 + $0x9a8] sm:$0xff] }
 0x54d   : > { %3264 = vmatpush1.bf16.msra.mxu0 %v2890_v15  ;;  %3295 = vmatprep.mubr.bf16.mxu0 %v5401_v55  ;;  %v2975_v15 = vld [vmem:[#allocation2 + $0x9b8] sm:$0xff] }
 0x54e   : > { %3101 = vmatprep.subr.bf16.mxu1 %v2896_v24  ;;  %3265 = vmatprep.subr.bf16.mxu0 %v2898_v16  ;;  %v2972_v24 = vld [vmem:[#allocation2 + $0x9a0] sm:$0xff]  ;;  %v2974_v16 = vld [vmem:[#allocation2 + $0x9b0] sm:$0xff] }
 0x550   : > { %3102 = vmatpush1.bf16.msra.mxu1 %v2895_v59  ;;  %v2980_v59 = vld [vmem:[#allocation2 + $0x9e0] sm:$0xff] }
 0x551   : > { %3266 = vmatpush1.bf16.msra.mxu0 %v2897_v17  ;;  %3103 = vmatprep.subr.bf16.mxu1 %v2903_v18  ;;  %v2982_v18 = vld [vmem:[#allocation2 + $0x9f0] sm:$0xff] }
 0x552   : > { %3267 = vmatprep.subr.bf16.mxu0 %v2905_v20 }
 0x554   : > { %3104 = vmatpush1.bf16.msra.mxu1 %v2902_v21  ;;  %v2979_v21 = vld [vmem:[#allocation2 + $0x9d8] sm:$0xff] }
 0x555   : > { %3268 = vmatpush1.bf16.msra.mxu0 %v2904_v25  ;;  %3105 = vmatprep.subr.bf16.mxu1 %v2910_v26  ;;  %v2981_v26 = vld [vmem:[#allocation2 + $0x9e8] sm:$0xff] }
 0x556   : > { %3269 = vmatprep.subr.bf16.mxu0 %v2912_v27  ;;  %v2987_v27 = vld [vmem:[#allocation2 + $0xa18] sm:$0xff] }
 0x558   : > { %3106 = vmatpush1.bf16.msra.mxu1 %v2909_v28  ;;  %v2989_v28 = vld [vmem:[#allocation2 + $0xa28] sm:$0xff] }
 0x559   : > { %3270 = vmatpush1.bf16.msra.mxu0 %v2911_v29  ;;  %3107 = vmatprep.subr.bf16.mxu1 %v2917_v30  ;;  %v2986_v30 = vld [vmem:[#allocation2 + $0xa10] sm:$0xff] }
 0x55a   : > { %3271 = vmatprep.subr.bf16.mxu0 %v2919_v32 }
 0x55c   : > { %3108 = vmatpush1.bf16.msra.mxu1 %v2916_v42  ;;  %v2994_v42 = vld [vmem:[#allocation2 + $0xa50] sm:$0xff] }
 0x55d   : > { %3272 = vmatpush1.bf16.msra.mxu0 %v2918_v35  ;;  %3109 = vmatprep.subr.bf16.mxu1 %v2924_v37  ;;  %v2996_v35 = vld [vmem:[#allocation2 + $0xa60] sm:$0xff]  ;;  %v2654_v37 = vmax.f32 %v5388_v58, 0.0  ;;  %v3007_v58 = vld [vmem:[#allocation2 + $0xab8] sm:$0xff] }
 0x55e   : > { %3273 = vmatprep.subr.bf16.mxu0 %v2926_v38  ;;  %v2993_v38 = vld [vmem:[#allocation2 + $0xa48] sm:$0xff] }
 0x560   : > { %3110 = vmatpush1.bf16.msra.mxu1 %v2923_v39  ;;  %v2995_v39 = vld [vmem:[#allocation2 + $0xa58] sm:$0xff] }
 0x561   : > { %3274 = vmatpush1.bf16.msra.mxu0 %v2925_v40  ;;  %3111 = vmatprep.subr.bf16.mxu1 %v2931_v41  ;;  %v3001_v40 = vld [vmem:[#allocation2 + $0xa88] sm:$0xff]  ;;  %v3003_v41 = vld [vmem:[#allocation2 + $0xa98] sm:$0xff] }
 0x562   : > { %3275 = vmatprep.subr.bf16.mxu0 %v2933_v44  ;;  %v5417_v44 = vpack.c.bf16 %v2654_v37, %v2654_v37  ;;  %v2724_v37 = vld [vmem:[#allocation2 + $0x1e0] sm:$0xff] }
 0x564   : > { %3112 = vmatpush1.bf16.msra.mxu1 %v2930_v22  ;;  %v3000_v22 = vld [vmem:[#allocation2 + $0xa80] sm:$0xff] }
 0x565   : > { %3276 = vmatpush1.bf16.msra.mxu0 %v2932_v45  ;;  %3113 = vmatprep.subr.bf16.mxu1 %v2938_v46  ;;  %v3002_v45 = vld [vmem:[#allocation2 + $0xa90] sm:$0xff]  ;;  %v3008_v46 = vld [vmem:[#allocation2 + $0xac0] sm:$0xff] }
 0x566   : > { %3277 = vmatprep.subr.bf16.mxu0 %v2940_v50  ;;  %v3010_v50 = vld [vmem:[#allocation2 + $0xad0] sm:$0xff] }
 0x568   : > { %3114 = vmatpush1.bf16.msra.mxu1 %v2937_v53  ;;  %v3009_v53 = vld [vmem:[#allocation2 + $0xac8] sm:$0xff] }
 0x569   : > { %3278 = vmatpush1.bf16.msra.mxu0 %v2939_v56  ;;  %3115 = vmatprep.subr.bf16.mxu1 %v2945_v57  ;;  %v2669_v56 = vld [vmem:[#allocation2 + $0x28] sm:$0xff]  ;;  %v2726_v57 = vld [vmem:[#allocation2 + $0x1f0] sm:$0xff] }
 0x56a   : > { %3279 = vmatprep.subr.bf16.mxu0 %v2947_v47  ;;  %v2656_v47 = vmax.f32 %v5395_v6, 0.0  ;;  %v2675_v6 = vld [vmem:[#allocation2 + $0x58] sm:$0xff] }
 0x56c   : > { %3116 = vmatpush1.bf16.msra.mxu1 %v2944_v60  ;;  %v5424_v60 = vpack.c.bf16 %v2656_v47, %v2656_v47  ;;  %v2803_v47 = vld [vmem:[#allocation2 + $0x458] sm:$0xff] }
 0x56d   : > { %3280 = vmatpush1.bf16.msra.mxu0 %v2946_v51  ;;  %3117 = vmatprep.subr.bf16.mxu1 %v2952_v61  ;;  %v2668_v51 = vld [vmem:[#allocation2 + $0x20] sm:$0xff]  ;;  %v2670_v61 = vld [vmem:[#allocation2 + $0x30] sm:$0xff] }
 0x56e   : > { %3281 = vmatprep.subr.bf16.mxu0 %v2954_v49  ;;  %v2676_v49 = vld [vmem:[#allocation2 + $0x60] sm:$0xff] }
 0x570   : > { %3118 = vmatpush1.bf16.msra.mxu1 %v2951_v62  ;;  %v2733_v62 = vld [vmem:[#allocation2 + $0x228] sm:$0xff] }
 0x571   : > { %3282 = vmatpush1.bf16.msra.mxu0 %v2953_v63  ;;  %3119 = vmatprep.subr.bf16.mxu1 %v2959_v2  ;;  %v2677_v63 = vld [vmem:[#allocation2 + $0x68] sm:$0xff]  ;;  %v2683_v2 = vld [vmem:[#allocation2 + $0x98] sm:$0xff] }
 0x572   : > { %3283 = vmatprep.subr.bf16.mxu0 %v2961_v3  ;;  %v2740_v3 = vld [vmem:[#allocation2 + $0x260] sm:$0xff] }
 0x574   : > { %3120 = vmatpush1.bf16.msra.mxu1 %v2958_v5  ;;  %v2682_v5 = vld [vmem:[#allocation2 + $0x90] sm:$0xff] }
 0x575   : > { %3284 = vmatpush1.bf16.msra.mxu0 %v2960_v8  ;;  %3121 = vmatprep.subr.bf16.mxu1 %v2966_v9  ;;  %v2684_v8 = vld [vmem:[#allocation2 + $0xa0] sm:$0xff]  ;;  %v2690_v9 = vld [vmem:[#allocation2 + $0xd0] sm:$0xff] }
 0x576   : > { %3285 = vmatprep.subr.bf16.mxu0 %v2968_v0  ;;  %v2747_v0 = vld [vmem:[#allocation2 + $0x298] sm:$0xff] }
 0x578   : > { %3122 = vmatpush1.bf16.msra.mxu1 %v2965_v11  ;;  %v2689_v11 = vld [vmem:[#allocation2 + $0xc8] sm:$0xff] }
 0x579   : > { %3286 = vmatpush1.bf16.msra.mxu0 %v2967_v12  ;;  %3123 = vmatprep.subr.bf16.mxu1 %v2973_v14  ;;  %v2691_v12 = vld [vmem:[#allocation2 + $0xd8] sm:$0xff]  ;;  %v2754_v14 = vld [vmem:[#allocation2 + $0x2d0] sm:$0xff] }
 0x57a   : > { %3287 = vmatprep.subr.bf16.mxu0 %v2975_v15  ;;  %v2696_v15 = vld [vmem:[#allocation2 + $0x100] sm:$0xff] }
 0x57b   : > { %v1884_v17 = vpop.xlane.xlu1 %1883 }
 0x57c   : > { %3124 = vmatpush1.bf16.msra.mxu1 %v2972_v24  ;;  %vm1885_vm4 = vcmp.ge.f32.partialorder %v5327_v43, %v1884_v17  ;;  %v2988_v43 = vld [vmem:[#allocation2 + $0xa20] sm:$0xff]  ;;  %v2698_v24 = vld [vmem:[#allocation2 + $0x110] sm:$0xff]  ;;  %v2703_v17 = vld [vmem:[#allocation2 + $0x138] sm:$0xff] }
 0x57d   : > { %3288 = vmatpush1.bf16.msra.mxu0 %v2974_v16  ;;  %v1886_v20 = vsel %vm1885_vm4, %v4772_v1, 4  ;;  %3125 = vmatprep.subr.bf16.mxu1 %v2980_v59  ;;  %v2704_v16 = vld [vmem:[#allocation2 + $0x140] sm:$0xff]  ;;  %v2761_v59 = vld [vmem:[#allocation2 + $0x308] sm:$0xff]  ;;  %vm3872_vm4 = vcmp.eq.s32.totalorder %v4772_v1, 11 }
 0x57e   : > { %v5410_v25 = vsel %vm1791_vm2, %v1886_v20, 2147483647  ;;  %3289 = vmatprep.subr.bf16.mxu0 %v2982_v18  ;;  %v2705_v18 = vld [vmem:[#allocation2 + $0x148] sm:$0xff]  ;;  %v2711_v20 = vld [vmem:[#allocation2 + $0x178] sm:$0xff]  ;;  %vm3866_vm2 = vcmp.eq.s32.totalorder %v4772_v1, 10 }
 0x57f   : > { %v1889_v29 = vshra.s32 %v5410_v25, 16 }
 0x580   : > { %3126 = vmatpush1.bf16.msra.mxu1 %v2979_v21  ;;  %v2768_v21 = vld [vmem:[#allocation2 + $0x340] sm:$0xff] }
 0x581   : > { %3290 = vmatpush1.bf16.msra.mxu0 %v2981_v26  ;;  %3127 = vmatprep.subr.bf16.mxu1 %v2987_v27  ;;  %v5413_v32 = vcvt.s32.f32 %v1889_v29  ;;  %v2710_v26 = vld [vmem:[#allocation2 + $0x170] sm:$0xff]  ;;  %v2712_v27 = vld [vmem:[#allocation2 + $0x180] sm:$0xff]  ;;  %v2775_v29 = vld [vmem:[#allocation2 + $0x378] sm:$0xff] }
 0x582   : > { %3291 = vmatprep.subr.bf16.mxu0 %v2989_v28  ;;  %v2718_v28 = vld [vmem:[#allocation2 + $0x1b0] sm:$0xff] }
 0x583   : > { %1892 = vmin.xlane.f32.xlu0 %v5413_v32 }
 0x584   : > { %3128 = vmatpush1.bf16.msra.mxu1 %v2986_v30  ;;  %v2717_v30 = vld [vmem:[#allocation2 + $0x1a8] sm:$0xff] }
 0x585   : > { %3292 = vmatpush1.bf16.msra.mxu0 %v2988_v43  ;;  %3129 = vmatprep.subr.bf16.mxu1 %v2994_v42  ;;  %v2719_v43 = vld [vmem:[#allocation2 + $0x1b8] sm:$0xff]  ;;  %v2725_v42 = vld [vmem:[#allocation2 + $0x1e8] sm:$0xff] }
 0x586   : > { %3293 = vmatprep.subr.bf16.mxu0 %v2996_v35  ;;  %v2838_v35 = vld [vmem:[#allocation2 + $0x570] sm:$0xff] }
 0x588   : > { %3130 = vmatpush1.bf16.msra.mxu1 %v2993_v38  ;;  %v2782_v38 = vld [vmem:[#allocation2 + $0x3b0] sm:$0xff] }
 0x589   : > { %3294 = vmatpush1.bf16.msra.mxu0 %v2995_v39  ;;  %3140 = vmatprep.subr.bf16.mxu1 %v3001_v40  ;;  %v2732_v39 = vld [vmem:[#allocation2 + $0x220] sm:$0xff]  ;;  %v2845_v40 = vld [vmem:[#allocation2 + $0x5a8] sm:$0xff] }
 0x58a   : > { %3304 = vmatprep.subr.bf16.mxu0 %v3003_v41  ;;  %v2731_v41 = vld [vmem:[#allocation2 + $0x218] sm:$0xff] }
 0x58b   : > { %3132 = vmatmul.mubr.bf16.vlgmr.msra.gmra.mrb[20].mxu1 %v5417_v44 }
 0x58c   : > { %3296 = vmatmul.mubr.bf16.vlgmr.msra.gmra.mrb[32].mxu0 %v5417_v44  ;;  %3141 = vmatpush1.bf16.msra.mxu1 %v3000_v22  ;;  %v2789_v22 = vld [vmem:[#allocation2 + $0x3e8] sm:$0xff] }
 0x58d   : > { %3305 = vmatpush1.bf16.msra.mxu0 %v3002_v45  ;;  %3142 = vmatprep.subr.bf16.mxu1 %v3008_v46  ;;  %v2739_v45 = vld [vmem:[#allocation2 + $0x258] sm:$0xff]  ;;  %v2852_v46 = vld [vmem:[#allocation2 + $0x5e0] sm:$0xff] }
 0x58e   : > { %3306 = vmatprep.subr.bf16.mxu0 %v3010_v50  ;;  %3172 = vmatprep.mubr.bf16.mxu1 %v4669_v34  ;;  %v2738_v50 = vld [vmem:[#allocation2 + $0x250] sm:$0xff] }
 0x58f   : > { %3336 = vmatprep.mubr.bf16.mxu0 %v4669_v34 }
 0x590   : > { %3143 = vmatpush1.bf16.msra.mxu1 %v3007_v58  ;;  %v2796_v58 = vld [vmem:[#allocation2 + $0x420] sm:$0xff] }
 0x591   : > { %3307 = vmatpush1.bf16.msra.mxu0 %v3009_v53  ;;  %3345 = vmatprep.subr.bf16.mxu1 %v2669_v56  ;;  %v2746_v53 = vld [vmem:[#allocation2 + $0x290] sm:$0xff]  ;;  %v2859_v56 = vld [vmem:[#allocation2 + $0x618] sm:$0xff] }
 0x592   : > { %4267 = vmatprep.subr.bf16.mxu0 %v2726_v57  ;;  %v2745_v57 = vld [vmem:[#allocation2 + $0x288] sm:$0xff] }
 0x597   : > { %4247 = vmatmul.mubr.msk.bf16.vlgmr.msra.gmra.mrb[20].mxu1 %vm1783_vm3, %v5424_v60 }
 0x598   : > { %4248 = vmatmul.mubr.msk.bf16.vlgmr.msra.gmra.mrb[32].mxu0 %vm1783_vm3, %v5424_v60  ;;  %3346 = vmatpush1.bf16.msra.mxu1 %v2668_v51  ;;  %v2753_v51 = vld [vmem:[#allocation2 + $0x2c8] sm:$0xff] }
 0x599   : > { %4268 = vmatpush3.bf16.msra.mxu0 %v2670_v61  ;;  %3377 = vmatprep.mubr.bf16.mxu1 %v5359_v19  ;;  %v2866_v61 = vld [vmem:[#allocation2 + $0x650] sm:$0xff] }
 0x59a   : > { %3541 = vmatprep.mubr.bf16.mxu0 %v5359_v19  ;;  %3347 = vmatprep.subr.bf16.mxu1 %v2676_v49  ;;  %v2697_v19 = vld [vmem:[#allocation2 + $0x108] sm:$0xff]  ;;  %v2752_v49 = vld [vmem:[#allocation2 + $0x2c0] sm:$0xff] }
 0x59b   : > { %4269 = vmatprep.subr.bf16.mxu0 %v2733_v62  ;;  %v2810_v62 = vld [vmem:[#allocation2 + $0x490] sm:$0xff] }
 0x59c   : > { %3348 = vmatpush1.bf16.msra.mxu1 %v2675_v6  ;;  %v2760_v6 = vld [vmem:[#allocation2 + $0x300] sm:$0xff] }
 0x59d   : > { %4270 = vmatpush3.bf16.msra.mxu0 %v2677_v63  ;;  %3349 = vmatprep.subr.bf16.mxu1 %v2683_v2  ;;  %v2873_v63 = vld [vmem:[#allocation2 + $0x688] sm:$0xff]  ;;  %v2759_v2 = vld [vmem:[#allocation2 + $0x2f8] sm:$0xff] }
 0x59e   : > { %4271 = vmatprep.subr.bf16.mxu0 %v2740_v3  ;;  %v2817_v3 = vld [vmem:[#allocation2 + $0x4c8] sm:$0xff] }
 0x5a0   : > { %3350 = vmatpush1.bf16.msra.mxu1 %v2682_v5  ;;  %v2767_v5 = vld [vmem:[#allocation2 + $0x338] sm:$0xff] }
 0x5a1   : > { %4272 = vmatpush3.bf16.msra.mxu0 %v2684_v8  ;;  %3351 = vmatprep.subr.bf16.mxu1 %v2690_v9  ;;  %v2880_v8 = vld [vmem:[#allocation2 + $0x6c0] sm:$0xff]  ;;  %v2766_v9 = vld [vmem:[#allocation2 + $0x330] sm:$0xff] }
 0x5a2   : > { %4273 = vmatprep.subr.bf16.mxu0 %v2747_v0  ;;  %v2824_v0 = vld [vmem:[#allocation2 + $0x500] sm:$0xff] }
 0x5a4   : > { %3352 = vmatpush1.bf16.msra.mxu1 %v2689_v11  ;;  %v2774_v11 = vld [vmem:[#allocation2 + $0x370] sm:$0xff] }
 0x5a5   : > { %4274 = vmatpush3.bf16.msra.mxu0 %v2691_v12  ;;  %3353 = vmatprep.subr.bf16.mxu1 %v2697_v19  ;;  %v2887_v12 = vld [vmem:[#allocation2 + $0x6f8] sm:$0xff]  ;;  %v2773_v19 = vld [vmem:[#allocation2 + $0x368] sm:$0xff] }
 0x5a6   : > { %4275 = vmatprep.subr.bf16.mxu0 %v2754_v14  ;;  %v2831_v14 = vld [vmem:[#allocation2 + $0x538] sm:$0xff] }
 0x5a8   : > { %3354 = vmatpush1.bf16.msra.mxu1 %v2696_v15  ;;  %v2781_v15 = vld [vmem:[#allocation2 + $0x3a8] sm:$0xff] }
 0x5a9   : > { %4276 = vmatpush3.bf16.msra.mxu0 %v2698_v24  ;;  %3355 = vmatprep.subr.bf16.mxu1 %v2704_v16  ;;  %v2950_v24 = vld [vmem:[#allocation2 + $0x8f0] sm:$0xff]  ;;  %v2780_v16 = vld [vmem:[#allocation2 + $0x3a0] sm:$0xff] }
 0x5aa   : > { %4277 = vmatprep.subr.bf16.mxu0 %v2761_v59  ;;  %v2894_v59 = vld [vmem:[#allocation2 + $0x730] sm:$0xff] }
 0x5ac   : > { %3356 = vmatpush1.bf16.msra.mxu1 %v2703_v17  ;;  %v2788_v17 = vld [vmem:[#allocation2 + $0x3e0] sm:$0xff] }
 0x5ad   : > { %4278 = vmatpush3.bf16.msra.mxu0 %v2705_v18  ;;  %3357 = vmatprep.subr.bf16.mxu1 %v2711_v20  ;;  %v2957_v18 = vld [vmem:[#allocation2 + $0x928] sm:$0xff]  ;;  %v2787_v20 = vld [vmem:[#allocation2 + $0x3d8] sm:$0xff] }
 0x5ae   : > { %4279 = vmatprep.subr.bf16.mxu0 %v2768_v21  ;;  %v2901_v21 = vld [vmem:[#allocation2 + $0x768] sm:$0xff] }
 0x5b0   : > { %3358 = vmatpush1.bf16.msra.mxu1 %v2710_v26  ;;  %v2795_v26 = vld [vmem:[#allocation2 + $0x418] sm:$0xff] }
 0x5b1   : > { %4280 = vmatpush3.bf16.msra.mxu0 %v2712_v27  ;;  %3359 = vmatprep.subr.bf16.mxu1 %v2718_v28  ;;  %v2964_v27 = vld [vmem:[#allocation2 + $0x960] sm:$0xff] }
 0x5b2   : > { %4281 = vmatprep.subr.bf16.mxu0 %v2775_v29  ;;  %v2908_v28 = vld [vmem:[#allocation2 + $0x7a0] sm:$0xff]  ;;  %v2802_v29 = vld [vmem:[#allocation2 + $0x450] sm:$0xff] }
 0x5b4   : > { %3360 = vmatpush1.bf16.msra.mxu1 %v2717_v30  ;;  %v2971_v30 = vld [vmem:[#allocation2 + $0x998] sm:$0xff] }
 0x5b5   : > { %4282 = vmatpush3.bf16.msra.mxu0 %v2719_v43  ;;  %3361 = vmatprep.subr.bf16.mxu1 %v2725_v42  ;;  %v2915_v43 = vld [vmem:[#allocation2 + $0x7d8] sm:$0xff]  ;;  %v2809_v42 = vld [vmem:[#allocation2 + $0x488] sm:$0xff] }
 0x5b6   : > { %4289 = vmatprep.subr.bf16.mxu0 %v2838_v35  ;;  %v2978_v35 = vld [vmem:[#allocation2 + $0x9d0] sm:$0xff] }
 0x5b8   : > { %3542 = vmatmul.mubr.bf16.vlgmr.msra.gmra.mrb[36].mxu0 %v5361_v23  ;;  %3362 = vmatpush1.bf16.msra.mxu1 %v2724_v37  ;;  %v2808_v37 = vld [vmem:[#allocation2 + $0x480] sm:$0xff] }
 0x5b9   : > { %4290 = vmatpush3.bf16.msra.mxu0 %v2782_v38  ;;  %3581 = vmatprep.mubr.bf16.mxu0 %v5375_v36  ;;  %v2922_v38 = vld [vmem:[#allocation2 + $0x810] sm:$0xff] }
 0x5ba   : > { %3363 = vmatprep.subr.bf16.mxu1 %v2732_v39  ;;  %4291 = vmatprep.subr.bf16.mxu0 %v2845_v40  ;;  %v2816_v39 = vld [vmem:[#allocation2 + $0x4c0] sm:$0xff]  ;;  %v2985_v40 = vld [vmem:[#allocation2 + $0xa08] sm:$0xff] }
 0x5bc   : > { %3364 = vmatpush1.bf16.msra.mxu1 %v2731_v41  ;;  %v2815_v41 = vld [vmem:[#allocation2 + $0x4b8] sm:$0xff] }
 0x5bd   : > { %4292 = vmatpush3.bf16.msra.mxu0 %v2789_v22  ;;  %3365 = vmatprep.subr.bf16.mxu1 %v2739_v45  ;;  %v2929_v22 = vld [vmem:[#allocation2 + $0x848] sm:$0xff]  ;;  %v2823_v45 = vld [vmem:[#allocation2 + $0x4f8] sm:$0xff] }
 0x5be   : > { %4293 = vmatprep.subr.bf16.mxu0 %v2852_v46  ;;  %v2992_v46 = vld [vmem:[#allocation2 + $0xa40] sm:$0xff] }
 0x5c0   : > { %3366 = vmatpush1.bf16.msra.mxu1 %v2738_v50  ;;  %v2822_v50 = vld [vmem:[#allocation2 + $0x4f0] sm:$0xff] }
 0x5c1   : > { %4294 = vmatpush3.bf16.msra.mxu0 %v2796_v58  ;;  %3367 = vmatprep.subr.bf16.mxu1 %v2746_v53  ;;  %v2936_v58 = vld [vmem:[#allocation2 + $0x880] sm:$0xff]  ;;  %v2830_v53 = vld [vmem:[#allocation2 + $0x530] sm:$0xff] }
 0x5c2   : > { %4295 = vmatprep.subr.bf16.mxu0 %v2859_v56  ;;  %v2999_v56 = vld [vmem:[#allocation2 + $0xa78] sm:$0xff] }
 0x5c4   : > { %3368 = vmatpush1.bf16.msra.mxu1 %v2745_v57  ;;  %v2829_v57 = vld [vmem:[#allocation2 + $0x528] sm:$0xff] }
 0x5c5   : > { %4296 = vmatpush3.bf16.msra.mxu0 %v2803_v47  ;;  %3369 = vmatprep.subr.bf16.mxu1 %v2753_v51  ;;  %v2943_v47 = vld [vmem:[#allocation2 + $0x8b8] sm:$0xff]  ;;  %v2837_v51 = vld [vmem:[#allocation2 + $0x568] sm:$0xff] }
 0x5c6   : > { %4297 = vmatprep.subr.bf16.mxu0 %v2866_v61  ;;  %v2836_v61 = vld [vmem:[#allocation2 + $0x560] sm:$0xff] }
 0x5c8   : > { %3370 = vmatpush1.bf16.msra.mxu1 %v2752_v49  ;;  %v3006_v49 = vld [vmem:[#allocation2 + $0xab0] sm:$0xff] }
 0x5c9   : > { %4298 = vmatpush3.bf16.msra.mxu0 %v2810_v62  ;;  %3371 = vmatprep.subr.bf16.mxu1 %v2760_v6  ;;  %v2844_v62 = vld [vmem:[#allocation2 + $0x5a0] sm:$0xff]  ;;  %v2843_v6 = vld [vmem:[#allocation2 + $0x598] sm:$0xff] }
 0x5ca   : > { %4299 = vmatprep.subr.bf16.mxu0 %v2873_v63  ;;  %v3013_v63 = vld [vmem:[#allocation2 + $0xae8] sm:$0xff] }
 0x5cc   : > { %3372 = vmatpush1.bf16.msra.mxu1 %v2759_v2  ;;  %v2851_v2 = vld [vmem:[#allocation2 + $0x5d8] sm:$0xff] }
 0x5cd   : > { %4300 = vmatpush3.bf16.msra.mxu0 %v2817_v3  ;;  %3373 = vmatprep.subr.bf16.mxu1 %v2767_v5  ;;  %v2850_v3 = vld [vmem:[#allocation2 + $0x5d0] sm:$0xff] }
 0x5ce   : > { %4301 = vmatprep.subr.bf16.mxu0 %v2880_v8  ;;  %v2858_v5 = vld [vmem:[#allocation2 + $0x610] sm:$0xff]  ;;  %v2857_v8 = vld [vmem:[#allocation2 + $0x608] sm:$0xff] }
 0x5d0   : > { %3374 = vmatpush1.bf16.msra.mxu1 %v2766_v9  ;;  %v2865_v9 = vld [vmem:[#allocation2 + $0x648] sm:$0xff] }
 0x5d1   : > { %4302 = vmatpush3.bf16.msra.mxu0 %v2824_v0  ;;  %3375 = vmatprep.subr.bf16.mxu1 %v2774_v11  ;;  %v2864_v0 = vld [vmem:[#allocation2 + $0x640] sm:$0xff] }
 0x5d2   : > { %4303 = vmatprep.subr.bf16.mxu0 %v2887_v12  ;;  %v2872_v11 = vld [vmem:[#allocation2 + $0x680] sm:$0xff]  ;;  %v2871_v12 = vld [vmem:[#allocation2 + $0x678] sm:$0xff] }
 0x5d4   : > { %3376 = vmatpush1.bf16.msra.mxu1 %v2773_v19  ;;  %v2879_v19 = vld [vmem:[#allocation2 + $0x6b8] sm:$0xff] }
 0x5d5   : > { %4304 = vmatpush3.bf16.msra.mxu0 %v2831_v14  ;;  %3386 = vmatprep.subr.bf16.mxu1 %v2781_v15  ;;  %v1888_v14 = vand.u32 65535, %v5410_v25  ;;  %v2878_v15 = vld [vmem:[#allocation2 + $0x6b0] sm:$0xff]  ;;  %v2900_v25 = vld [vmem:[#allocation2 + $0x760] sm:$0xff] }
 0x5d6   : > { %4311 = vmatprep.subr.bf16.mxu0 %v2950_v24  ;;  %v2886_v24 = vld [vmem:[#allocation2 + $0x6f0] sm:$0xff] }
 0x5d7   : > { %3378 = vmatmul.mubr.bf16.vlgmr.msra.gmra.mrb[24].mxu1 %v5361_v23  ;;  %v2794_v23 = vld [vmem:[#allocation2 + $0x410] sm:$0xff] }
 0x5d8   : > { %3582 = vmatmul.mubr.bf16.vlgmr.msra.gmra.mrb[40].mxu0 %v5399_v13  ;;  %3387 = vmatpush1.bf16.msra.mxu1 %v2780_v16 }
 0x5d9   : > { %3418 = vmatprep.mubr.bf16.mxu1 %v5375_v36  ;;  %4312 = vmatpush3.bf16.msra.mxu0 %v2894_v59  ;;  %v2801_v36 = vld [vmem:[#allocation2 + $0x448] sm:$0xff]  ;;  %v1890_v59 = vcvt.s32.f32 %v1888_v14 }
 0x5da   : > { %3621 = vmatprep.mubr.bf16.mxu0 %v5401_v55  ;;  %3388 = vmatprep.subr.bf16.mxu1 %v2788_v17  ;;  %v2885_v17 = vld [vmem:[#allocation2 + $0x6e8] sm:$0xff] }
 0x5db   : > { %4313 = vmatprep.subr.bf16.mxu0 %v2957_v18 }
 0x5dc   : > { %3389 = vmatpush1.bf16.msra.mxu1 %v2787_v20  ;;  %v2893_v20 = vld [vmem:[#allocation2 + $0x728] sm:$0xff] }
 0x5dd   : > { %4314 = vmatpush3.bf16.msra.mxu0 %v2901_v21  ;;  %3390 = vmatprep.subr.bf16.mxu1 %v2795_v26  ;;  %v2892_v21 = vld [vmem:[#allocation2 + $0x720] sm:$0xff]  ;;  %v2899_v26 = vld [vmem:[#allocation2 + $0x758] sm:$0xff] }
 0x5de   : > { %4315 = vmatprep.subr.bf16.mxu0 %v2964_v27  ;;  %v2907_v27 = vld [vmem:[#allocation2 + $0x798] sm:$0xff] }
 0x5e0   : > { %3391 = vmatpush1.bf16.msra.mxu1 %v2794_v23  ;;  %v2906_v23 = vld [vmem:[#allocation2 + $0x790] sm:$0xff] }
 0x5e1   : > { %4316 = vmatpush3.bf16.msra.mxu0 %v2908_v28  ;;  %3392 = vmatprep.subr.bf16.mxu1 %v2802_v29  ;;  %v2914_v28 = vld [vmem:[#allocation2 + $0x7d0] sm:$0xff]  ;;  %v2921_v29 = vld [vmem:[#allocation2 + $0x808] sm:$0xff] }
 0x5e2   : > { %4317 = vmatprep.subr.bf16.mxu0 %v2971_v30  ;;  %v2920_v30 = vld [vmem:[#allocation2 + $0x800] sm:$0xff] }
 0x5e4   : > { %3393 = vmatpush1.bf16.msra.mxu1 %v2801_v36  ;;  %v2928_v36 = vld [vmem:[#allocation2 + $0x840] sm:$0xff] }
 0x5e5   : > { %4318 = vmatpush3.bf16.msra.mxu0 %v2915_v43  ;;  %3394 = vmatprep.subr.bf16.mxu1 %v2809_v42  ;;  %v2935_v43 = vld [vmem:[#allocation2 + $0x878] sm:$0xff]  ;;  %v2942_v42 = vld [vmem:[#allocation2 + $0x8b0] sm:$0xff] }
 0x5e6   : > { %4319 = vmatprep.subr.bf16.mxu0 %v2978_v35  ;;  %v2941_v35 = vld [vmem:[#allocation2 + $0x8a8] sm:$0xff] }
 0x5e8   : > { %3395 = vmatpush1.bf16.msra.mxu1 %v2808_v37  ;;  %v2949_v37 = vld [vmem:[#allocation2 + $0x8e8] sm:$0xff] }
 0x5e9   : > { %4320 = vmatpush3.bf16.msra.mxu0 %v2922_v38  ;;  %3396 = vmatprep.subr.bf16.mxu1 %v2816_v39  ;;  %v2948_v38 = vld [vmem:[#allocation2 + $0x8e0] sm:$0xff] }
 0x5ea   : > { %4321 = vmatprep.subr.bf16.mxu0 %v2985_v40  ;;  %v2956_v39 = vld [vmem:[#allocation2 + $0x920] sm:$0xff]  ;;  %v2955_v40 = vld [vmem:[#allocation2 + $0x918] sm:$0xff] }
 0x5ec   : > { %3397 = vmatpush1.bf16.msra.mxu1 %v2815_v41  ;;  %v2963_v41 = vld [vmem:[#allocation2 + $0x958] sm:$0xff] }
 0x5ed   : > { %4322 = vmatpush3.bf16.msra.mxu0 %v2929_v22  ;;  %3398 = vmatprep.subr.bf16.mxu1 %v2823_v45  ;;  %v2962_v22 = vld [vmem:[#allocation2 + $0x950] sm:$0xff] }
 0x5ee   : > { %4323 = vmatprep.subr.bf16.mxu0 %v2992_v46  ;;  %v2970_v45 = vld [vmem:[#allocation2 + $0x990] sm:$0xff]  ;;  %v2969_v46 = vld [vmem:[#allocation2 + $0x988] sm:$0xff] }
 0x5f0   : > { %3399 = vmatpush1.bf16.msra.mxu1 %v2822_v50  ;;  %v2977_v50 = vld [vmem:[#allocation2 + $0x9c8] sm:$0xff] }
 0x5f1   : > { %4324 = vmatpush3.bf16.msra.mxu0 %v2936_v58  ;;  %3400 = vmatprep.subr.bf16.mxu1 %v2830_v53  ;;  %v2976_v58 = vld [vmem:[#allocation2 + $0x9c0] sm:$0xff] }
 0x5f2   : > { %4325 = vmatprep.subr.bf16.mxu0 %v2999_v56  ;;  %v2984_v53 = vld [vmem:[#allocation2 + $0xa00] sm:$0xff]  ;;  %v2983_v56 = vld [vmem:[#allocation2 + $0x9f8] sm:$0xff] }
 0x5f4   : > { %3401 = vmatpush1.bf16.msra.mxu1 %v2829_v57  ;;  %v2991_v57 = vld [vmem:[#allocation2 + $0xa38] sm:$0xff] }
 0x5f5   : > { %4326 = vmatpush3.bf16.msra.mxu0 %v2943_v47  ;;  %3402 = vmatprep.subr.bf16.mxu1 %v2837_v51  ;;  %v2990_v47 = vld [vmem:[#allocation2 + $0xa30] sm:$0xff] }
 0x5f6   : > { %4367 = vmatprep.subr.bf16.mxu0 %v4672_v10  ;;  %v2998_v51 = vld [vmem:[#allocation2 + $0xa70] sm:$0xff] }
 0x5f8   : > { %3622 = vmatmul.mubr.bf16.vlgmr.msra.gmra.mrb[44].mxu0 %v5417_v44  ;;  %3403 = vmatpush1.bf16.msra.mxu1 %v2836_v61  ;;  %v2997_v61 = vld [vmem:[#allocation2 + $0xa68] sm:$0xff] }
 0x5f9   : > { %4368 = vmatpush3.bf16.msra.mxu0 %v3006_v49  ;;  %3404 = vmatprep.subr.bf16.mxu1 %v2844_v62  ;;  %v3005_v49 = vld [vmem:[#allocation2 + $0xaa8] sm:$0xff]  ;;  %v3004_v62 = vld [vmem:[#allocation2 + $0xaa0] sm:$0xff] }
 0x5fa   : > { %4369 = vmatprep.subr.bf16.mxu0 %v4672_v10  ;;  %4371 = vmatprep.mubr.msk.bf16.mxu0 %vm4671_vm1, %v4672_v10  ;;  %vm3863_vm1 = vcmp.eq.s32.totalorder %v4772_v1, 3 }
 0x5fc   : > { %3405 = vmatpush1.bf16.msra.mxu1 %v2843_v6  ;;  %v3012_v6 = vld [vmem:[#allocation2 + $0xae0] sm:$0xff] }
 0x5fd   : > { %4370 = vmatpush3.bf16.msra.mxu0 %v3013_v63  ;;  %3406 = vmatprep.subr.bf16.mxu1 %v2851_v2  ;;  %v3011_v63 = vld [vmem:[#allocation2 + $0xad8] sm:$0xff] }
 0x5fe   : > { %v4145_v2 = vld [vmem:[%s5673_s8 + $0x7] ss:$8 sm:$0xf] }
 0x600   : > { %4372 = vmatmul.mubr.msk.bf16.vlgmr.msra.gmra.mrb[48].mxu0 %vm1783_vm3, %v5424_v60  ;;  %3407 = vmatpush1.bf16.msra.mxu1 %v2850_v3  ;;  %v4146_v3 = vld [vmem:[%s5673_s8 + $0x7] ss:$8 sm:$0xf0] }
 0x601   : > { %3408 = vmatprep.subr.bf16.mxu1 %v2858_v5  ;;  %v4141_v5 = vld [vmem:[%s5673_s8 + $0x4] ss:$8 sm:$0xf] }
 0x604   : > { %3409 = vmatpush1.bf16.msra.mxu1 %v2857_v8 }
 0x605   : > { %3410 = vmatprep.subr.bf16.mxu1 %v2865_v9  ;;  %v4143_v9 = vld [vmem:[%s5673_s8 + $0x5] ss:$8 sm:$0xf] }
 0x608   : > { %3411 = vmatpush1.bf16.msra.mxu1 %v2864_v0  ;;  %v4144_v0 = vld [vmem:[%s5673_s8 + $0x5] ss:$8 sm:$0xf0] }
 0x609   : > { %3412 = vmatprep.subr.bf16.mxu1 %v2872_v11 }
 0x60c   : > { %3413 = vmatpush1.bf16.msra.mxu1 %v2871_v12 }
 0x60d   : > { %3414 = vmatprep.subr.bf16.mxu1 %v2879_v19  ;;  %v5484_v19 = vor.u32 %v4144_v0, %v4143_v9 }
 0x610   : > { %3415 = vmatpush1.bf16.msra.mxu1 %v2878_v15  ;;  %v5446_v16 = vpop.xlane.xlu0 %1892 }
 0x611   : > { %3416 = vmatprep.subr.bf16.mxu1 %v2886_v24  ;;  %vm1894_vm5 = vcmp.eq.f32.partialorder %v5413_v32, %v5446_v16  ;;  %v2913_v32 = vld [vmem:[#allocation2 + $0x7c8] sm:$0xff] }
 0x612   : > { %v1895_v18 = vsel %vm1894_vm5, %v1890_v59, inf  ;;  %vm3875_vm5 = vcmp.eq.s32.totalorder %v4772_v1, 16 }
 0x613   : > { %1896 = vmin.xlane.f32.xlu1 %v1895_v18 }
 0x614   : > { %3417 = vmatpush1.bf16.msra.mxu1 %v2885_v17 }
 0x615   : > { %3427 = vmatprep.subr.bf16.mxu1 %v2893_v20 }
 0x617   : > { %3419 = vmatmul.mubr.bf16.vlgmr.msra.gmra.mrb[24].mxu1 %v5399_v13  ;;  %v2927_v13 = vld [vmem:[#allocation2 + $0x838] sm:$0xff] }
 0x618   : > { %3428 = vmatpush1.bf16.msra.mxu1 %v2892_v21  ;;  %3459 = vmatprep.mubr.bf16.mxu1 %v5401_v55  ;;  %v2934_v55 = vld [vmem:[#allocation2 + $0x870] sm:$0xff] }
 0x619   : > { %3429 = vmatprep.subr.bf16.mxu1 %v2900_v25 }
 0x61c   : > { %3430 = vmatpush1.bf16.msra.mxu1 %v2899_v26 }
 0x61d   : > { %3431 = vmatprep.subr.bf16.mxu1 %v2907_v27 }
 0x620   : > { %3432 = vmatpush1.bf16.msra.mxu1 %v2906_v23 }
 0x621   : > { %3433 = vmatprep.subr.bf16.mxu1 %v2914_v28 }
 0x624   : > { %3434 = vmatpush1.bf16.msra.mxu1 %v2913_v32 }
 0x625   : > { %3435 = vmatprep.subr.bf16.mxu1 %v2921_v29  ;;  %v3766_v29 = vrot.slane %v5484_v19, %v5039_v54 }
 0x628   : > { %3436 = vmatpush1.bf16.msra.mxu1 %v2920_v30 }
 0x629   : > { %3437 = vmatprep.subr.bf16.mxu1 %v2928_v36 }
 0x62c   : > { %3438 = vmatpush1.bf16.msra.mxu1 %v2927_v13 }
 0x62d   : > { %3439 = vmatprep.subr.bf16.mxu1 %v2935_v43 }
 0x630   : > { %3440 = vmatpush1.bf16.msra.mxu1 %v2934_v55 }
 0x631   : > { %3441 = vmatprep.subr.bf16.mxu1 %v2942_v42  ;;  %v3770_v42 = vrot.slane %v5484_v19, %v5033_v52 }
 0x634   : > { %3442 = vmatpush1.bf16.msra.mxu1 %v2941_v35 }
 0x635   : > { %3443 = vmatprep.subr.bf16.mxu1 %v2949_v37 }
 0x638   : > { %3444 = vmatpush1.bf16.msra.mxu1 %v2948_v38 }
 0x639   : > { %3445 = vmatprep.subr.bf16.mxu1 %v2956_v39 }
 0x63c   : > { %3446 = vmatpush1.bf16.msra.mxu1 %v2955_v40  ;;  %v3774_v40 = vrot.slane %v5484_v19, %v5350_v4 }
 0x63d   : > { %3447 = vmatprep.subr.bf16.mxu1 %v2963_v41 }
 0x640   : > { %3448 = vmatpush1.bf16.msra.mxu1 %v2962_v22 }
 0x641   : > { %3449 = vmatprep.subr.bf16.mxu1 %v2970_v45 }
 0x644   : > { %3450 = vmatpush1.bf16.msra.mxu1 %v2969_v46  ;;  %v3778_v46 = vrot.slane %v5484_v19, %v5353_v7 }
 0x645   : > { %3451 = vmatprep.subr.bf16.mxu1 %v2977_v50 }
 0x648   : > { %3452 = vmatpush1.bf16.msra.mxu1 %v2976_v58 }
 0x649   : > { %3453 = vmatprep.subr.bf16.mxu1 %v2984_v53 }
 0x64c   : > { %3454 = vmatpush1.bf16.msra.mxu1 %v2983_v56 }
 0x64d   : > { %3455 = vmatprep.subr.bf16.mxu1 %v2991_v57 }
 0x650   : > { %3456 = vmatpush1.bf16.msra.mxu1 %v2990_v47 }
 0x651   : > { %3457 = vmatprep.subr.bf16.mxu1 %v2998_v51 }
 0x654   : > { %3458 = vmatpush1.bf16.msra.mxu1 %v2997_v61 }
 0x655   : > { %3468 = vmatprep.subr.bf16.mxu1 %v3005_v49 }
 0x657   : > { %3460 = vmatmul.mubr.bf16.vlgmr.msra.gmra.mrb[24].mxu1 %v5417_v44  ;;  %v4142_v44 = vld [vmem:[%s5673_s8 + $0x4] ss:$8 sm:$0xf0] }
 0x658   : > { %3469 = vmatpush1.bf16.msra.mxu1 %v3004_v62  ;;  %3500 = vmatprep.mubr.bf16.mxu1 %v4669_v34  ;;  %v5468_v34 = vor.u32 %v4146_v3, %v4145_v2  ;;  %v5470_v8 = vor.u32 %v4142_v44, %v4141_v5  ;;  %v1902_v62 = vld [vmem:[%s359_s15] sm:$0xff] }
 0x659   : > { %3470 = vmatprep.subr.bf16.mxu1 %v3012_v6  ;;  %vm1917_vm6 = vcmp.eq.s32.totalorder %v1902_v62, 0  ;;  %vm1941_vm9 = vcmp.eq.s32.totalorder %v1902_v62, 1  ;;  %vm1965_vm10 = vcmp.eq.s32.totalorder %v1902_v62, 2  ;;  %vm1989_vm11 = vcmp.eq.s32.totalorder %v1902_v62, 3 }
 0x65a   : > { %v3673_v11 = vrot.slane %v5468_v34, %v5039_v54  ;;  %v3681_v12 = vrot.slane %v5468_v34, %v5350_v4  ;;  %v3716_v14 = vrot.slane %v5470_v8, %v5039_v54  ;;  %v3685_v15 = vrot.slane %v5468_v34, %v5353_v7 }
 0x65b   : > { %v3724_v59 = vrot.slane %v5470_v8, %v5350_v4  ;;  %v3720_v17 = vrot.slane %v5470_v8, %v5033_v52  ;;  %v3728_v25 = vrot.slane %v5470_v8, %v5353_v7  ;;  %v1899_v4 = vcvt.f32.s32 %v5446_v16 }
 0x65c   : > { %3471 = vmatpush1.bf16.msra.mxu1 %v3011_v63  ;;  %v5513_v3 = vsel %vm1917_vm6, 1.0, %v4672_v10  ;;  %v5519_v9 = vsel %vm1941_vm9, 1.0, %v4672_v10  ;;  %vm3878_vm6 = vcmp.eq.s32.totalorder %v4772_v1, 17  ;;  %vm4060_vm9 = vcmp.eq.s32.totalorder (!%p4251_p4), %v4772_v1, 5 }
 0x65d   : > { %v1900_v7 = vshll.u32 %v1899_v4, 16  ;;  %v3786_v4 = vrot.slane %v5484_v19, %v5373_v33 }
 0x663   : > { %4249 = vmatmul.mubr.msk.bf16.vlgmr.msra.gmra.mrb[24].mxu1 %vm1783_vm3, %v5424_v60  ;;  %v3677_v60 = vrot.slane %v5468_v34, %v5033_v52  ;;  %vm3869_vm3 = vcmp.eq.s32.totalorder %v4772_v1, 4 }
 0x66a   : > { %v3174_v24 = vpop.f32.mrb[20].mxu1 }
 0x66b   : > { %v3705_v18 = vmul.f32 %v3673_v11, %v3174_v24  ;;  %v3338_v20 = vpop.f32.mrb[32].mxu0  ;;  %v3176_v21 = vpop.f32.mrb[21].mxu1 }
 0x66c   : > { %v3707_v26 = vmul.f32 %v3681_v12, %v3338_v20  ;;  %v3706_v27 = vmul.f32 %v3677_v60, %v3176_v21  ;;  %v3340_v23 = vpop.f32.mrb[33].mxu0  ;;  %v3178_v28 = vpop.f32.mrb[22].mxu1  ;;  %v4196_v21 = vsel %vm1989_vm11, 1.0, %v4672_v10 }
 0x66d   : > { %v3748_v32 = vadd.f32 %v3716_v14, %v3705_v18  ;;  %v3708_v30 = vmul.f32 %v3685_v15, %v3340_v23  ;;  %v3342_v36 = vpop.f32.mrb[34].mxu0  ;;  %v3179_v13 = vpop.f32.mrb[23].mxu1  ;;  %v5524_v14 = vsel %vm1965_vm10, 1.0, %v4672_v10 }
 0x66e   : > { %v3750_v43 = vadd.f32 %v3724_v59, %v3707_v26  ;;  %v3749_v55 = vadd.f32 %v3720_v17, %v3706_v27  ;;  %v3343_v35 = vpop.f32.mrb[35].mxu0 }
 0x66f   : > { %v3755_v37 = vmax.f32 %v3748_v32, 0.0  ;;  %v3751_v38 = vadd.f32 %v3728_v25, %v3708_v30 }
 0x670   : > { %v3757_v39 = vmax.f32 %v3750_v43, 0.0  ;;  %v3756_v41 = vmax.f32 %v3749_v55, 0.0 }
 0x671   : > { %v3798_v22 = vmul.f32 %v3766_v29, %v3755_v37  ;;  %v3758_v54 = vmax.f32 %v3751_v38, 0.0  ;;  %v3689_v37 = vrot.slane %v5468_v34, %v5370_v31  ;;  %v3693_v38 = vrot.slane %v5468_v34, %v5373_v33 }
 0x672   : > { %v3799_v45 = vmul.f32 %v3770_v42, %v3756_v41  ;;  %v3800_v50 = vmul.f32 %v3774_v40, %v3757_v39  ;;  %v3740_v40 = vrot.slane %v5470_v8, %v5385_v48  ;;  %v3732_v41 = vrot.slane %v5470_v8, %v5370_v31 }
 0x673   : > { %v3801_v53 = vmul.f32 %v3778_v46, %v3758_v54  ;;  %v3736_v54 = vrot.slane %v5470_v8, %v5373_v33  ;;  %v1920_v33 = vsel %vm1906_vm7, %v5513_v3, 0.0 }
 0x674   : > { %v3805_v58 = vadd.f32 %v3799_v45, %v3798_v22 }
 0x676   : > { %v3806_v56 = vadd.f32 %v3805_v58, %v3800_v50 }
 0x678   : > { %v5504_v52 = vadd.f32 %v3806_v56, %v3801_v53 }
 0x68b   : > { %v4283_v57 = vpop.f32.mrb[36].mxu0 }
 0x68c   : > { %v4284_v47 = vpop.f32.mrb[37].mxu0 }
 0x68d   : > { %v4285_v51 = vadd.f32 %v4284_v47, %v4283_v57  ;;  %v4286_v61 = vpop.f32.mrb[38].mxu0 }
 0x68e   : > { %v4287_v49 = vpop.f32.mrb[39].mxu0 }
 0x6a0   : > { %v1897_v6 = vpop.xlane.xlu1 %1896 }
 0x6a1   : > { %v1898_v63 = vcvt.f32.s32 %v1897_v6 }
 0x6a3   : > { %v1901_v2 = vadd.s32 %v1900_v7, %v1898_v63 }
 0x6a5   : > { %vm1903_vm8 = vcmp.eq.s32.totalorder %v1901_v2, %v1902_v62 }
 0x6a6   : > { %v4192_v5 = vsel %vm1903_vm8, 1.0, %v4672_v10  ;;  %v3697_v10 = vrot.slane %v5468_v34, %v5385_v48  ;;  %vm3893_vm8 = vcmask (!%p4251_p4), 1040384  }
 0x6a7   : > { %v1907_v16 = vsel %vm1906_vm7, %v4192_v5, 0.0  ;;  %v1930_v44 = vmul.f32 %v5513_v3, %v4192_v5  ;;  %v1954_v12 = vmul.f32 %v5519_v9, %v4192_v5  ;;  %v1978_v20 = vmul.f32 %v5524_v14, %v4192_v5 }
 0x6a8   : > { %1908 = vadd.xlane.f32.xlu1 %v1907_v16  ;;  %v2002_v26 = vmul.f32 %v4196_v21, %v4192_v5  ;;  %v3790_v5 = vrot.slane %v5484_v19, %v5385_v48  ;;  %v1968_v48 = vsel %vm1906_vm7, %v5524_v14, 0.0 }
 0x6a9   : > { %v1931_v11 = vsel %vm1906_vm7, %v1930_v44, 0.0  ;;  %v1955_v18 = vsel %vm1906_vm7, %v1954_v12, 0.0  ;;  %v1979_v25 = vsel %vm1906_vm7, %v1978_v20, 0.0 }
 0x6aa   : > { %v2003_v27 = vsel %vm1906_vm7, %v2002_v26, 0.0 }
 0x6ab   : > { %v4305_v0 = vpop.f32.mrb[40].mxu0 }
 0x6ac   : > { %v4306_v60 = vpop.f32.mrb[41].mxu0  ;;  %1932 = vadd.xlane.f32.xlu1 %v1931_v11 }
 0x6ad   : > { %v4307_v15 = vadd.f32 %v4306_v60, %v4305_v0  ;;  %v4308_v24 = vpop.f32.mrb[42].mxu0 }
 0x6ae   : > { %v4309_v59 = vpop.f32.mrb[43].mxu0 }
 0x6af   : > { %v3584_v17 = vadd.f32 %v4307_v15, %v4285_v51  ;;  %v3782_v51 = vrot.slane %v5484_v19, %v5370_v31  ;;  %v1944_v15 = vsel %vm1906_vm7, %v5519_v9, 0.0  ;;  %v1992_v19 = vsel %vm1906_vm7, %v4196_v21, 0.0  ;;  %v1263_v9 = vld [vmem:[%s5673_s8 + $0x6] ss:$0 sm:$0xff] }
 0x6b0   : > { %1956 = vadd.xlane.f32.xlu1 %v1955_v18 }
 0x6b4   : > { %1980 = vadd.xlane.f32.xlu1 %v1979_v25 }
 0x6b8   : > { %2004 = vadd.xlane.f32.xlu1 %v2003_v27 }
 0x6cb   : > { %v4327_v23 = vpop.f32.mrb[44].mxu0 }
 0x6cc   : > { %v4328_v28 = vpop.f32.mrb[45].mxu0 }
 0x6cd   : > { %v4329_v32 = vadd.f32 %v4328_v28, %v4327_v23  ;;  %v4330_v29 = vpop.f32.mrb[46].mxu0 }
 0x6ce   : > { %v4331_v30 = vpop.f32.mrb[47].mxu0 }
 0x6cf   : > { %v3624_v36 = vadd.f32 %v4329_v32, %v3584_v17 }
 0x6d3   : > { %v3663_v13 = vpop.f32.mrb[48].mxu0 }
 0x6d4   : > { %v3664_v43 = vadd.f32 %v3663_v13, %v3624_v36  ;;  %v4373_v55 = vpop.f32.mrb[49].mxu0 }
 0x6d5   : > { %v3666_v42 = vpop.f32.mrb[50].mxu0 }
 0x6d6   : > { %v4374_v35 = vpop.f32.mrb[51].mxu0  ;;  %v3711_v39 = vmul.f32 %v3697_v10, %v3664_v43 }
 0x6d8   : > { %v3754_v47 = vadd.f32 %v3740_v40, %v3711_v39 }
 0x6da   : > { %v3761_v63 = vmax.f32 %v3754_v47, 0.0 }
 0x6dc   : > { %v3804_v11 = vmul.f32 %v3790_v5, %v3761_v63 }
 0x735   : > { %v1909_v22 = vpop.xlane.xlu1 %1908 }
 0x736   : > { %v3502_v45 = vpop.f32.mrb[24].mxu1  ;;  %v1910_v46 = vrot.slane %v1909_v22, 4 }
 0x737   : > { %v3709_v50 = vmul.f32 %v3689_v37, %v3502_v45  ;;  %v3504_v58 = vpop.f32.mrb[25].mxu1 }
 0x738   : > { %v3710_v53 = vmul.f32 %v3693_v38, %v3504_v58  ;;  %v3506_v56 = vpop.f32.mrb[26].mxu1  ;;  %v1911_v57 = vadd.f32 %v1910_v46, %v1909_v22 }
 0x739   : > { %v3752_v34 = vadd.f32 %v3732_v41, %v3709_v50  ;;  %v3507_v61 = vpop.f32.mrb[27].mxu1  ;;  %v1933_v3 = vpop.xlane.xlu1 %1932 }
 0x73a   : > { %v3753_v49 = vadd.f32 %v3736_v54, %v3710_v53  ;;  %v1912_v62 = vrot.slane %v1911_v57, 2  ;;  %v1934_v17 = vrot.slane %v1933_v3, 4 }
 0x73b   : > { %v3759_v6 = vmax.f32 %v3752_v34, 0.0 }
 0x73c   : > { %v3760_v7 = vmax.f32 %v3753_v49, 0.0  ;;  %v1913_v8 = vadd.f32 %v1912_v62, %v1911_v57  ;;  %v1935_v18 = vadd.f32 %v1934_v17, %v1933_v3 }
 0x73d   : > { %v3802_v2 = vmul.f32 %v3782_v51, %v3759_v6  ;;  %v1957_v59 = vpop.xlane.xlu1 %1956 }
 0x73e   : > { %v3803_v16 = vmul.f32 %v3786_v4, %v3760_v7  ;;  %v1914_v44 = vrot.slane %v1913_v8, 1  ;;  %v1958_v20 = vrot.slane %v1957_v59, 4  ;;  %v1936_v27 = vrot.slane %v1935_v18, 2 }
 0x73f   : > { %v3808_v0 = vadd.f32 %v5504_v52, %v3802_v2  ;;  %v3814_v52 = vld [vmem:[%s363_s18] sm:$0xff] }
 0x740   : > { %v1915_v31 = vadd.f32 %v1914_v44, %v1913_v8  ;;  %v3827_v24 = vsel %vm1906_vm7, %v3814_v52, 0.0  ;;  %v1959_v23 = vadd.f32 %v1958_v20, %v1957_v59  ;;  %v3837_v13 = vmul.f32 %v3814_v52, %v3814_v52 }
 0x741   : > { %v3809_v12 = vadd.f32 %v3808_v0, %v3803_v16  ;;  %3828 = vadd.xlane.f32.xlu1 %v3827_v24  ;;  %v1981_v14 = vpop.xlane.xlu1 %1980  ;;  %v1937_v38 = vadd.f32 %v1936_v27, %v1935_v18 }
 0x742   : > { %4417 = vpush %v1915_v31  ;;  %v1982_v28 = vrot.slane %v1981_v14, 4  ;;  %v1960_v42 = vrot.slane %v1959_v23, 2  ;;  %v3838_v41 = vsel %vm1906_vm7, %v3837_v13, 0.0 }
 0x743   : > { %v3810_v60 = vadd.f32 %v3809_v12, %v3804_v11  ;;  %v1938_v58 = vrot.slane %v1937_v38, 1 }
 0x744   : > { %v1983_v35 = vadd.f32 %v1982_v28, %v1981_v14  ;;  %v1961_v53 = vadd.f32 %v1960_v42, %v1959_v23 }
 0x745   : > { %3811 = vadd.xlane.f32.xlu0 %v3810_v60  ;;  %v2005_v29 = vpop.xlane.xlu1 %2004  ;;  %v1939_v62 = vadd.f32 %v1938_v58, %v1937_v38 }
 0x746   : > { %v2006_v10 = vrot.slane %v2005_v29, 4  ;;  %v1984_v54 = vrot.slane %v1983_v35, 2  ;;  %v1962_v6 = vrot.slane %v1961_v53, 1 }
 0x748   : > { %v2007_v46 = vadd.f32 %v2006_v10, %v2005_v29  ;;  %v1985_v7 = vadd.f32 %v1984_v54, %v1983_v35  ;;  %v1963_v0 = vadd.f32 %v1962_v6, %v1961_v53 }
 0x749   : > { %1921 = vadd.xlane.f32.xlu0 %v1920_v33 }
 0x74a   : > { %v2008_v49 = vrot.slane %v2007_v46, 2  ;;  %v1986_v31 = vrot.slane %v1985_v7, 1 }
 0x74c   : > { %v2009_v11 = vadd.f32 %v2008_v49, %v2007_v46 }
 0x74d   : > { %1945 = vadd.xlane.f32.xlu0 %v1944_v15 }
 0x751   : > { %1969 = vadd.xlane.f32.xlu0 %v1968_v48  ;;  %v1987_v48 = vadd.f32 %v1986_v31, %v1985_v7 }
 0x755   : > { %1993 = vadd.xlane.f32.xlu0 %v1992_v19  ;;  %v2010_v19 = vrot.slane %v2009_v11, 1 }
 0x757   : > { %v2011_v3 = vadd.f32 %v2010_v19, %v2009_v11 }
 0x773   : > { %s4418_s28 = spop %4417 }
 0x774   : > { %v3849_v10 = vstv %s4418_s28 }
 0x775   : > { %v3850_v38 = vsel %vm3848_vm12, %v3849_v10, 0.0 }
 0x7ce   : > { %v3829_v59 = vpop.xlane.xlu1 %3828 }
 0x7cf   : > { %v3830_v17 = vrot.slane %v3829_v59, 4 }
 0x7d2   : > { %v3812_v21 = vpop.xlane.xlu0 %3811 }
 0x7d3   : > { %v3813_v25 = vadd.f32 %v3812_v21, %v1263_v9  ;;  %v3831_v9 = vadd.f32 %v3830_v17, %v3829_v59 }
 0x7d5   : > { %v3815_v26 = vsub.f32 %v3814_v52, %v3813_v25  ;;  %v3832_v14 = vrot.slane %v3831_v9, 2 }
 0x7d6   : > { %v1922_v32 = vpop.xlane.xlu0 %1921 }
 0x7d7   : > { %v1923_v30 = vrot.slane %v1922_v32, 4  ;;  %v3816_v36 = vmul.f32 %v3815_v26, %v3815_v26  ;;  %v3833_v25 = vadd.f32 %v3832_v14, %v3831_v9 }
 0x7d9   : > { %v1924_v43 = vadd.f32 %v1923_v30, %v1922_v32  ;;  %v3817_v55 = vsel %vm1906_vm7, %v3816_v36, 0.0  ;;  %v3834_v29 = vrot.slane %v3833_v25, 1  ;;  %vm3881_vm7 = vcmp.eq.s32.totalorder %v4772_v1, 18 }
 0x7da   : > { %3818 = vadd.xlane.f32.xlu0 %v3817_v55  ;;  %v1946_v37 = vpop.xlane.xlu0 %1945 }
 0x7db   : > { %v1925_v39 = vrot.slane %v1924_v43, 2  ;;  %v1947_v40 = vrot.slane %v1946_v37, 4  ;;  %v3835_v55 = vadd.f32 %v3834_v29, %v3833_v25 }
 0x7dd   : > { %v1948_v22 = vadd.f32 %v1947_v40, %v1946_v37  ;;  %v1926_v45 = vadd.f32 %v1925_v39, %v1924_v43 }
 0x7de   : > { %3839 = vadd.xlane.f32.xlu0 %v3838_v41  ;;  %v1970_v50 = vpop.xlane.xlu0 %1969 }
 0x7df   : > { %v1949_v56 = vrot.slane %v1948_v22, 2  ;;  %v1971_v57 = vrot.slane %v1970_v50, 4  ;;  %v1927_v47 = vrot.slane %v1926_v45, 1 }
 0x7e1   : > { %v1972_v34 = vadd.f32 %v1971_v57, %v1970_v50  ;;  %v1928_v51 = vadd.f32 %v1927_v47, %v1926_v45  ;;  %v1950_v61 = vadd.f32 %v1949_v56, %v1948_v22 }
 0x7e2   : > { %v1994_v4 = vpop.xlane.xlu0 %1993 }
 0x7e3   : > { %v1973_v8 = vrot.slane %v1972_v34, 2  ;;  %v1995_v63 = vrot.slane %v1994_v4, 4  ;;  %4419 = vpush %v1928_v51  ;;  %v1951_v2 = vrot.slane %v1950_v61, 1 }
 0x7e4   : > { %4421 = vpush %v1939_v62  ;;  %v3884_v62 = vld [vmem:[#allocation3] sm:$0x1] }
 0x7e5   : > { %v1996_v5 = vadd.f32 %v1995_v63, %v1994_v4  ;;  %v1952_v16 = vadd.f32 %v1951_v2, %v1950_v61  ;;  %v1974_v44 = vadd.f32 %v1973_v8, %v1972_v34 }
 0x7e7   : > { %v1997_v12 = vrot.slane %v1996_v5, 2  ;;  %4423 = vpush %v1952_v16  ;;  %v1975_v60 = vrot.slane %v1974_v44, 1 }
 0x7e8   : > { %4425 = vpush %v1963_v0 }
 0x7e9   : > { %v1976_v33 = vadd.f32 %v1975_v60, %v1974_v44  ;;  %v1998_v15 = vadd.f32 %v1997_v12, %v1996_v5 }
 0x7eb   : > { %4427 = vpush %v1976_v33  ;;  %v1999_v52 = vrot.slane %v1998_v15, 1 }
 0x7ec   : > { %4429 = vpush %v1987_v48 }
 0x7ed   : > { %v2000_v24 = vadd.f32 %v1999_v52, %v1998_v15 }
 0x7ef   : > { %4431 = vpush %v2000_v24 }
 0x7f0   : > { %4433 = vpush %v2011_v3 }
 0x814   : > { %s4420_s18 = spop %4419 }
 0x815   : > { %s4422_s29 = spop %4421  ;;  %v3855_v39 = vstv %s4420_s18 }
 0x816   : > { %v3852_v37 = vstv %s4422_s29 }
 0x817   : > { %v3853_v40 = vsel %vm3851_vm13, %v3852_v37, %v3850_v38 }
 0x818   : > { %s4424_s11 = spop %4423  ;;  %v3856_v22 = vsel %vm3854_vm14, %v3855_v39, %v3853_v40 }
 0x819   : > { %s4426_s13 = spop %4425  ;;  %v3861_v45 = vstv %s4424_s11 }
 0x81a   : > { %v3858_v41 = vstv %s4426_s13 }
 0x81b   : > { %v3859_v54 = vsel %vm3857_vm15, %v3858_v41, %v3856_v22 }
 0x81c   : > { %s4428_s14 = spop %4427  ;;  %v3862_v50 = vsel %vm3860_vm0, %v3861_v45, %v3859_v54 }
 0x81d   : > { %s4430_s16 = spop %4429  ;;  %v3867_v58 = vstv %s4428_s14 }
 0x81e   : > { %v3864_v46 = vstv %s4430_s16 }
 0x81f   : > { %v3865_v53 = vsel %vm3863_vm1, %v3864_v46, %v3862_v50 }
 0x820   : > { %s4432_s17 = spop %4431  ;;  %v3868_v57 = vsel %vm3866_vm2, %v3867_v58, %v3865_v53 }
 0x821   : > { %s4434_s19 = spop %4433  ;;  %v3873_v47 = vstv %s4432_s17 }
 0x822   : > { %v3870_v56 = vstv %s4434_s19 }
 0x823   : > { %v3871_v34 = vsel %vm3869_vm3, %v3870_v56, %v3868_v57 }
 0x824   : > { %v3874_v51 = vsel %vm3872_vm4, %v3873_v47, %v3871_v34 }
 0x867   : > { %v3819_v18 = vpop.xlane.xlu0 %3818 }
 0x868   : > { %v3820_v20 = vrot.slane %v3819_v18, 4 }
 0x86a   : > { %v3821_v21 = vadd.f32 %v3820_v20, %v3819_v18 }
 0x86b   : > { %v3840_v26 = vpop.xlane.xlu0 %3839 }
 0x86c   : > { %v3822_v27 = vrot.slane %v3821_v21, 2  ;;  %v3841_v23 = vrot.slane %v3840_v26, 4 }
 0x86e   : > { %v3842_v28 = vadd.f32 %v3841_v23, %v3840_v26  ;;  %v3823_v32 = vadd.f32 %v3822_v27, %v3821_v21 }
 0x870   : > { %v3843_v30 = vrot.slane %v3842_v28, 2  ;;  %v3824_v36 = vrot.slane %v3823_v32, 1 }
 0x872   : > { %v3844_v13 = vadd.f32 %v3843_v30, %v3842_v28  ;;  %v3825_v43 = vadd.f32 %v3824_v36, %v3823_v32 }
 0x874   : > { %4435 = vpush %v3825_v43  ;;  %v3845_v42 = vrot.slane %v3844_v13, 1 }
 0x875   : > { %4437 = vpush %v3835_v55 }
 0x876   : > { %v3846_v35 = vadd.f32 %v3845_v42, %v3844_v13 }
 0x878   : > { %4439 = vpush %v3846_v35 }
 0x8a5   : > { %s4436_s20 = spop %4435 }
 0x8a6   : > { %v3876_v61 = vstv %s4436_s20  ;;  %s4438_s21 = spop %4437 }
 0x8a7   : > { %v3877_v49 = vsel %vm3875_vm5, %v3876_v61, %v3874_v51  ;;  %v3879_v4 = vstv %s4438_s21 }
 0x8a8   : > { %v3880_v6 = vsel %vm3878_vm6, %v3879_v4, %v3877_v49  ;;  %3890 = sbr.rel (%p4251_p4) target bundleno = 2771 (0xad3), region = 68 }
 0x8a9   : > { %s4440_s22 = spop %4439 }
 0x8aa   : > { %v3882_v7 = vstv %s4440_s22 }
 0x8ab   : > { %v3883_v8 = vsel %vm3881_vm7, %v3882_v7, %v3880_v6 }
 0x8ac   : > { %v3885_v63 = vadd.f32 %v3884_v62, %v3883_v8 }
 0x8ae   : > { %3886 = vst [vmem:[#allocation3] sm:$0x1] %v3885_v63 }
 0x8b5   : > { %v3891_v2 = vld [vmem:[#allocation3] sm:$0x1] }
 0x8b6   : > { %v3916_v5 = vsel %vm3878_vm6, %v3891_v2, 0.0  ;;  %v3892_v16 = vsel %vm3848_vm12, %v3891_v2, 0.0  ;;  %v3927_v44 = vsel %vm3881_vm7, %v3891_v2, 0.0  ;;  %v3905_v0 = vsel %vm3875_vm5, %v3891_v2, 0.0 }
 0x8b7   : > { %v3917_v31 = vsel %vm3893_vm8, %v3916_v5, 0.0  ;;  %v3894_v11 = vsel %vm3893_vm8, %v3892_v16, 0.0  ;;  %v3928_v12 = vsel %vm3893_vm8, %v3927_v44, 0.0  ;;  %v3906_v60 = vsel %vm3893_vm8, %v3905_v0, 0.0 }
 0x8b8   : > { %3918 = vadd.xlane.f32.xlu1 %v3917_v31  ;;  %3895 = vadd.xlane.f32.xlu0 %v3894_v11  ;;  %v3959_v33 = vsel %vm3854_vm14, %v3891_v2, 0.0  ;;  %v3948_v15 = vsel %vm3851_vm13, %v3891_v2, 0.0  ;;  %v3987_v52 = vsel %vm3860_vm0, %v3891_v2, 0.0  ;;  %v3976_v24 = vsel %vm3857_vm15, %v3891_v2, 0.0 }
 0x8b9   : > { %v3960_v48 = vsel %vm3893_vm8, %v3959_v33, 0.0  ;;  %v3949_v19 = vsel %vm3893_vm8, %v3948_v15, 0.0  ;;  %v3988_v3 = vsel %vm3893_vm8, %v3987_v52, 0.0  ;;  %v3977_v59 = vsel %vm3893_vm8, %v3976_v24, 0.0 }
 0x8ba   : > { %v4015_v17 = vsel %vm3866_vm2, %v3891_v2, 0.0  ;;  %v4004_v9 = vsel %vm3863_vm1, %v3891_v2, 0.0  ;;  %v4043_v20 = vsel %vm3872_vm4, %v3891_v2, 0.0  ;;  %v4032_v21 = vsel %vm3869_vm3, %v3891_v2, 0.0 }
 0x8bb   : > { %v4016_v14 = vsel %vm3893_vm8, %v4015_v17, 0.0  ;;  %v4005_v18 = vsel %vm3893_vm8, %v4004_v9, 0.0  ;;  %v4044_v25 = vsel %vm3893_vm8, %v4043_v20, 0.0  ;;  %v4033_v26 = vsel %vm3893_vm8, %v4032_v21, 0.0 }
 0x8bc   : > { %3929 = vadd.xlane.f32.xlu1 %v3928_v12  ;;  %3907 = vadd.xlane.f32.xlu0 %v3906_v60 }
 0x8c0   : > { %3961 = vadd.xlane.f32.xlu1 %v3960_v48  ;;  %3950 = vadd.xlane.f32.xlu0 %v3949_v19 }
 0x8c4   : > { %3989 = vadd.xlane.f32.xlu1 %v3988_v3  ;;  %3978 = vadd.xlane.f32.xlu0 %v3977_v59 }
 0x8c8   : > { %4017 = vadd.xlane.f32.xlu1 %v4016_v14  ;;  %4006 = vadd.xlane.f32.xlu0 %v4005_v18 }
 0x8cc   : > { %4045 = vadd.xlane.f32.xlu1 %v4044_v25  ;;  %4034 = vadd.xlane.f32.xlu0 %v4033_v26 }
 0x945   : > { %v3919_v27 = vpop.xlane.xlu1 %3918  ;;  %v3896_v23 = vpop.xlane.xlu0 %3895 }
 0x946   : > { %v3920_v28 = vrot.slane %v3919_v27, 4  ;;  %v3897_v32 = vrot.slane %v3896_v23, 4 }
 0x948   : > { %v3921_v29 = vadd.f32 %v3920_v28, %v3919_v27  ;;  %v3898_v30 = vadd.f32 %v3897_v32, %v3896_v23 }
 0x949   : > { %v3930_v36 = vpop.xlane.xlu1 %3929  ;;  %v3908_v13 = vpop.xlane.xlu0 %3907 }
 0x94a   : > { %v3922_v43 = vrot.slane %v3921_v29, 2  ;;  %v3899_v55 = vrot.slane %v3898_v30, 2  ;;  %v3931_v42 = vrot.slane %v3930_v36, 4  ;;  %v3909_v35 = vrot.slane %v3908_v13, 4 }
 0x94c   : > { %v3932_v10 = vadd.f32 %v3931_v42, %v3930_v36  ;;  %v3910_v37 = vadd.f32 %v3909_v35, %v3908_v13  ;;  %v3900_v38 = vadd.f32 %v3899_v55, %v3898_v30  ;;  %v3923_v39 = vadd.f32 %v3922_v43, %v3921_v29 }
 0x94d   : > { %v3951_v34 = vpop.xlane.xlu0 %3950  ;;  %v3962_v51 = vpop.xlane.xlu1 %3961 }
 0x94e   : > { %v3933_v40 = vrot.slane %v3932_v10, 2  ;;  %v3911_v41 = vrot.slane %v3910_v37, 2  ;;  %v3901_v22 = vrot.slane %v3900_v38, 1  ;;  %v3924_v50 = vrot.slane %v3923_v39, 1 }
 0x94f   : > { %v3952_v61 = vrot.slane %v3951_v34, 4  ;;  %v3963_v49 = vrot.slane %v3962_v51, 4 }
 0x950   : > { %v3902_v45 = vadd.f32 %v3901_v22, %v3900_v38  ;;  %v3912_v54 = vadd.f32 %v3911_v41, %v3910_v37  ;;  %v3934_v46 = vadd.f32 %v3933_v40, %v3932_v10  ;;  %v3925_v47 = vadd.f32 %v3924_v50, %v3923_v39 }
 0x951   : > { %v3953_v4 = vadd.f32 %v3952_v61, %v3951_v34  ;;  %v3964_v62 = vadd.f32 %v3963_v49, %v3962_v51  ;;  %v3979_v11 = vpop.xlane.xlu0 %3978  ;;  %v3990_v12 = vpop.xlane.xlu1 %3989 }
 0x952   : > { %4441 = vpush %v3902_v45  ;;  %v3913_v58 = vrot.slane %v3912_v54, 1  ;;  %v3935_v53 = vrot.slane %v3934_v46, 1  ;;  %v3980_v60 = vrot.slane %v3979_v11, 4  ;;  %v3991_v33 = vrot.slane %v3990_v12, 4 }
 0x953   : > { %v3954_v6 = vrot.slane %v3953_v4, 2  ;;  %v3965_v7 = vrot.slane %v3964_v62, 2 }
 0x954   : > { %v3914_v56 = vadd.f32 %v3913_v58, %v3912_v54  ;;  %v3936_v57 = vadd.f32 %v3935_v53, %v3934_v46  ;;  %v3981_v15 = vadd.f32 %v3980_v60, %v3979_v11  ;;  %v3992_v48 = vadd.f32 %v3991_v33, %v3990_v12 }
 0x955   : > { %v3955_v63 = vadd.f32 %v3954_v6, %v3953_v4  ;;  %v3966_v2 = vadd.f32 %v3965_v7, %v3964_v62  ;;  %v4007_v21 = vpop.xlane.xlu0 %4006  ;;  %v4018_v25 = vpop.xlane.xlu1 %4017 }
 0x956   : > { %4443 = vpush %v3914_v56  ;;  %v3982_v19 = vrot.slane %v3981_v15, 2  ;;  %v3993_v52 = vrot.slane %v3992_v48, 2  ;;  %v4008_v26 = vrot.slane %v4007_v21, 4  ;;  %v4019_v27 = vrot.slane %v4018_v25, 4 }
 0x957   : > { %4445 = vpush %v3925_v47  ;;  %v3956_v5 = vrot.slane %v3955_v63, 1  ;;  %v3967_v16 = vrot.slane %v3966_v2, 1 }
 0x958   : > { %4447 = vpush %v3936_v57  ;;  %v3983_v3 = vadd.f32 %v3982_v19, %v3981_v15  ;;  %v3994_v59 = vadd.f32 %v3993_v52, %v3992_v48  ;;  %v4009_v23 = vadd.f32 %v4008_v26, %v4007_v21  ;;  %v4020_v28 = vadd.f32 %v4019_v27, %v4018_v25 }
 0x959   : > { %v3957_v0 = vadd.f32 %v3956_v5, %v3955_v63  ;;  %v3968_v31 = vadd.f32 %v3967_v16, %v3966_v2  ;;  %v4035_v41 = vpop.xlane.xlu0 %4034  ;;  %v4046_v22 = vpop.xlane.xlu1 %4045 }
 0x95a   : > { %v3984_v17 = vrot.slane %v3983_v3, 1  ;;  %v3995_v9 = vrot.slane %v3994_v59, 1  ;;  %v4010_v29 = vrot.slane %v4009_v23, 2  ;;  %v4021_v36 = vrot.slane %v4020_v28, 2 }
 0x95b   : > { %v4036_v45 = vrot.slane %v4035_v41, 4  ;;  %v4047_v54 = vrot.slane %v4046_v22, 4 }
 0x95c   : > { %v3985_v18 = vadd.f32 %v3984_v17, %v3983_v3  ;;  %v3996_v20 = vadd.f32 %v3995_v9, %v3994_v59  ;;  %v4011_v42 = vadd.f32 %v4010_v29, %v4009_v23  ;;  %v4022_v35 = vadd.f32 %v4021_v36, %v4020_v28 }
 0x95d   : > { %v4037_v46 = vadd.f32 %v4036_v45, %v4035_v41  ;;  %v4048_v50 = vadd.f32 %v4047_v54, %v4046_v22 }
 0x95e   : > { %v4012_v10 = vrot.slane %v4011_v42, 1  ;;  %v4023_v37 = vrot.slane %v4022_v35, 1 }
 0x95f   : > { %v4038_v58 = vrot.slane %v4037_v46, 2  ;;  %v4049_v53 = vrot.slane %v4048_v50, 2 }
 0x960   : > { %v4013_v39 = vadd.f32 %v4012_v10, %v4011_v42  ;;  %v4024_v40 = vadd.f32 %v4023_v37, %v4022_v35 }
 0x961   : > { %v4039_v34 = vadd.f32 %v4038_v58, %v4037_v46  ;;  %v4050_v51 = vadd.f32 %v4049_v53, %v4048_v50 }
 0x963   : > { %v4040_v61 = vrot.slane %v4039_v34, 1  ;;  %v4051_v49 = vrot.slane %v4050_v51, 1 }
 0x965   : > { %v4041_v62 = vadd.f32 %v4040_v61, %v4039_v34  ;;  %v4052_v6 = vadd.f32 %v4051_v49, %v4050_v51 }
 0x983   : > { %s5633_s10 = spop %4441 }
 0x984   : > { %s3904_s29 = smul.f32 0.03125, %s5633_s10 }
 0x986   : > { %v3946_v32 = vstv %s3904_s29 }
 0x987   : > { %s5635_s23 = spop %4443  ;;  %v3947_v30 = vsel %vm3848_vm12, %v3946_v32, 0.0 }
 0x988   : > { %s4446_s24 = spop %4445 }
 0x989   : > { %s3938_s25 = smul.f32 %s4446_s24, %s4446_s24  ;;  %s4448_s26 = spop %4447 }
 0x98b   : > { %s3939_s15 = smul.f32 0.03125, %s3938_s25 }
 0x98d   : > { %s3940_s12 = ssub.f32 %s4448_s26, %s3939_s15 }
 0x98f   : > { %v3941_v8 = vstv %s3940_s12 }
 0x990   : > { %4615 = vrcp.f32 %v3941_v8 }
 0x99a   : > { %v4616_v44 = vpop.eup %4615 }
 0x99b   : > { %4449 = vpush %v4616_v44 }
 0x99c   : > { %4451 = vpush %v3957_v0 }
 0x99d   : > { %4453 = vpush %v3968_v31 }
 0x9cc   : > { %s5637_s27 = spop %4449 }
 0x9cd   : > { %s5639_s28 = spop %4451  ;;  %s3944_s15 = smul.f32 %s5637_s27, %s5635_s23 }
 0x9ce   : > { %s4454_s18 = spop %4453 }
 0x9cf   : > { %v3970_v24 = vstv %s4454_s18  ;;  %s3945_s26 = ssub.f32 1.0, %s3944_s15 }
 0x9d0   : > { %4617 = vrcp.f32 %v3970_v24 }
 0x9d1   : > { %v4061_v16 = vstv %s3945_s26 }
 0x9da   : > { %v4618_v14 = vpop.eup %4617 }
 0x9db   : > { %4455 = vpush %v4618_v14 }
 0x9dc   : > { %4457 = vpush %v3985_v18 }
 0x9dd   : > { %4459 = vpush %v3996_v20 }
 0xa0c   : > { %s4456_s11 = spop %4455 }
 0xa0d   : > { %s3973_s13 = smul.f32 %s4456_s11, %s5639_s28  ;;  %s5643_s14 = spop %4457 }
 0xa0e   : > { %s4460_s16 = spop %4459 }
 0xa0f   : > { %v3974_v13 = vstv %s3973_s13  ;;  %v3998_v43 = vstv %s4460_s16 }
 0xa10   : > { %v3975_v55 = vsel %vm3851_vm13, %v3974_v13, %v3947_v30  ;;  %4619 = vrcp.f32 %v3998_v43 }
 0xa1a   : > { %v4620_v38 = vpop.eup %4619 }
 0xa1b   : > { %4461 = vpush %v4620_v38 }
 0xa1c   : > { %4463 = vpush %v4013_v39 }
 0xa1d   : > { %4465 = vpush %v4024_v40 }
 0xa4c   : > { %s4462_s17 = spop %4461 }
 0xa4d   : > { %s4001_s19 = smul.f32 %s4462_s17, %s5643_s14  ;;  %s4464_s20 = spop %4463 }
 0xa4e   : > { %s4466_s21 = spop %4465 }
 0xa4f   : > { %v4002_v56 = vstv %s4001_s19  ;;  %v4026_v57 = vstv %s4466_s21 }
 0xa50   : > { %v4003_v47 = vsel %vm3857_vm15, %v4002_v56, %v3975_v55  ;;  %4621 = vrcp.f32 %v4026_v57 }
 0xa5a   : > { %v4622_v4 = vpop.eup %4621 }
 0xa5b   : > { %4467 = vpush %v4622_v4 }
 0xa5c   : > { %4469 = vpush %v4041_v62 }
 0xa5d   : > { %4471 = vpush %v4052_v6 }
 0xa8c   : > { %s4468_s22 = spop %4467 }
 0xa8d   : > { %s4029_s10 = smul.f32 %s4468_s22, %s4464_s20  ;;  %s4470_s24 = spop %4469 }
 0xa8e   : > { %s4472_s25 = spop %4471 }
 0xa8f   : > { %v4030_v7 = vstv %s4029_s10  ;;  %v4054_v8 = vstv %s4472_s25 }
 0xa90   : > { %v4031_v63 = vsel %vm3863_vm1, %v4030_v7, %v4003_v47  ;;  %4623 = vrcp.f32 %v4054_v8 }
 0xa9a   : > { %v4624_v2 = vpop.eup %4623 }
 0xa9b   : > { %4473 = vpush %v4624_v2 }
 0xacc   : > { %s4474_s12 = spop %4473 }
 0xacd   : > { %s4057_s28 = smul.f32 %s4474_s12, %s4470_s24 }
 0xacf   : > { %v4058_v5 = vstv %s4057_s28 }
 0xad0   : > { %v4059_v44 = vsel %vm3869_vm3, %v4058_v5, %v4031_v63 }
 0xad1   : > { %v4062_v0 = vsel %vm4060_vm9, %v4061_v16, %v4059_v44 }
 0xad2   : > { %4063 = vst [vmem:[%s5674_s9] sm:$0x1] %v4062_v0 }
 0xad3 PF: > { %s20_s30 = sadd.s32 1, %s4663_s30  }
 0xad4   : > { %p17_p6 = scmp.ge.s32.totalorder %s20_s30, 6  }
 0xad6   :  { %19 = sbr.rel (!%p17_p6) target bundleno = 1 (0x1), region = 106 }
 0xadd   :  { %4075 = vsyncpa [#allocation5], 1 }
 0xade   :  { %4077 = vsyncpa [#allocation5 + $0x1], 1 }

</bundles_post_ra>
